<compile_context>
chip_gen: v7x
topology: tpu7x:2x2x1
jax: 0.10.0
libtpu: 0.0.40
codegen_flags: <defaults>
</compile_context>

<pallas_src>
import jax
import jax.numpy as jnp
from jax.experimental import pallas as pl
from jax.experimental.pallas import tpu as pltpu


def _make_kernel(M: int, TM: int, needs_mask: bool):
    def kernel(fvar_ref, ffix_ref, out_ref):
        fv = fvar_ref[...].astype(jnp.float32)
        ff = ffix_ref[...].astype(jnp.float32)

        # Numerically-stable row-wise softmax (== dim=1 of the (M, M) input).
        ev = jnp.exp(fv - jnp.max(fv, axis=-1, keepdims=True))
        ef = jnp.exp(ff - jnp.max(ff, axis=-1, keepdims=True))
        sv = ev * pl.reciprocal(jnp.sum(ev, axis=-1, keepdims=True), approx=True)
        sf = ef * pl.reciprocal(jnp.sum(ef, axis=-1, keepdims=True), approx=True)

        d = sf - sv
        if needs_mask:
            # Zero out contributions from padded tail rows of the last tile.
            row = (jax.lax.broadcasted_iota(jnp.int32, (TM, 1), 0)
                   + pl.program_id(0) * TM)
            d = jnp.where(row < M, d, 0.0)

        tile_sum = jnp.sum(d * d)  # scalar partial sum for this row tile
        # Lane-dense splat into this tile's private (1, 8, 128) output block.
        out_ref[...] = jnp.zeros(out_ref.shape, jnp.float32) + tile_sum

    return kernel


def _choose_block_rows(M: int, itemsize_a: int, itemsize_b: int) -> int:
    """Pick a row-tile size: multiple of the sublane tile, VMEM-bounded."""
    min_item = min(itemsize_a, itemsize_b)
    sub = {4: 8, 2: 16, 1: 32}.get(min_item, 8)
    m_pad = -(-M // sub) * sub
    # 2 inputs x 2 pipeline buffers; keep total <= ~32 MiB so it also fits
    # v7x's 64 MiB physical VMEM with headroom.
    max_buf_bytes = 32 * 1024 * 1024
    per_row_bytes = 2 * M * (itemsize_a + itemsize_b)
    cap = max(sub, (max_buf_bytes // per_row_bytes) // sub * sub)
    return int(max(sub, min(256, m_pad, cap)))


def regularization_loss(f_var: jax.Array, f_fix: jax.Array, *,
                        block_rows: int | None = None) -> jax.Array:
    """Pallas equivalent of Regularization.forward for square (M, M) inputs.

    Returns a shape-(1,) float32 array, matching PyTorch's
    `.view(-1, 1).sum(0)` output shape.
    """
    assert f_var.shape == f_fix.shape
    assert f_var.ndim == 2 and f_var.shape[0] == f_var.shape[1], \
        "expected square (M, M) matrices"
    M = f_var.shape[0]
    it_a = jnp.dtype(f_var.dtype).itemsize
    it_b = jnp.dtype(f_fix.dtype).itemsize

    tm = int(block_rows) if block_rows is not None else _choose_block_rows(M, it_a, it_b)
    num_tiles = pl.cdiv(M, tm)
    needs_mask = (num_tiles * tm != M)

    # Explicit scoped-VMEM budget: pipeline buffers + small headroom.
    buf_bytes = 2 * tm * M * (it_a + it_b) + 2 * 8 * 128 * 4
    vmem_limit = int(min(max(buf_bytes + (4 << 20), 16 << 20), 48 << 20))

    partials = pl.pallas_call(
        _make_kernel(M, tm, needs_mask),
        out_shape=jax.ShapeDtypeStruct((num_tiles, 8, 128), jnp.float32),
        grid_spec=pltpu.PrefetchScalarGridSpec(
            num_scalar_prefetch=0,
            grid=(num_tiles,),
            in_specs=[
                pl.BlockSpec((tm, M), lambda i: (i, 0)),
                pl.BlockSpec((tm, M), lambda i: (i, 0)),
            ],
            out_specs=pl.BlockSpec((1, 8, 128), lambda i: (i, 0, 0)),
        ),
        compiler_params=pltpu.CompilerParams(
            dimension_semantics=("parallel",),
            vmem_limit_bytes=vmem_limit,
        ),
    )(f_var, f_fix)

    bsz = M
    loss = jnp.sum(partials[:, 0, 0]) / jnp.float32(bsz * bsz)
    return loss.reshape((1,))


def _reference(f_var, f_fix):
    bsz = f_var.shape[0]
    sv = jax.nn.softmax(f_var.astype(jnp.float32), axis=1)
    sf = jax.nn.softmax(f_fix.astype(jnp.float32), axis=1)
    d = sf - sv
    return (jnp.sum(d * d) / (bsz * bsz)).reshape((1,))


if __name__ == "__main__":
    key = jax.random.PRNGKey(0)
    k1, k2, k3, k4, k5, k6 = jax.random.split(key, 6)

    # Tolerance is relaxed slightly (rtol=5e-3) to accommodate the
    # approximate EUP reciprocal in the softmax denominators; a structurally
    # wrong kernel would miss by orders of magnitude more.
    RTOL, ATOL = 5e-3, 1e-9

    # Case 1: aligned f32 matrices, multi-tile grid (TM=256 -> 2 steps).
    M1 = 512
    a1 = jax.random.normal(k1, (M1, M1), dtype=jnp.float32)
    b1 = jax.random.normal(k2, (M1, M1), dtype=jnp.float32)
    out1 = regularization_loss(a1, b1)
    jax.block_until_ready(out1)
    ref1 = _reference(a1, b1)
    assert out1.shape == (1,)
    assert jnp.allclose(out1, ref1, rtol=RTOL, atol=ATOL), (out1, ref1)

    # Case 2: M not a multiple of the row tile -> exercises tail-row masking.
    M2 = 200
    a2 = jax.random.normal(k3, (M2, M2), dtype=jnp.float32)
    b2 = jax.random.normal(k4, (M2, M2), dtype=jnp.float32)
    out2 = regularization_loss(a2, b2, block_rows=64)
    jax.block_until_ready(out2)
    ref2 = _reference(a2, b2)
    assert jnp.allclose(out2, ref2, rtol=RTOL, atol=ATOL), (out2, ref2)

    # Case 3: bf16 inputs stay bf16 in HBM; cast to f32 happens in-kernel.
    M3 = 256
    a3 = jax.random.normal(k5, (M3, M3), dtype=jnp.float32).astype(jnp.bfloat16)
    b3 = jax.random.normal(k6, (M3, M3), dtype=jnp.float32).astype(jnp.bfloat16)
    out3 = regularization_loss(a3, b3, block_rows=128)
    jax.block_until_ready(out3)
    ref3 = _reference(a3, b3)
    assert jnp.allclose(out3, ref3, rtol=RTOL, atol=ATOL), (out3, ref3)

    print("KERNEL_OK")
</pallas_src>

<mosaic_0001>
module attributes {stable_mosaic.version = 11 : i64} {
  func.func @kernel(%arg0: i32, %arg1: memref<256x512xf32, #tpu.memory_space<vmem>>, %arg2: memref<256x512xf32, #tpu.memory_space<vmem>>, %arg3: memref<1x8x128xf32, #tpu.memory_space<vmem>>) attributes {dimension_semantics = [#tpu.dimension_semantics<parallel>], iteration_bounds = array<i64: 2>, scalar_prefetch = 0 : i64, scratch_operands = 0 : i64, tpu.core_type = #tpu.core_type<tc>, window_params = [{transform_indices = @transform_0, window_bounds = array<i64: 256, 512>}, {transform_indices = @transform_1, window_bounds = array<i64: 256, 512>}, {transform_indices = @transform_2, window_bounds = array<i64: 1, 8, 128>}]} {
    %c0 = arith.constant 0 : index
    %c0_0 = arith.constant 0 : index
    %0 = vector.load %arg1[%c0, %c0_0] : memref<256x512xf32, #tpu.memory_space<vmem>>, vector<256x512xf32>
    %c0_1 = arith.constant 0 : index
    %c0_2 = arith.constant 0 : index
    %1 = vector.load %arg2[%c0_1, %c0_2] : memref<256x512xf32, #tpu.memory_space<vmem>>, vector<256x512xf32>
    %cst = arith.constant dense<0xFF800000> : vector<256xf32>
    %2 = vector.multi_reduction <maximumf>, %0, %cst [1] : vector<256x512xf32> to vector<256xf32>
    %3 = vector.shape_cast %2 : vector<256xf32> to vector<256x1xf32>
    %4 = vector.broadcast %3 : vector<256x1xf32> to vector<256x512xf32>
    %5 = arith.subf %0, %4 : vector<256x512xf32>
    %6 = math.exp %5 : vector<256x512xf32>
    %cst_3 = arith.constant dense<0xFF800000> : vector<256xf32>
    %7 = vector.multi_reduction <maximumf>, %1, %cst_3 [1] : vector<256x512xf32> to vector<256xf32>
    %8 = vector.shape_cast %7 : vector<256xf32> to vector<256x1xf32>
    %9 = vector.broadcast %8 : vector<256x1xf32> to vector<256x512xf32>
    %10 = arith.subf %1, %9 : vector<256x512xf32>
    %11 = math.exp %10 : vector<256x512xf32>
    %cst_4 = arith.constant dense<0.000000e+00> : vector<256xf32>
    %12 = vector.multi_reduction <add>, %6, %cst_4 [1] : vector<256x512xf32> to vector<256xf32>
    %13 = vector.shape_cast %12 : vector<256xf32> to vector<256x1xf32>
    %14 = tpu.reciprocal %13 {approx = true} : vector<256x1xf32> -> vector<256x1xf32>
    %15 = vector.broadcast %14 : vector<256x1xf32> to vector<256x512xf32>
    %16 = arith.mulf %6, %15 : vector<256x512xf32>
    %cst_5 = arith.constant dense<0.000000e+00> : vector<256xf32>
    %17 = vector.multi_reduction <add>, %11, %cst_5 [1] : vector<256x512xf32> to vector<256xf32>
    %18 = vector.shape_cast %17 : vector<256xf32> to vector<256x1xf32>
    %19 = tpu.reciprocal %18 {approx = true} : vector<256x1xf32> -> vector<256x1xf32>
    %20 = vector.broadcast %19 : vector<256x1xf32> to vector<256x512xf32>
    %21 = arith.mulf %11, %20 : vector<256x512xf32>
    %22 = arith.subf %21, %16 : vector<256x512xf32>
    %23 = arith.mulf %22, %22 : vector<256x512xf32>
    %24 = vector.shape_cast %23 : vector<256x512xf32> to vector<1x256x512xf32>
    %cst_6 = arith.constant dense<0.000000e+00> : vector<1xf32>
    %25 = vector.multi_reduction <add>, %24, %cst_6 [1, 2] : vector<1x256x512xf32> to vector<1xf32>
    %26 = vector.shape_cast %25 : vector<1xf32> to vector<1x1x1xf32>
    %27 = vector.extract %26[0, 0, 0] : f32 from vector<1x1x1xf32>
    %cst_7 = arith.constant 0.000000e+00 : f32
    %28 = vector.broadcast %cst_7 : f32 to vector<1x8x128xf32>
    %29 = vector.broadcast %27 : f32 to vector<1x8x128xf32>
    %30 = arith.addf %28, %29 : vector<1x8x128xf32>
    %c0_8 = arith.constant 0 : index
    %c0_9 = arith.constant 0 : index
    %c0_10 = arith.constant 0 : index
    %31 = vector.load %arg3[%c0_8, %c0_9, %c0_10] : memref<1x8x128xf32, #tpu.memory_space<vmem>>, vector<1x8x128xf32>
    tpu.vector_store %arg3[%c0_8, %c0_9, %c0_10], %30 {strides = array<i32>} : memref<1x8x128xf32, #tpu.memory_space<vmem>>, vector<1x8x128xf32>,
    return
  }
  func.func @transform_0(%arg0: i32) -> (i32, i32) {
    %c0_i32 = arith.constant 0 : i32
    %c0_i32_0 = arith.constant 0 : i32
    return %arg0, %c0_i32 : i32, i32
  }
  func.func @transform_1(%arg0: i32) -> (i32, i32) {
    %c0_i32 = arith.constant 0 : i32
    %c0_i32_0 = arith.constant 0 : i32
    return %arg0, %c0_i32 : i32, i32
  }
  func.func @transform_2(%arg0: i32) -> (i32, i32, i32) {
    %c0_i32 = arith.constant 0 : i32
    %c0_i32_0 = arith.constant 0 : i32
    %c0_i32_1 = arith.constant 0 : i32
    return %arg0, %c0_i32, %c0_i32_0 : i32, i32, i32
  }
}

</mosaic_0001>

<bundles_post_ra>
// kernel: tpu_custom_call.1
= control target key start
LH: loop header
LB: loop body
LE: loop exit
PB: predicated region body
PF: predicated region fallthrough
CT: control target
= control target key end

     0   :  { %7 = vsyncpa [#allocation3], 0  ;;  %s6304_s0 = inlined_call_operand.hbm [shape: f32[512,512], index: 0, kind: input, shape index: {}]   ;;  %s6305_s1 = inlined_call_operand.hbm [shape: f32[512,512], index: 1, kind: input, shape index: {}]   ;;  %s6306_s2 = inlined_call_operand.hbm [shape: f32[2,8,128], index: 2, kind: output, shape index: {}]  }
   0x1   :  { %9 = vsyncpa [#allocation3 + $0x1], 0 }
   0x2   :  { %10 = vsyncpa [#allocation6], 0 }
   0x3   :  { %12 = vsyncpa [#allocation6 + $0x1], 0 }
   0x4   :  { %13 = vsyncpa [#allocation4], 0 }
   0x5   :  { %15 = vsyncpa [#allocation4 + $0x1], 0  ;;  %s3747_s9 = smov 0   ;;  %s3749_s10 = smov 0  }
   0x6   :  { %s3751_s11 = smov 0   ;;  %s3753_s12 = smov 0  }
   0x7 LB: > { %s3768_s13 = sadd.s32 4294967295, %s3725_s12   ;;  %s2692_s14 = sadd.s32 4294967294, %s3725_s12   ;;  %s3725_s12 = sphi %s3753_s12, %s6996_s12   ;;  %s3721_s11 = sphi %s3751_s11, %s6995_s11   ;;  %s3717_s10 = sphi %s3749_s10, %s6994_s10   ;;  %s3713_s9 = sphi %s3747_s9, %s6993_s9  }
   0x8   : > { %s3772_s15 = sadd.s32 1, %s3725_s12   ;;  %s28_s16 = sadd.s32 1, %s3721_s11 }
   0x9   : > { %s25_s17 = ssub.s32 %s3725_s12, %s3772_s15  ;;  %p35_p0 = scmp.ne.s32.totalorder %s3721_s11, %s3717_s10 }
   0xa   : > { %p26_p1 = scmp.eq.s32.totalorder %s25_s17, 0  ;;  %p36_p2 = scmp.eq.s32.totalorder %s3725_s12, 0 }
   0xb   : > { %p41_p3 = scmp.ne.s32.totalorder %s3717_s10, %s3713_s9  ;;  %p42_p4 = scmp.eq.s32.totalorder %s3768_s13, 0 }
   0xc   : > { %s3784_s18 = scalar_select %p26_p1, %s3721_s11, %s28_s16  }
   0xd   : > { %p3786_p5 = por %p36_p2, %p35_p0  ;;  %p3790_p6 = por %p42_p4, %p41_p3 }
   0xe   : > { %p91_p7 = scmp.eq.s32.totalorder %s3768_s13, 1  ;;  %p97_p8 = scmp.eq.s32.totalorder %s2692_s14, 1 }
   0xf   : > { %s6524_s20 = scalar_select %p3790_p6, 1, 0 }
  0x10   : > { %p2734_p10 = scmp.lt.s32.totalorder %s3725_s12, 2  ;;  %p3797_p11 = por %p91_p7, %p35_p0 }
  0x11   : > { %p3801_p12 = por %p97_p8, %p41_p3  ;;  %s3806_s23 = sand.u32 1, %s3721_s11  }
  0x12   : > { %s6525_s21 = scalar_select %p3797_p11, 1, 0 }
  0x13   : > { %s6526_s22 = scalar_select %p3801_p12, 1, 0 }
  0x14   : > { %s2712_s24 = sshll.u32 %s3725_s12, 14  ;;  %s2695_s25 = sshll.u32 %s3806_s23, 10 }
  0x15   : > { %s3815_s28 = scalar_lea.hbm %s6304_s0, %s2712_s24  ;;  %s121_s29 = scalar_lea.vmem [#allocation2], %s2695_s25 }
  0x16   : > { %s129_s30 = sshll.u32 %s121_s29, 4  ;;  %p3821_p13 = pnand %p2734_p10, %p3786_p5  ;;  %s3825_s30 = int_to_ptr.vmem [resolvable:$true] %s129_s30 }
  0x17   : > { %s118_s4 = scalar_lea.sflag [#allocation3], %s3806_s23  ;;  %s3595_s5 = scalar_lea.hbm %s3815_s28, 16384 }
  0x18   : > { %p3596_p0 = scmp.ne.s32.totalorder %s3815_s28, %s3595_s5  ;;  %p3597_p1 = pneg %p3821_p13 }
  0x19   : > { %s3600_s8 = scalar_lea.hbm %s6304_s0, 32768  ;;  %p3601_p4 = scmp.lt.u32.totalorder %s3815_s28, %s6304_s0 }
  0x1a   : > { %p3598_p2 = pnand %p3597_p1, %p3596_p0  ;;  %p3602_p5 = scmp.lt.u32.totalorder %s3600_s8, %s3595_s5 }
  0x1b   : > { %p3604_p8 = scmp.lt.u32.totalorder %s3595_s5, %s3815_s28 }
  0x1c   : > { %p3599_p3 = pneg %p3598_p2  ;;  %p3603_p7 = por %p3602_p5, %p3601_p4 }
  0x1e   : > { %p3605_p10 = por %p3604_p8, %p3603_p7 }
  0x20   : > { %p3606_p9 = pnand %p3605_p10, %p3599_p3 }
  0x22   : > { %3609 = shalt.err (!%p3606_p9)
}
  0x23   : > { %s3610_s17 = scalar_lea.vmem %s3825_s30, 16384  ;;  %s3727_s19 = smov [#allocation2]  }
  0x24   : > { %p3611_p0 = scmp.ne.s32.totalorder %s3825_s30, %s3610_s17  ;;  %s3615_s26 = sshll.u32 %s3727_s19, 4  ;;  %s3616_s26 = int_to_ptr.vmem [resolvable:$false] %s3615_s26 }
  0x25   : > { %s3617_s27 = scalar_lea.vmem %s3616_s26, 32768  ;;  %p3618_p11 = scmp.lt.s32.totalorder %s3825_s30, %s3616_s26 }
  0x26   : > { %p3613_p2 = pnand %p3611_p0, %p3597_p1  ;;  %p3619_p4 = scmp.lt.s32.totalorder %s3617_s27, %s3610_s17 }
  0x28   : > { %p3614_p12 = pneg %p3613_p2  ;;  %p3620_p5 = por %p3619_p4, %p3618_p11 }
  0x2a   : > { %p3621_p7 = pnand %p3620_p5, %p3614_p12 }
  0x2c   : > { %3624 = shalt.err (!%p3621_p7)
}
  0x2d   : > { %s3728_s29 = smov 512   ;;  %s3729_s5 = smov 32  }
  0x2e   : > { %2726 = dma.hbm_to_vmem [thread:$0]  (!%p3821_p13), %s3815_s28, 16384, %s3825_s30, %s118_s4, %s3728_s29, %s3728_s29, %s3729_s5  }
  0x2f   : > { %p2703_p9 = scmp.ge.s32.totalorder %s3725_s12, 1  ;;  %p159_p11 = scmp.lt.s32.totalorder %s3725_s12, 3 }
  0x30   : > { %s3869_s14 = scalar_lea.hbm %s6305_s1, %s2712_s24  ;;  %s143_s16 = scalar_lea.vmem [#allocation5], %s2695_s25 }
  0x31   : > { %p3860_p12 = pnand %p2703_p9, %p159_p11  ;;  %s151_s17 = sshll.u32 %s143_s16, 4  ;;  %s3873_s17 = int_to_ptr.vmem [resolvable:$true] %s151_s17 }
  0x32   : > { %s140_s28 = scalar_lea.sflag [#allocation6], %s3806_s23  ;;  %s3625_s30 = scalar_lea.hbm %s3869_s14, 16384 }
  0x33   : > { %p3626_p3 = scmp.ne.s32.totalorder %s3869_s14, %s3625_s30  ;;  %s3630_s24 = scalar_lea.hbm %s6305_s1, 32768 }
  0x34   : > { %p3631_p0 = scmp.lt.u32.totalorder %s3869_s14, %s6305_s1  ;;  %p3632_p2 = scmp.lt.u32.totalorder %s3630_s24, %s3625_s30 }
  0x35   : > { %p3628_p8 = pnand %p3626_p3, %p3597_p1  ;;  %p3634_p5 = scmp.lt.u32.totalorder %s3625_s30, %s3869_s14 }
  0x36   : > { %p3633_p4 = por %p3632_p2, %p3631_p0 }
  0x37   : > { %p3629_p10 = pneg %p3628_p8 }
  0x38   : > { %p3635_p7 = por %p3634_p5, %p3633_p4 }
  0x3a   : > { %p3636_p9 = pnand %p3635_p7, %p3629_p10 }
  0x3c   : > { %3639 = shalt.err (!%p3636_p9)
}
  0x3d   : > { %s3640_s25 = scalar_lea.vmem %s3873_s17, 16384  ;;  %s3730_s7 = smov [#allocation5]  }
  0x3e   : > { %p3641_p11 = scmp.ne.s32.totalorder %s3873_s17, %s3640_s25  ;;  %s3645_s8 = sshll.u32 %s3730_s7, 4  ;;  %s3646_s8 = int_to_ptr.vmem [resolvable:$false] %s3645_s8 }
  0x3f   : > { %s3647_s16 = scalar_lea.vmem %s3646_s8, 32768  ;;  %p3648_p6 = scmp.lt.s32.totalorder %s3873_s17, %s3646_s8 }
  0x40   : > { %p3643_p3 = pnand %p3641_p11, %p3597_p1  ;;  %p3649_p0 = scmp.lt.s32.totalorder %s3647_s16, %s3640_s25 }
  0x42   : > { %p3644_p8 = pneg %p3643_p3  ;;  %p3650_p2 = por %p3649_p0, %p3648_p6 }
  0x44   : > { %p3651_p4 = pnand %p3650_p2, %p3644_p8 }
  0x46   : > { %3654 = shalt.err (!%p3651_p4)
}
  0x47   : > { %2729 = dma.hbm_to_vmem [thread:$0]  (!%p3821_p13), %s3869_s14, 16384, %s3873_s17, %s140_s28, %s3728_s29, %s3728_s29, %s3729_s5  }
  0x48   : > { %163 = sbr.rel (%p3860_p12) target bundleno = 1091 (0x443), region = 28 }
  0x4f   : > { %s3907_s30 = sand.u32 1, %s3717_s10   ;;  %p6529_p6 = scmp.ne.s32.totalorder %s6524_s20, 0 }
  0x50   : > { %s2704_s4 = sshll.u32 %s3907_s30, 10  ;;  %s166_s19 = scalar_lea.sflag [#allocation3], %s3907_s30 }
  0x51   : > { %s3911_s3 = scalar_lea.vmem [#allocation2], %s2704_s4 }
  0x52   : > { %3700 = dma.done.wait (%p6529_p6), %s166_s19, 16384  }
  0x53   : > { %3702 = vsyncadd (%p6529_p6), %s166_s19, 4294950912  ;;  %s175_s23 = scalar_lea.sflag [#allocation6], %s3907_s30  ;;  %s3918_s29 = scalar_lea.vmem [#allocation5], %s2704_s4 }
  0x54   : > { %3704 = dma.done.wait (%p6529_p6), %s175_s23, 16384  }
  0x55   : > { %3706 = vsyncadd (%p6529_p6), %s175_s23, 4294950912  ;;  %v3925_v0 = vld [vmem:[%s3911_s3] sm:$0xff]  ;;  %v3928_v1 = vld [vmem:[%s3911_s3 + $0x8] sm:$0xff]  ;;  %s2706_s20 = sshll.u32 %s3907_s30, 3  ;;  %s2708_s14 = sshll.u32 %s3768_s13, 7 }
  0x56   : > { %v3931_v2 = vld [vmem:[%s3911_s3 + $0x10] sm:$0xff]  ;;  %v462_v3 = vmax.f32 %v3925_v0, %v3928_v1  ;;  %v3936_v4 = vld [vmem:[%s3911_s3 + $0x20] sm:$0xff]  ;;  %v3939_v5 = vld [vmem:[%s3911_s3 + $0x28] sm:$0xff]  ;;  %s203_s5 = scalar_lea.vmem [#allocation7], %s2706_s20  ;;  %s6262_s26 = scalar_lea.hbm %s6306_s2, %s2708_s14 }
  0x57   : > { %v3942_v6 = vld [vmem:[%s3911_s3 + $0x18] sm:$0xff]  ;;  %v3945_v7 = vld [vmem:[%s3911_s3 + $0x30] sm:$0xff]  ;;  %v467_v8 = vmax.f32 %v3936_v4, %v3939_v5  ;;  %v3950_v9 = vld [vmem:[%s3918_s29] sm:$0xff]  ;;  %s2599_s6 = sshll.u32 %s203_s5, 4  ;;  %s2586_s27 = scalar_lea.sflag [#allocation4], %s3907_s30  ;;  %s6257_s6 = int_to_ptr.vmem [resolvable:$true] %s2599_s6 }
  0x58   : > { %v463_v10 = vmax.f32 %v462_v3, %v3931_v2  ;;  %v3954_v11 = vld [vmem:[%s3911_s3 + $0x38] sm:$0xff]  ;;  %v3957_v12 = vld [vmem:[%s3918_s29 + $0x8] sm:$0xff]  ;;  %v3960_v13 = vld [vmem:[%s3918_s29 + $0x10] sm:$0xff]  ;;  %s3655_s25 = scalar_lea.vmem %s6257_s6, 128  ;;  %p6990_p1 = scmp.ne.s32.totalorder %s6525_s21, 0 }
  0x59   : > { %v468_v14 = vmax.f32 %v467_v8, %v3945_v7  ;;  %v1006_v15 = vmax.f32 %v3950_v9, %v3957_v12  ;;  %v3966_v16 = vld [vmem:[%s3918_s29 + $0x20] sm:$0xff]  ;;  %v3969_v17 = vld [vmem:[%s3918_s29 + $0x28] sm:$0xff]  ;;  %v3972_v18 = vld [vmem:[%s3918_s29 + $0x30] sm:$0xff]  ;;  %p3656_p13 = scmp.ne.s32.totalorder %s6257_s6, %s3655_s25  ;;  %s3731_s13 = smov [#allocation7]  }
  0x5a   : > { %v464_v19 = vmax.f32 %v463_v10, %v3942_v6  ;;  %v3976_v20 = vld [vmem:[%s3918_s29 + $0x18] sm:$0xff]  ;;  %v1011_v21 = vmax.f32 %v3966_v16, %v3969_v17  ;;  %v3981_v22 = vld [vmem:[%s3918_s29 + $0x40] sm:$0xff]  ;;  %v3984_v23 = vld [vmem:[%s3918_s29 + $0x48] sm:$0xff]  ;;  %s3659_s7 = sshll.u32 %s3731_s13, 4  ;;  %s3660_s7 = int_to_ptr.vmem [resolvable:$false] %s3659_s7 }
  0x5b   : > { %v469_v24 = vmax.f32 %v468_v14, %v3954_v11  ;;  %v1007_v25 = vmax.f32 %v1006_v15, %v3960_v13  ;;  %v3989_v26 = vld [vmem:[%s3918_s29 + $0x38] sm:$0xff]  ;;  %v3992_v27 = vld [vmem:[%s3918_s29 + $0x50] sm:$0xff]  ;;  %v1016_v28 = vmax.f32 %v3981_v22, %v3984_v23  ;;  %v3997_v29 = vld [vmem:[%s3911_s3 + $0x40] sm:$0xff]  ;;  %p3657_p12 = pnand %p3656_p13, %p6990_p1  ;;  %s3661_s8 = scalar_lea.vmem %s3660_s7, 256 }
  0x5c   : > { %465 = vmax.xlane.f32.xlu0 %v464_v19  ;;  %v1012_v30 = vmax.f32 %v1011_v21, %v3972_v18  ;;  %v4001_v31 = vld [vmem:[%s3918_s29 + $0x58] sm:$0xff]  ;;  %v4004_v32 = vld [vmem:[%s3911_s3 + $0x48] sm:$0xff]  ;;  %v4007_v33 = vld [vmem:[%s3911_s3 + $0x50] sm:$0xff]  ;;  %p3662_p5 = scmp.lt.s32.totalorder %s6257_s6, %s3660_s7  ;;  %p3663_p7 = scmp.lt.s32.totalorder %s3661_s8, %s3655_s25 }
  0x5d   : > { %470 = vmax.xlane.f32.xlu1 %v469_v24  ;;  %v1008_v34 = vmax.f32 %v1007_v25, %v3976_v20  ;;  %v1017_v35 = vmax.f32 %v1016_v28, %v3992_v27  ;;  %v4012_v36 = vld [vmem:[%s3911_s3 + $0x58] sm:$0xff]  ;;  %v472_v37 = vmax.f32 %v3997_v29, %v4004_v32  ;;  %v4017_v38 = vld [vmem:[%s3918_s29 + $0x60] sm:$0xff]  ;;  %v4020_v39 = vld [vmem:[%s3918_s29 + $0x68] sm:$0xff]  ;;  %p3658_p10 = pneg %p3657_p12 }
  0x5e   : > { %v1013_v40 = vmax.f32 %v1012_v30, %v3989_v26  ;;  %v4024_v41 = vld [vmem:[%s3918_s29 + $0x70] sm:$0xff]  ;;  %v1021_v42 = vmax.f32 %v4017_v38, %v4020_v39  ;;  %v4029_v43 = vld [vmem:[%s3911_s3 + $0x60] sm:$0xff]  ;;  %v4032_v44 = vld [vmem:[%s3911_s3 + $0x68] sm:$0xff]  ;;  %p3664_p9 = por %p3663_p7, %p3662_p5 }
  0x5f   : > { %v473_v45 = vmax.f32 %v472_v37, %v4007_v33  ;;  %v4036_v46 = vld [vmem:[%s3911_s3 + $0x70] sm:$0xff]  ;;  %v477_v47 = vmax.f32 %v4029_v43, %v4032_v44  ;;  %v4041_v48 = vld [vmem:[%s3918_s29 + $0x80] sm:$0xff]  ;;  %v1018_v49 = vmax.f32 %v1017_v35, %v4001_v31  ;;  %v4045_v50 = vld [vmem:[%s3918_s29 + $0x78] sm:$0xff] }
  0x60   : > { %1009 = vmax.xlane.f32.xlu0 %v1008_v34  ;;  %v4048_v51 = vld [vmem:[%s3911_s3 + $0x78] sm:$0xff]  ;;  %v4051_v52 = vld [vmem:[%s3918_s29 + $0x88] sm:$0xff]  ;;  %v1022_v54 = vmax.f32 %v1021_v42, %v4024_v41  ;;  %v4059_v57 = vld [vmem:[%s3911_s3 + $0x80] sm:$0xff]  ;;  %p3665_p11 = pnand %p3664_p9, %p3658_p10 }
  0x61   : > { %1014 = vmax.xlane.f32.xlu1 %v1013_v40  ;;  %v474_v53 = vmax.f32 %v473_v45, %v4012_v36  ;;  %v478_v55 = vmax.f32 %v477_v47, %v4036_v46  ;;  %v1026_v56 = vmax.f32 %v4041_v48, %v4051_v52  ;;  %v4062_v58 = vld [vmem:[%s3911_s3 + $0x88] sm:$0xff]  ;;  %v4065_v59 = vld [vmem:[%s3911_s3 + $0x90] sm:$0xff]  ;;  %v4073_v62 = vld [vmem:[%s3918_s29 + $0xa0] sm:$0xff] }
  0x62   : > { %6530 = vst [vmem:[#allocation11_spill] sm:$0xff] %v4062_v58  ;;  %6531 = vst [vmem:[#allocation12_spill] sm:$0xff] %v4065_v59  ;;  %v4068_v60 = vld [vmem:[%s3918_s29 + $0x90] sm:$0xff]  ;;  %v482_v61 = vmax.f32 %v4059_v57, %v4062_v58  ;;  %v4076_v63 = vld [vmem:[%s3918_s29 + $0xa8] sm:$0xff]  ;;  %v1023_v21 = vmax.f32 %v1022_v54, %v4045_v50 }
  0x63   : > { %6532 = vst [vmem:[#allocation13_spill] sm:$0xff] %v4073_v62  ;;  %6533 = vst [vmem:[#allocation14_spill] sm:$0xff] %v4076_v63  ;;  %v4079_v3 = vld [vmem:[%s3911_s3 + $0xa0] sm:$0xff]  ;;  %v479_v8 = vmax.f32 %v478_v55, %v4048_v51  ;;  %v4083_v10 = vld [vmem:[%s3918_s29 + $0x98] sm:$0xff]  ;;  %v1027_v24 = vmax.f32 %v1026_v56, %v4068_v60  ;;  %v1031_v28 = vmax.f32 %v4073_v62, %v4076_v63 }
  0x64   : > { %6534 = vst [vmem:[#allocation15_spill] sm:$0xff] %v4079_v3  ;;  %475 = vmax.xlane.f32.xlu0 %v474_v53  ;;  %v4086_v14 = vld [vmem:[%s3911_s3 + $0x98] sm:$0xff]  ;;  %v483_v15 = vmax.f32 %v482_v61, %v4065_v59  ;;  %v4090_v19 = vld [vmem:[%s3911_s3 + $0xa8] sm:$0xff]  ;;  %v4095_v25 = vld [vmem:[%s3918_s29 + $0xb0] sm:$0xff] }
  0x65   : > { %6535 = vst [vmem:[#allocation16_spill] sm:$0xff] %v4086_v14  ;;  %6536 = vst [vmem:[#allocation17_spill] sm:$0xff] %v4090_v19  ;;  %1019 = vmax.xlane.f32.xlu1 %v1018_v49  ;;  %v4100_v30 = vld [vmem:[%s3911_s3 + $0xb0] sm:$0xff]  ;;  %v487_v34 = vmax.f32 %v4079_v3, %v4090_v19  ;;  %v4105_v35 = vld [vmem:[%s3918_s29 + $0xc0] sm:$0xff]  ;;  %v1028_v55 = vmax.f32 %v1027_v24, %v4083_v10  ;;  %v1032_v56 = vmax.f32 %v1031_v28, %v4095_v25 }
  0x66   : > { %6537 = vst [vmem:[#allocation18_spill] sm:$0xff] %v4095_v25  ;;  %6538 = vst [vmem:[#allocation19_spill] sm:$0xff] %v4100_v30  ;;  %v4108_v37 = vld [vmem:[%s3918_s29 + $0xc8] sm:$0xff]  ;;  %v4111_v40 = vld [vmem:[%s3911_s3 + $0xc0] sm:$0xff]  ;;  %v484_v45 = vmax.f32 %v483_v15, %v4086_v14 }
  0x67   : > { %6539 = vst [vmem:[#allocation20_spill] sm:$0xff] %v4105_v35  ;;  %6540 = vst [vmem:[#allocation21_spill] sm:$0xff] %v4108_v37  ;;  %v4114_v42 = vld [vmem:[%s3911_s3 + $0xc8] sm:$0xff]  ;;  %v4118_v47 = vld [vmem:[%s3918_s29 + $0xb8] sm:$0xff]  ;;  %v488_v53 = vmax.f32 %v487_v34, %v4100_v30  ;;  %v1036_v61 = vmax.f32 %v4105_v35, %v4108_v37 }
  0x68   : > { %6541 = vst [vmem:[#allocation22_spill] sm:$0xff] %v4111_v40  ;;  %6542 = vst [vmem:[#allocation23_spill] sm:$0xff] %v4114_v42  ;;  %480 = vmax.xlane.f32.xlu0 %v479_v8  ;;  %v4121_v49 = vld [vmem:[%s3911_s3 + $0xb8] sm:$0xff]  ;;  %v492_v54 = vmax.f32 %v4111_v40, %v4114_v42  ;;  %v4131_v8 = vld [vmem:[%s3911_s3 + $0xd0] sm:$0xff]  ;;  %v1033_v30 = vmax.f32 %v1032_v56, %v4118_v47 }
  0x69   : > { %6543 = vst [vmem:[#allocation24_spill] sm:$0xff] %v4118_v47  ;;  %6544 = vst [vmem:[#allocation25_spill] sm:$0xff] %v4121_v49  ;;  %1024 = vmax.xlane.f32.xlu1 %v1023_v21  ;;  %v4134_v15 = vld [vmem:[%s3911_s3 + $0xe0] sm:$0xff]  ;;  %v4137_v19 = vld [vmem:[%s3911_s3 + $0xe8] sm:$0xff]  ;;  %v489_v28 = vmax.f32 %v488_v53, %v4121_v49 }
  0x6a   : > { %6545 = vst [vmem:[#allocation26_spill] sm:$0xff] %v4131_v8  ;;  %6546 = vst [vmem:[#allocation27_spill] sm:$0xff] %v4134_v15  ;;  %v4140_v34 = vld [vmem:[%s3918_s29 + $0xd0] sm:$0xff]  ;;  %v4143_v21 = vld [vmem:[%s3918_s29 + $0xe0] sm:$0xff]  ;;  %v493_v37 = vmax.f32 %v492_v54, %v4131_v8  ;;  %v497_v35 = vmax.f32 %v4134_v15, %v4137_v19 }
  0x6b   : > { %6547 = vst [vmem:[#allocation28_spill] sm:$0xff] %v4137_v19  ;;  %6548 = vst [vmem:[#allocation29_spill] sm:$0xff] %v4140_v34  ;;  %v4146_v24 = vld [vmem:[%s3918_s29 + $0xe8] sm:$0xff]  ;;  %v4150_v42 = vld [vmem:[%s3918_s29 + $0xd8] sm:$0xff]  ;;  %v1037_v3 = vmax.f32 %v1036_v61, %v4140_v34 }
  0x6c   : > { %6549 = vst [vmem:[#allocation30_spill] sm:$0xff] %v4143_v21  ;;  %6550 = vst [vmem:[#allocation31_spill] sm:$0xff] %v4146_v24  ;;  %485 = vmax.xlane.f32.xlu0 %v484_v45  ;;  %v4153_v40 = vld [vmem:[%s3911_s3 + $0xd8] sm:$0xff]  ;;  %v1041_v45 = vmax.f32 %v4143_v21, %v4146_v24  ;;  %v4163_v53 = vld [vmem:[%s3911_s3 + $0xf0] sm:$0xff] }
  0x6d   : > { %6551 = vst [vmem:[#allocation32_spill] sm:$0xff] %v4150_v42  ;;  %6552 = vst [vmem:[#allocation33_spill] sm:$0xff] %v4153_v40  ;;  %1029 = vmax.xlane.f32.xlu1 %v1028_v55  ;;  %v4166_v49 = vld [vmem:[%s3911_s3 + $0x100] sm:$0xff]  ;;  %v4169_v25 = vld [vmem:[%s3911_s3 + $0x108] sm:$0xff]  ;;  %v494_v61 = vmax.f32 %v493_v37, %v4153_v40  ;;  %v498_v24 = vmax.f32 %v497_v35, %v4163_v53  ;;  %v1038_v8 = vmax.f32 %v1037_v3, %v4150_v42 }
  0x6e   : > { %6553 = vst [vmem:[#allocation34_spill] sm:$0xff] %v4163_v53  ;;  %6554 = vst [vmem:[#allocation35_spill] sm:$0xff] %v4166_v49  ;;  %v4172_v54 = vld [vmem:[%s3918_s29 + $0xf0] sm:$0xff]  ;;  %v4175_v55 = vld [vmem:[%s3918_s29 + $0x100] sm:$0xff]  ;;  %v502_v21 = vmax.f32 %v4166_v49, %v4169_v25 }
  0x6f   : > { %6555 = vst [vmem:[#allocation36_spill] sm:$0xff] %v4169_v25  ;;  %6556 = vst [vmem:[#allocation37_spill] sm:$0xff] %v4172_v54  ;;  %v367_v56 = vld [vmem:[%s3918_s29 + $0x108] sm:$0xff]  ;;  %v4180_v19 = vld [vmem:[%s3918_s29 + $0xf8] sm:$0xff]  ;;  %v1042_v34 = vmax.f32 %v1041_v45, %v4172_v54 }
  0x70   : > { %6557 = vst [vmem:[#allocation38_spill] sm:$0xff] %v4175_v55  ;;  %490 = vmax.xlane.f32.xlu0 %v489_v28  ;;  %6558 = vst [vmem:[#allocation39_spill] sm:$0xff] %v4180_v19  ;;  %v4183_v15 = vld [vmem:[%s3911_s3 + $0xf8] sm:$0xff]  ;;  %v4191_v47 = vld [vmem:[%s3911_s3 + $0x110] sm:$0xff]  ;;  %v1046_v37 = vmax.f32 %v4175_v55, %v367_v56 }
  0x71   : > { %6559 = vst [vmem:[#allocation40_spill] sm:$0xff] %v4183_v15  ;;  %1034 = vmax.xlane.f32.xlu1 %v1033_v30  ;;  %6560 = vst [vmem:[#allocation41_spill] sm:$0xff] %v4191_v47  ;;  %v242_v28 = vld [vmem:[%s3911_s3 + $0x120] sm:$0xff]  ;;  %v243_v40 = vld [vmem:[%s3911_s3 + $0x128] sm:$0xff]  ;;  %v499_v3 = vmax.f32 %v498_v24, %v4183_v15  ;;  %v503_v45 = vmax.f32 %v502_v21, %v4191_v47  ;;  %v1043_v49 = vmax.f32 %v1042_v34, %v4180_v19 }
  0x72   : > { %v4197_v63 = vld [vmem:[%s3918_s29 + $0x110] sm:$0xff]  ;;  %v370_v35 = vld [vmem:[%s3918_s29 + $0x120] sm:$0xff]  ;;  %v371_v25 = vld [vmem:[%s3918_s29 + $0x128] sm:$0xff]  ;;  %v507_v55 = vmax.f32 %v242_v28, %v243_v40 }
  0x73   : > { %6561 = vst [vmem:[#allocation42_spill] sm:$0xff] %v4197_v63  ;;  %v4203_v30 = vld [vmem:[%s3911_s3 + $0x118] sm:$0xff]  ;;  %v1047_v53 = vmax.f32 %v1046_v37, %v4197_v63  ;;  %v244_v54 = vld [vmem:[%s3911_s3 + $0x130] sm:$0xff]  ;;  %v1051_v42 = vmax.f32 %v370_v35, %v371_v25  ;;  %v247_v24 = vld [vmem:[%s3911_s3 + $0x148] sm:$0xff] }
  0x74   : > { %495 = vmax.xlane.f32.xlu0 %v494_v61  ;;  %6562 = vst [vmem:[#allocation43_spill] sm:$0xff] %v4203_v30  ;;  %v4207_v56 = vld [vmem:[%s3918_s29 + $0x118] sm:$0xff]  ;;  %v246_v61 = vld [vmem:[%s3911_s3 + $0x140] sm:$0xff]  ;;  %v372_v15 = vld [vmem:[%s3918_s29 + $0x130] sm:$0xff]  ;;  %v504_v40 = vmax.f32 %v503_v45, %v4203_v30  ;;  %v508_v34 = vmax.f32 %v507_v55, %v244_v54 }
  0x75   : > { %6563 = vst [vmem:[#allocation44_spill] sm:$0xff] %v4207_v56  ;;  %1039 = vmax.xlane.f32.xlu1 %v1038_v8  ;;  %v374_v62 = vld [vmem:[%s3918_s29 + $0x140] sm:$0xff]  ;;  %v375_v21 = vld [vmem:[%s3918_s29 + $0x148] sm:$0xff]  ;;  %v245_v8 = vld [vmem:[%s3911_s3 + $0x138] sm:$0xff]  ;;  %v512_v37 = vmax.f32 %v246_v61, %v247_v24  ;;  %v1048_v25 = vmax.f32 %v1047_v53, %v4207_v56  ;;  %v1052_v35 = vmax.f32 %v1051_v42, %v372_v15 }
  0x76   : > { %v373_v28 = vld [vmem:[%s3918_s29 + $0x138] sm:$0xff]  ;;  %v248_v63 = vld [vmem:[%s3911_s3 + $0x150] sm:$0xff]  ;;  %v1056_v47 = vmax.f32 %v374_v62, %v375_v21  ;;  %v250_v19 = vld [vmem:[%s3911_s3 + $0x160] sm:$0xff]  ;;  %v509_v45 = vmax.f32 %v508_v34, %v245_v8 }
  0x77   : > { %v251_v14 = vld [vmem:[%s3911_s3 + $0x168] sm:$0xff]  ;;  %v376_v59 = vld [vmem:[%s3918_s29 + $0x150] sm:$0xff]  ;;  %v513_v54 = vmax.f32 %v512_v37, %v248_v63  ;;  %v249_v53 = vld [vmem:[%s3911_s3 + $0x158] sm:$0xff] }
  0x78   : > { %500 = vmax.xlane.f32.xlu0 %v499_v3  ;;  %v378_v3 = vld [vmem:[%s3918_s29 + $0x160] sm:$0xff]  ;;  %v379_v58 = vld [vmem:[%s3918_s29 + $0x168] sm:$0xff]  ;;  %v517_v55 = vmax.f32 %v250_v19, %v251_v14  ;;  %v1057_v42 = vmax.f32 %v1056_v47, %v376_v59  ;;  %v252_v15 = vld [vmem:[%s3911_s3 + $0x170] sm:$0xff] }
  0x79   : > { %1044 = vmax.xlane.f32.xlu1 %v1043_v49  ;;  %v1053_v49 = vmax.f32 %v1052_v35, %v373_v28  ;;  %v1061_v61 = vmax.f32 %v378_v3, %v379_v58  ;;  %v377_v62 = vld [vmem:[%s3918_s29 + $0x158] sm:$0xff]  ;;  %v380_v24 = vld [vmem:[%s3918_s29 + $0x170] sm:$0xff]  ;;  %v514_v21 = vmax.f32 %v513_v54, %v249_v53  ;;  %v254_v8 = vld [vmem:[%s3911_s3 + $0x180] sm:$0xff] }
  0x7a   : > { %v1058_v63 = vmax.f32 %v1057_v42, %v377_v62  ;;  %v253_v14 = vld [vmem:[%s3911_s3 + $0x178] sm:$0xff]  ;;  %v255_v34 = vld [vmem:[%s3911_s3 + $0x188] sm:$0xff]  ;;  %v382_v28 = vld [vmem:[%s3918_s29 + $0x180] sm:$0xff] }
  0x7b   : > { %v1062_v19 = vmax.f32 %v1061_v61, %v380_v24  ;;  %v381_v59 = vld [vmem:[%s3918_s29 + $0x178] sm:$0xff]  ;;  %v383_v37 = vld [vmem:[%s3918_s29 + $0x188] sm:$0xff]  ;;  %v386_v3 = vld [vmem:[%s3918_s29 + $0x1a0] sm:$0xff] }
  0x7c   : > { %505 = vmax.xlane.f32.xlu0 %v504_v40  ;;  %v518_v40 = vmax.f32 %v517_v55, %v252_v15  ;;  %v259_v35 = vld [vmem:[%s3911_s3 + $0x1a8] sm:$0xff]  ;;  %v262_v54 = vld [vmem:[%s3911_s3 + $0x1c0] sm:$0xff]  ;;  %v522_v55 = vmax.f32 %v254_v8, %v255_v34  ;;  %v256_v61 = vld [vmem:[%s3911_s3 + $0x190] sm:$0xff] }
  0x7d   : > { %1049 = vmax.xlane.f32.xlu1 %v1048_v25  ;;  %v1063_v47 = vmax.f32 %v1062_v19, %v381_v59  ;;  %v258_v25 = vld [vmem:[%s3911_s3 + $0x1a0] sm:$0xff]  ;;  %v263_v53 = vld [vmem:[%s3911_s3 + $0x1c8] sm:$0xff]  ;;  %v384_v62 = vld [vmem:[%s3918_s29 + $0x190] sm:$0xff] }
  0x7e   : > { %v519_v58 = vmax.f32 %v518_v40, %v253_v14  ;;  %v390_v42 = vld [vmem:[%s3918_s29 + $0x1c0] sm:$0xff]  ;;  %v391_v15 = vld [vmem:[%s3918_s29 + $0x1c8] sm:$0xff]  ;;  %v260_v24 = vld [vmem:[%s3911_s3 + $0x1b0] sm:$0xff]  ;;  %v532_v59 = vmax.f32 %v262_v54, %v263_v53  ;;  %v4254_v8 = vmax.f32 %v522_v55, %v256_v61 }
  0x7f   : > { %v266_v14 = vld [vmem:[%s3911_s3 + $0x1e0] sm:$0xff]  ;;  %v267_v19 = vld [vmem:[%s3911_s3 + $0x1e8] sm:$0xff]  ;;  %v4301_v30 = vld [vmem:[%s3911_s3 + $0x1f8] sm:$0xff] }
  0x80   : > { %510 = vmax.xlane.f32.xlu0 %v509_v45  ;;  %v387_v45 = vld [vmem:[%s3918_s29 + $0x1a8] sm:$0xff]  ;;  %v537_v53 = vmax.f32 %v266_v14, %v267_v19  ;;  %v394_v55 = vld [vmem:[%s3918_s29 + $0x1e0] sm:$0xff] }
  0x81   : > { %1054 = vmax.xlane.f32.xlu1 %v1053_v49  ;;  %v1066_v49 = vmax.f32 %v382_v28, %v383_v37  ;;  %v1071_v40 = vmax.f32 %v386_v3, %v387_v45  ;;  %v264_v28 = vld [vmem:[%s3911_s3 + $0x1d0] sm:$0xff]  ;;  %v4269_v45 = vld [vmem:[%s3918_s29 + $0x1b8] sm:$0xff]  ;;  %v270_v14 = vld [vmem:[%s3911_s3 + $0x200] sm:$0xff] }
  0x82   : > { %v392_v37 = vld [vmem:[%s3918_s29 + $0x1d0] sm:$0xff]  ;;  %6565 = vst [vmem:[#allocation46_spill] sm:$0xff] %v4269_v45 }
  0x83   : > { %v4256_v34 = vmax.f32 %v1066_v49, %v384_v62  ;;  %v4276_v49 = vmax.f32 %v532_v59, %v264_v28 }
  0x84   : > { %515 = vmax.xlane.f32.xlu0 %v514_v21  ;;  %v527_v21 = vmax.f32 %v258_v25, %v259_v35  ;;  %v4261_v25 = vld [vmem:[%s3918_s29 + $0x198] sm:$0xff] }
  0x85   : > { %1059 = vmax.xlane.f32.xlu1 %v1058_v63  ;;  %v388_v63 = vld [vmem:[%s3918_s29 + $0x1b0] sm:$0xff]  ;;  %v4264_v35 = vld [vmem:[%s3911_s3 + $0x1b8] sm:$0xff]  ;;  %6567 = vst [vmem:[#allocation48_spill] sm:$0xff] %v4276_v49  ;;  %v274_v49 = vld [vmem:[%s3911_s3 + $0x220] sm:$0xff] }
  0x86   : > { %6564 = vst [vmem:[#allocation45_spill] sm:$0xff] %v4264_v35  ;;  %v4266_v3 = vmax.f32 %v527_v21, %v260_v24  ;;  %v4271_v54 = vmax.f32 %v1071_v40, %v388_v63  ;;  %v4285_v21 = vld [vmem:[%s3911_s3 + $0x1d8] sm:$0xff]  ;;  %v271_v35 = vld [vmem:[%s3911_s3 + $0x208] sm:$0xff] }
  0x87   : > { %6568 = vst [vmem:[#allocation49_spill] sm:$0xff] %v4285_v21  ;;  %v4288_v40 = vld [vmem:[%s3918_s29 + $0x1d8] sm:$0xff]  ;;  %v542_v21 = vmax.f32 %v270_v14, %v271_v35 }
  0x88   : > { %520 = vmax.xlane.f32.xlu0 %v519_v58  ;;  %v1076_v58 = vmax.f32 %v390_v42, %v391_v15  ;;  %6566 = vst [vmem:[#allocation47_spill] sm:$0xff] %v4271_v54  ;;  %v268_v42 = vld [vmem:[%s3911_s3 + $0x1f0] sm:$0xff]  ;;  %v395_v15 = vld [vmem:[%s3918_s29 + $0x1e8] sm:$0xff]  ;;  %6569 = vst [vmem:[#allocation50_spill] sm:$0xff] %v4288_v40 }
  0x89   : > { %1064 = vmax.xlane.f32.xlu1 %v1063_v47  ;;  %v4252_v47 = vld [vmem:[%s3911_s3 + $0x198] sm:$0xff]  ;;  %v4294_v59 = vmax.f32 %v537_v53, %v268_v42  ;;  %v398_v42 = vld [vmem:[%s3918_s29 + $0x200] sm:$0xff] }
  0x8a   : > { %v4278_v61 = vmax.f32 %v1076_v58, %v392_v37  ;;  %v1081_v58 = vmax.f32 %v394_v55, %v395_v15 }
  0xe9   : > { %v466_v63 = vpop.xlane.xlu0 %465 }
  0xea   : > { %v622_v28 = vsub.f32 %v3925_v0, %v466_v63  ;;  %v623_v37 = vsub.f32 %v3928_v1, %v466_v63  ;;  %v624_v24 = vsub.f32 %v3931_v2, %v466_v63  ;;  %v625_v62 = vsub.f32 %v3942_v6, %v466_v63  ;;  %v471_v56 = vpop.xlane.xlu1 %470  ;;  %v396_v2 = vld [vmem:[%s3918_s29 + $0x1f0] sm:$0xff]  ;;  %v399_v6 = vld [vmem:[%s3918_s29 + $0x208] sm:$0xff] }
  0xeb   : > { %v626_v19 = vsub.f32 %v3936_v4, %v471_v56  ;;  %v627_v53 = vsub.f32 %v3939_v5, %v471_v56  ;;  %v628_v45 = vsub.f32 %v3945_v7, %v471_v56  ;;  %v629_v5 = vsub.f32 %v3954_v11, %v471_v56  ;;  %v275_v1 = vld [vmem:[%s3911_s3 + $0x228] sm:$0xff] }
  0xec   : > { %v750_v55 = vmul.f32 1.442695, %v622_v28  ;;  %v752_v15 = vmul.f32 1.442695, %v623_v37  ;;  %v754_v63 = vmul.f32 1.442695, %v624_v24  ;;  %v4321_v37 = vmax.f32 %v1081_v58, %v396_v2 }
  0xed   : > { %v756_v4 = vmul.f32 1.442695, %v625_v62  ;;  %v1010_v54 = vpop.xlane.xlu0 %1009  ;;  %v758_v40 = vmul.f32 1.442695, %v626_v19  ;;  %v272_v24 = vld [vmem:[%s3911_s3 + $0x210] sm:$0xff]  ;;  %v4326_v62 = vld [vmem:[%s3918_s29 + $0x1f8] sm:$0xff]  ;;  %v1086_v35 = vmax.f32 %v398_v42, %v399_v6  ;;  %v547_v0 = vmax.f32 %v274_v49, %v275_v1 }
  0xee   : > { %2770 = vpow2.f32 %v750_v55  ;;  %v1166_v28 = vsub.f32 %v3950_v9, %v1010_v54  ;;  %v760_v7 = vmul.f32 1.442695, %v627_v53  ;;  %v1167_v11 = vsub.f32 %v3957_v12, %v1010_v54  ;;  %v1015_v56 = vpop.xlane.xlu1 %1014  ;;  %v400_v19 = vld [vmem:[%s3918_s29 + $0x210] sm:$0xff] }
  0xef   : > { %2772 = vpow2.f32 %v752_v15  ;;  %v762_v14 = vmul.f32 1.442695, %v628_v45  ;;  %v1168_v55 = vsub.f32 %v3960_v13, %v1010_v54  ;;  %v764_v9 = vmul.f32 1.442695, %v629_v5  ;;  %v276_v12 = vld [vmem:[%s3911_s3 + $0x230] sm:$0xff]  ;;  %v4338_v13 = vld [vmem:[%s3911_s3 + $0x218] sm:$0xff] }
  0xf0   : > { %2774 = vpow2.f32 %v754_v63  ;;  %v1169_v58 = vsub.f32 %v3976_v20, %v1010_v54  ;;  %v4331_v53 = vmax.f32 %v542_v21, %v272_v24  ;;  %v1294_v2 = vmul.f32 1.442695, %v1166_v28  ;;  %v402_v54 = vld [vmem:[%s3918_s29 + $0x220] sm:$0xff]  ;;  %v403_v21 = vld [vmem:[%s3918_s29 + $0x228] sm:$0xff]  ;;  %v4355_v28 = vld [vmem:[%s3911_s3 + $0x238] sm:$0xff] }
  0xf1   : > { %2776 = vpow2.f32 %v756_v4  ;;  %v1170_v42 = vsub.f32 %v3966_v16, %v1015_v56  ;;  %v1296_v49 = vmul.f32 1.442695, %v1167_v11  ;;  %v1171_v1 = vsub.f32 %v3969_v17, %v1015_v56  ;;  %v4347_v16 = vld [vmem:[%s3918_s29 + $0x218] sm:$0xff]  ;;  %v6587_v45 = vld [vmem:[#allocation13_spill] sm:$0xff] }
  0xf2   : > { %2778 = vpow2.f32 %v758_v40  ;;  %v1020_v6 = vpop.xlane.xlu1 %1019  ;;  %v4341_v20 = vmax.f32 %v1086_v35, %v400_v19  ;;  %v1298_v40 = vmul.f32 1.442695, %v1168_v55  ;;  %v1172_v15 = vsub.f32 %v3972_v18, %v1015_v56 }
  0xf3   : > { %2780 = vpow2.f32 %v760_v7  ;;  %v4349_v63 = vmax.f32 %v547_v0, %v276_v12  ;;  %v1300_v4 = vmul.f32 1.442695, %v1169_v58  ;;  %v1173_v5 = vsub.f32 %v3989_v26, %v1015_v56  ;;  %v4358_v7 = vpop.xlane.xlu0 %475  ;;  %v404_v56 = vld [vmem:[%s3918_s29 + $0x230] sm:$0xff]  ;;  %v279_v58 = vld [vmem:[%s3911_s3 + $0x248] sm:$0xff] }
  0xf4   : > { %2782 = vpow2.f32 %v762_v14  ;;  %v1302_v24 = vmul.f32 1.442695, %v1170_v42  ;;  %v1174_v18 = vsub.f32 %v3981_v22, %v1020_v6  ;;  %v1091_v11 = vmax.f32 %v402_v54, %v403_v21  ;;  %v407_v22 = vld [vmem:[%s3918_s29 + $0x248] sm:$0xff] }
  0xf5   : > { %2784 = vpow2.f32 %v764_v9  ;;  %v1304_v0 = vmul.f32 1.442695, %v1171_v1  ;;  %v1175_v35 = vsub.f32 %v3984_v23, %v1020_v6  ;;  %v1306_v55 = vmul.f32 1.442695, %v1172_v15  ;;  %v278_v9 = vld [vmem:[%s3911_s3 + $0x240] sm:$0xff] }
  0xf6   : > { %2786 = vpow2.f32 %v1294_v2  ;;  %v1176_v19 = vsub.f32 %v3992_v27, %v1020_v6  ;;  %v1308_v2 = vmul.f32 1.442695, %v1173_v5  ;;  %v1177_v23 = vsub.f32 %v4001_v31, %v1020_v6  ;;  %v1025_v6 = vpop.xlane.xlu1 %1024 }
  0xf7   : > { %2788 = vpow2.f32 %v1296_v49  ;;  %v630_v42 = vsub.f32 %v3997_v29, %v4358_v7  ;;  %v1310_v1 = vmul.f32 1.442695, %v1174_v18  ;;  %v4380_v54 = vmax.f32 %v1091_v11, %v404_v56  ;;  %v4392_v18 = vld [vmem:[%s3918_s29 + $0x238] sm:$0xff]  ;;  %v280_v56 = vld [vmem:[%s3911_s3 + $0x250] sm:$0xff] }
  0xf8   : > { %v4364_v14 = vpop.eup %2770  ;;  %2790 = vpow2.f32 %v1298_v40  ;;  %v1312_v40 = vmul.f32 1.442695, %v1175_v35  ;;  %v631_v31 = vsub.f32 %v4004_v32, %v4358_v7  ;;  %v552_v29 = vmax.f32 %v278_v9, %v279_v58 }
  0xf9   : > { %v4371_v12 = vpop.eup %2772  ;;  %2792 = vpow2.f32 %v1300_v4  ;;  %v1314_v4 = vmul.f32 1.442695, %v1176_v19  ;;  %v632_v5 = vsub.f32 %v4007_v33, %v4358_v7  ;;  %v633_v32 = vsub.f32 %v4012_v36, %v4358_v7  ;;  %v4403_v19 = vpop.xlane.xlu0 %480 }
  0xfa   : > { %v4376_v49 = vpop.eup %2774  ;;  %2794 = vpow2.f32 %v1302_v24  ;;  %v1550_v27 = vadd.f32 %v4371_v12, %v4364_v14  ;;  %v766_v35 = vmul.f32 1.442695, %v630_v42  ;;  %v1178_v33 = vsub.f32 %v4017_v38, %v1025_v6 }
  0xfb   : > { %v4382_v21 = vpop.eup %2776  ;;  %2796 = vpow2.f32 %v1304_v0  ;;  %v1316_v0 = vmul.f32 1.442695, %v1177_v23  ;;  %v768_v36 = vmul.f32 1.442695, %v631_v31  ;;  %v1179_v7 = vsub.f32 %v4020_v39, %v1025_v6 }
  0xfc   : > { %v4386_v15 = vpop.eup %2778  ;;  %2798 = vpow2.f32 %v1306_v55  ;;  %v1551_v24 = vadd.f32 %v4376_v49, %v1550_v27  ;;  %v1180_v38 = vsub.f32 %v4024_v41, %v1025_v6  ;;  %v4415_v27 = vmax.f32 %v552_v29, %v280_v56 }
  0xfd   : > { %v4394_v11 = vpop.eup %2780  ;;  %2800 = vpow2.f32 %v1308_v2  ;;  %v1181_v39 = vsub.f32 %v4045_v50, %v1025_v6  ;;  %v634_v31 = vsub.f32 %v4029_v43, %v4403_v19  ;;  %v1320_v56 = vmul.f32 1.442695, %v1179_v7  ;;  %v1030_v50 = vpop.xlane.xlu1 %1029 }
  0xfe   : > { %v4399_v9 = vpop.eup %2782  ;;  %2802 = vpow2.f32 %v1310_v1  ;;  %v1552_v55 = vadd.f32 %v4382_v21, %v1551_v24  ;;  %v1555_v58 = vadd.f32 %v4394_v11, %v4386_v15  ;;  %v770_v1 = vmul.f32 1.442695, %v632_v5  ;;  %v406_v24 = vld [vmem:[%s3918_s29 + $0x240] sm:$0xff] }
  0xff   : > { %v4407_v2 = vpop.eup %2784  ;;  %2804 = vpow2.f32 %v1312_v40  ;;  %v772_v40 = vmul.f32 1.442695, %v633_v32  ;;  %v1096_v6 = vmax.f32 %v406_v24, %v407_v22  ;;  %v1322_v43 = vmul.f32 1.442695, %v1180_v38  ;;  %v4453_v38 = vld [vmem:[%s3911_s3 + $0x258] sm:$0xff] }
 0x100   : > { %v4412_v42 = vpop.eup %2786  ;;  %2806 = vpow2.f32 %v1314_v4  ;;  %1553 = vadd.xlane.f32.xlu0 %v1552_v55  ;;  %v1318_v4 = vmul.f32 1.442695, %v1178_v33  ;;  %v1556_v29 = vadd.f32 %v4399_v9, %v1555_v58  ;;  %v6571_v55 = vmax.f32 %v4254_v8, %v4252_v47  ;;  %v4450_v8 = vpop.xlane.xlu0 %485 }
 0x101   : > { %v4419_v26 = vpop.eup %2788  ;;  %2808 = vpow2.f32 %v1316_v0  ;;  %v635_v0 = vsub.f32 %v4032_v44, %v4403_v19  ;;  %v1324_v44 = vmul.f32 1.442695, %v1181_v39  ;;  %v637_v22 = vsub.f32 %v4048_v51, %v4403_v19  ;;  %v408_v39 = vld [vmem:[%s3918_s29 + $0x250] sm:$0xff] }
 0x102   : > { %v4424_v23 = vpop.eup %2790  ;;  %2810 = vpow2.f32 %v766_v35  ;;  %v1870_v41 = vadd.f32 %v4419_v26, %v4412_v42  ;;  %v636_v35 = vsub.f32 %v4036_v46, %v4403_v19  ;;  %v1182_v47 = vsub.f32 %v4041_v48, %v1030_v50 }
 0x103   : > { %v4429_v5 = vpop.eup %2792  ;;  %2812 = vpow2.f32 %v768_v36  ;;  %v774_v36 = vmul.f32 1.442695, %v634_v31  ;;  %v1183_v51 = vsub.f32 %v4051_v52, %v1030_v50  ;;  %v638_v52 = vsub.f32 %v4059_v57, %v4450_v8 }
 0x104   : > { %v4433_v32 = vpop.eup %2794  ;;  %2814 = vpow2.f32 %v770_v1  ;;  %525 = vmax.xlane.f32.xlu0 %v6571_v55  ;;  %v1871_v33 = vadd.f32 %v4424_v23, %v1870_v41  ;;  %v1557_v1 = vadd.f32 %v4407_v2, %v1556_v29  ;;  %v778_v48 = vmul.f32 1.442695, %v636_v35  ;;  %v4472_v55 = vld [vmem:[%s3911_s3 + $0x260] sm:$0xff] }
 0x105   : > { %6570 = vst [vmem:[#allocation51_spill] sm:$0xff] %v4433_v32  ;;  %v4441_v58 = vpop.eup %2796  ;;  %2816 = vpow2.f32 %v772_v40  ;;  %v776_v40 = vmul.f32 1.442695, %v635_v0  ;;  %v1185_v41 = vsub.f32 %v4083_v10, %v1030_v50  ;;  %v1328_v57 = vmul.f32 1.442695, %v1183_v51 }
 0x106   : > { %6572 = vst [vmem:[#allocation52_spill] sm:$0xff] %v4441_v58  ;;  %v4445_v7 = vpop.eup %2798  ;;  %2818 = vpow2.f32 %v1318_v4  ;;  %v1872_v46 = vadd.f32 %v4429_v5, %v1871_v33  ;;  %v1875_v19 = vadd.f32 %v4441_v58, %v4433_v32  ;;  %v1184_v4 = vsub.f32 %v4068_v60, %v1030_v50  ;;  %v1035_v50 = vpop.xlane.xlu1 %1034 }
 0x107   : > { %6573 = vst [vmem:[#allocation53_spill] sm:$0xff] %v4445_v7  ;;  %v4455_v24 = vpop.eup %2800  ;;  %2820 = vpow2.f32 %v1320_v56  ;;  %v780_v56 = vmul.f32 1.442695, %v637_v22  ;;  %v1326_v60 = vmul.f32 1.442695, %v1182_v47  ;;  %v4480_v33 = vmax.f32 %v1096_v6, %v408_v39  ;;  %v6579_v22 = vld [vmem:[#allocation11_spill] sm:$0xff] }
 0x108   : > { %6574 = vst [vmem:[#allocation54_spill] sm:$0xff] %v4455_v24  ;;  %v4461_v31 = vpop.eup %2802  ;;  %2822 = vpow2.f32 %v1322_v43  ;;  %1873 = vadd.xlane.f32.xlu1 %v1872_v46  ;;  %1558 = vadd.xlane.f32.xlu0 %v1557_v1  ;;  %v4475_v43 = vld [vmem:[%s3911_s3 + $0x268] sm:$0xff]  ;;  %v1876_v10 = vadd.f32 %v4445_v7, %v1875_v19  ;;  %v639_v46 = vsub.f32 %v6579_v22, %v4450_v8  ;;  %v6580_v1 = vld [vmem:[#allocation12_spill] sm:$0xff]  ;;  %v1330_v6 = vmul.f32 1.442695, %v1184_v4  ;;  %v6583_v19 = vld [vmem:[#allocation45_spill] sm:$0xff] }
 0x109   : > { %6575 = vst [vmem:[#allocation55_spill] sm:$0xff] %v4461_v31  ;;  %v4465_v29 = vpop.eup %2804  ;;  %2824 = vpow2.f32 %v1324_v44  ;;  %v640_v0 = vsub.f32 %v6580_v1, %v4450_v8  ;;  %v1332_v47 = vmul.f32 1.442695, %v1185_v41  ;;  %v557_v51 = vmax.f32 %v4472_v55, %v4475_v43  ;;  %v6586_v22 = vld [vmem:[#allocation16_spill] sm:$0xff]  ;;  %v4508_v41 = vpop.xlane.xlu0 %490 }
 0x10a   : > { %6576 = vst [vmem:[#allocation56_spill] sm:$0xff] %v4465_v29  ;;  %v4477_v35 = vpop.eup %2806  ;;  %2826 = vpow2.f32 %v774_v36  ;;  %v6582_v36 = vmax.f32 %v4256_v34, %v4261_v25  ;;  %v782_v1 = vmul.f32 1.442695, %v638_v52  ;;  %v1186_v34 = vsub.f32 %v6587_v45, %v1035_v50  ;;  %v6590_v52 = vld [vmem:[#allocation14_spill] sm:$0xff] }
 0x10b   : > { %6577 = vst [vmem:[#allocation57_spill] sm:$0xff] %v4477_v35  ;;  %v4482_v44 = vpop.eup %2808  ;;  %2828 = vpow2.f32 %v776_v40  ;;  %v6584_v40 = vmax.f32 %v4266_v3, %v6583_v19  ;;  %v1877_v4 = vadd.f32 %v4455_v24, %v1876_v10  ;;  %v1880_v55 = vadd.f32 %v4465_v29, %v4461_v31  ;;  %v6592_v19 = vld [vmem:[#allocation18_spill] sm:$0xff] }
 0x10c   : > { %6578 = vst [vmem:[#allocation58_spill] sm:$0xff] %v4482_v44  ;;  %v4488_v17 = vpop.eup %2810  ;;  %2830 = vpow2.f32 %v778_v48  ;;  %1069 = vmax.xlane.f32.xlu1 %v6582_v36  ;;  %v641_v48 = vsub.f32 %v6586_v22, %v4450_v8  ;;  %v784_v45 = vmul.f32 1.442695, %v639_v46  ;;  %v786_v8 = vmul.f32 1.442695, %v640_v0  ;;  %v6593_v22 = vld [vmem:[#allocation24_spill] sm:$0xff] }
 0x10d   : > { %6581 = vst [vmem:[#allocation11_spill] sm:$0xff] %v4488_v17  ;;  %530 = vmax.xlane.f32.xlu0 %v6584_v40  ;;  %v4498_v39 = vpop.eup %2812  ;;  %2832 = vpow2.f32 %v780_v56  ;;  %v4513_v56 = vld [vmem:[%s3918_s29 + $0x258] sm:$0xff]  ;;  %v1188_v40 = vsub.f32 %v6592_v19, %v1035_v50  ;;  %v1189_v29 = vsub.f32 %v6593_v22, %v1035_v50  ;;  %v6601_v24 = vld [vmem:[#allocation46_spill] sm:$0xff] }
 0x10e   : > { %6585 = vst [vmem:[#allocation12_spill] sm:$0xff] %v4498_v39  ;;  %v4503_v25 = vpop.eup %2814  ;;  %2834 = vpow2.f32 %v1326_v60  ;;  %v1560_v3 = vadd.f32 %v4498_v39, %v4488_v17  ;;  %v1187_v60 = vsub.f32 %v6590_v52, %v1035_v50  ;;  %v788_v39 = vmul.f32 1.442695, %v641_v48  ;;  %v284_v52 = vld [vmem:[%s3911_s3 + $0x270] sm:$0xff]  ;;  %v1040_v50 = vpop.xlane.xlu1 %1039  ;;  %v6597_v48 = vld [vmem:[#allocation17_spill] sm:$0xff] }
 0x10f   : > { %6588 = vst [vmem:[#allocation45_spill] sm:$0xff] %v4503_v25  ;;  %v4515_v43 = vpop.eup %2816  ;;  %2836 = vpow2.f32 %v1328_v57  ;;  %v6595_v57 = vld [vmem:[#allocation15_spill] sm:$0xff]  ;;  %v643_v22 = vsub.f32 %v6597_v48, %v4508_v41 }
 0x110   : > { %6589 = vst [vmem:[#allocation16_spill] sm:$0xff] %v4515_v43  ;;  %v4518_v36 = vpop.eup %2818  ;;  %2838 = vpow2.f32 %v1330_v6  ;;  %1878 = vadd.xlane.f32.xlu1 %v1877_v4  ;;  %v1561_v10 = vadd.f32 %v4503_v25, %v1560_v3  ;;  %v642_v46 = vsub.f32 %v6595_v57, %v4508_v41  ;;  %v1334_v4 = vmul.f32 1.442695, %v1186_v34  ;;  %v6598_v57 = vld [vmem:[#allocation19_spill] sm:$0xff] }
 0x111   : > { %6591 = vst [vmem:[#allocation13_spill] sm:$0xff] %v4518_v36  ;;  %v4523_v31 = vpop.eup %2820  ;;  %2840 = vpow2.f32 %v1332_v47  ;;  %v1881_v3 = vadd.f32 %v4477_v35, %v1880_v55  ;;  %v1336_v47 = vmul.f32 1.442695, %v1187_v60  ;;  %v644_v0 = vsub.f32 %v6598_v57, %v4508_v41  ;;  %v6604_v60 = vld [vmem:[#allocation25_spill] sm:$0xff] }
 0x112   : > { %6594 = vst [vmem:[#allocation14_spill] sm:$0xff] %v4523_v31  ;;  %v4530_v17 = vpop.eup %2822  ;;  %2842 = vpow2.f32 %v782_v1  ;;  %v1562_v6 = vadd.f32 %v4515_v43, %v1561_v10  ;;  %v6600_v1 = vld [vmem:[#allocation47_spill] sm:$0xff]  ;;  %v1338_v34 = vmul.f32 1.442695, %v1188_v40  ;;  %v1340_v55 = vmul.f32 1.442695, %v1189_v29  ;;  %v4557_v29 = vpop.xlane.xlu0 %495 }
 0x113   : > { %6596 = vst [vmem:[#allocation18_spill] sm:$0xff] %v4530_v17  ;;  %v4534_v19 = vpop.eup %2824  ;;  %2844 = vpow2.f32 %v784_v45  ;;  %v6602_v10 = vmax.f32 %v6600_v1, %v6601_v24  ;;  %v4545_v35 = vmax.f32 %v557_v51, %v284_v52  ;;  %v645_v48 = vsub.f32 %v6604_v60, %v4508_v41  ;;  %v6605_v43 = vld [vmem:[#allocation20_spill] sm:$0xff]  ;;  %v6611_v1 = vld [vmem:[#allocation49_spill] sm:$0xff] }
 0x114   : > { %v4540_v25 = vpop.eup %2826  ;;  %2846 = vpow2.f32 %v786_v8  ;;  %1563 = vadd.xlane.f32.xlu0 %v1562_v6  ;;  %v790_v57 = vmul.f32 1.442695, %v642_v46  ;;  %v1190_v7 = vsub.f32 %v6605_v43, %v1040_v50  ;;  %v1882_v24 = vadd.f32 %v4482_v44, %v1881_v3  ;;  %v6608_v46 = vld [vmem:[#allocation21_spill] sm:$0xff]  ;;  %v6610_v3 = vld [vmem:[#allocation48_spill] sm:$0xff]  ;;  %v411_v44 = vld [vmem:[%s3918_s29 + $0x268] sm:$0xff] }
 0x115   : > { %6599 = vst [vmem:[#allocation24_spill] sm:$0xff] %v4540_v25  ;;  %1074 = vmax.xlane.f32.xlu1 %v6602_v10  ;;  %v4547_v45 = vpop.eup %2828  ;;  %2848 = vpow2.f32 %v788_v39  ;;  %v1885_v51 = vadd.f32 %v4523_v31, %v4518_v36  ;;  %v4562_v39 = vld [vmem:[%s3911_s3 + $0x278] sm:$0xff]  ;;  %v792_v41 = vmul.f32 1.442695, %v643_v22  ;;  %v794_v43 = vmul.f32 1.442695, %v644_v0 }
 0x116   : > { %6603 = vst [vmem:[#allocation15_spill] sm:$0xff] %v4547_v45  ;;  %v4552_v8 = vpop.eup %2830  ;;  %2850 = vpow2.f32 %v1334_v4  ;;  %v1565_v40 = vadd.f32 %v4547_v45, %v4540_v25  ;;  %v1191_v6 = vsub.f32 %v6608_v46, %v1040_v50  ;;  %v6612_v10 = vmax.f32 %v6610_v3, %v6611_v1  ;;  %v6613_v31 = vld [vmem:[#allocation29_spill] sm:$0xff]  ;;  %v6614_v45 = vld [vmem:[#allocation32_spill] sm:$0xff]  ;;  %v6616_v22 = vld [vmem:[#allocation22_spill] sm:$0xff] }
 0x117   : > { %6606 = vst [vmem:[#allocation17_spill] sm:$0xff] %v4552_v8  ;;  %v4564_v52 = vpop.eup %2832  ;;  %2852 = vpow2.f32 %v1336_v47  ;;  %v1192_v36 = vsub.f32 %v6613_v31, %v1040_v50  ;;  %v1193_v47 = vsub.f32 %v6614_v45, %v1040_v50  ;;  %v796_v0 = vmul.f32 1.442695, %v645_v48  ;;  %v1045_v45 = vpop.xlane.xlu1 %1044  ;;  %v6618_v48 = vld [vmem:[#allocation23_spill] sm:$0xff] }
 0x118   : > { %6607 = vst [vmem:[#allocation19_spill] sm:$0xff] %v4564_v52  ;;  %v4567_v4 = vpop.eup %2834  ;;  %2854 = vpow2.f32 %v1338_v34  ;;  %535 = vmax.xlane.f32.xlu0 %v6612_v10  ;;  %v1566_v60 = vadd.f32 %v4552_v8, %v1565_v40  ;;  %v646_v46 = vsub.f32 %v6616_v22, %v4557_v29  ;;  %v1342_v31 = vmul.f32 1.442695, %v1190_v7  ;;  %v6619_v22 = vld [vmem:[#allocation26_spill] sm:$0xff] }
 0x119   : > { %6609 = vst [vmem:[#allocation47_spill] sm:$0xff] %v4567_v4  ;;  %1883 = vadd.xlane.f32.xlu1 %v1882_v24  ;;  %v4575_v25 = vpop.eup %2836  ;;  %2856 = vpow2.f32 %v1340_v55  ;;  %v410_v24 = vld [vmem:[%s3918_s29 + $0x260] sm:$0xff]  ;;  %v1886_v50 = vadd.f32 %v4530_v17, %v1885_v51  ;;  %v1344_v55 = vmul.f32 1.442695, %v1191_v6  ;;  %v647_v10 = vsub.f32 %v6618_v48, %v4557_v29 }
 0x11a   : > { %6615 = vst [vmem:[#allocation46_spill] sm:$0xff] %v4575_v25  ;;  %v4583_v3 = vpop.eup %2838  ;;  %2858 = vpow2.f32 %v790_v57  ;;  %v1567_v40 = vadd.f32 %v4564_v52, %v1566_v60  ;;  %v648_v34 = vsub.f32 %v6619_v22, %v4557_v29  ;;  %v6620_v57 = vld [vmem:[#allocation50_spill] sm:$0xff]  ;;  %v1346_v7 = vmul.f32 1.442695, %v1192_v36  ;;  %v6623_v6 = vld [vmem:[#allocation33_spill] sm:$0xff]  ;;  %v4608_v36 = vpop.xlane.xlu0 %500 }
 0x11b   : > { %6617 = vst [vmem:[#allocation25_spill] sm:$0xff] %v4583_v3  ;;  %v4587_v1 = vpop.eup %2840  ;;  %2860 = vpow2.f32 %v792_v41  ;;  %v6621_v60 = vmax.f32 %v4278_v61, %v6620_v57  ;;  %v1348_v51 = vmul.f32 1.442695, %v1193_v47  ;;  %v1101_v17 = vmax.f32 %v410_v24, %v411_v44  ;;  %v6624_v22 = vld [vmem:[#allocation30_spill] sm:$0xff]  ;;  %v412_v47 = vld [vmem:[%s3918_s29 + $0x270] sm:$0xff] }
 0x11c   : > { %v4593_v8 = vpop.eup %2842  ;;  %2862 = vpow2.f32 %v794_v43  ;;  %1568 = vadd.xlane.f32.xlu0 %v1567_v40  ;;  %v649_v48 = vsub.f32 %v6623_v6, %v4557_v29  ;;  %v798_v52 = vmul.f32 1.442695, %v646_v46  ;;  %v1194_v58 = vsub.f32 %v6624_v22, %v1045_v45  ;;  %v6626_v24 = vld [vmem:[#allocation31_spill] sm:$0xff] }
 0x11d   : > { %1079 = vmax.xlane.f32.xlu1 %v6621_v60  ;;  %v4598_v41 = vpop.eup %2844  ;;  %2864 = vpow2.f32 %v796_v0  ;;  %v1887_v61 = vadd.f32 %v4534_v19, %v1886_v50  ;;  %v1890_v44 = vadd.f32 %v4575_v25, %v4567_v4  ;;  %v800_v29 = vmul.f32 1.442695, %v647_v10  ;;  %v6629_v60 = vld [vmem:[#allocation37_spill] sm:$0xff]  ;;  %v6630_v22 = vld [vmem:[#allocation39_spill] sm:$0xff] }
 0x11e   : > { %6622 = vst [vmem:[#allocation20_spill] sm:$0xff] %v4598_v41  ;;  %v4603_v32 = vpop.eup %2846  ;;  %2866 = vpow2.f32 %v1342_v31  ;;  %v1570_v43 = vadd.f32 %v4598_v41, %v4593_v8  ;;  %v802_v46 = vmul.f32 1.442695, %v648_v34  ;;  %v1195_v40 = vsub.f32 %v6626_v24, %v1045_v45  ;;  %v6632_v10 = vld [vmem:[#allocation27_spill] sm:$0xff] }
 0x11f   : > { %v4613_v0 = vpop.eup %2848  ;;  %2868 = vpow2.f32 %v1344_v55  ;;  %v6628_v50 = vmax.f32 %v4294_v59, %v4301_v30  ;;  %v1196_v6 = vsub.f32 %v6629_v60, %v1045_v45  ;;  %v1197_v55 = vsub.f32 %v6630_v22, %v1045_v45  ;;  %v506_v45 = vpop.xlane.xlu0 %505 }
 0x120   : > { %6625 = vst [vmem:[#allocation21_spill] sm:$0xff] %v4613_v0  ;;  %v4616_v31 = vpop.eup %2850  ;;  %2870 = vpow2.f32 %v1346_v7  ;;  %v1571_v57 = vadd.f32 %v4603_v32, %v1570_v43  ;;  %v804_v34 = vmul.f32 1.442695, %v649_v48  ;;  %v650_v24 = vsub.f32 %v6632_v10, %v4608_v36  ;;  %v286_v7 = vld [vmem:[%s3911_s3 + $0x280] sm:$0xff]  ;;  %v6635_v48 = vld [vmem:[#allocation28_spill] sm:$0xff] }
 0x121   : > { %6627 = vst [vmem:[#allocation48_spill] sm:$0xff] %v4616_v31  ;;  %1888 = vadd.xlane.f32.xlu1 %v1887_v61  ;;  %540 = vmax.xlane.f32.xlu0 %v6628_v50  ;;  %v4624_v25 = vpop.eup %2852  ;;  %2872 = vpow2.f32 %v1348_v51  ;;  %v4628_v4 = vmax.f32 %v1101_v17, %v412_v47  ;;  %v287_v61 = vld [vmem:[%s3911_s3 + $0x288] sm:$0xff]  ;;  %v1350_v59 = vmul.f32 1.442695, %v1194_v58  ;;  %v1891_v43 = vadd.f32 %v4583_v3, %v1890_v44 }
 0x122   : > { %6631 = vst [vmem:[#allocation49_spill] sm:$0xff] %v4624_v25  ;;  %v4632_v41 = vpop.eup %2854  ;;  %2874 = vpow2.f32 %v798_v52  ;;  %v1572_v30 = vadd.f32 %v4613_v0, %v1571_v57  ;;  %v1352_v51 = vmul.f32 1.442695, %v1195_v40  ;;  %v651_v60 = vsub.f32 %v6635_v48, %v4608_v36  ;;  %v6636_v17 = vld [vmem:[#allocation34_spill] sm:$0xff]  ;;  %v6640_v40 = vld [vmem:[#allocation40_spill] sm:$0xff] }
 0x123   : > { %6633 = vst [vmem:[#allocation29_spill] sm:$0xff] %v4632_v41  ;;  %v4636_v50 = vpop.eup %2856  ;;  %2876 = vpow2.f32 %v800_v29  ;;  %v652_v47 = vsub.f32 %v6636_v17, %v4608_v36  ;;  %v6638_v52 = vmax.f32 %v4321_v37, %v4326_v62  ;;  %v1354_v58 = vmul.f32 1.442695, %v1196_v6  ;;  %v6641_v17 = vld [vmem:[#allocation35_spill] sm:$0xff]  ;;  %v4659_v6 = vpop.xlane.xlu1 %1049 }
 0x124   : > { %6634 = vst [vmem:[#allocation32_spill] sm:$0xff] %v4636_v50  ;;  %v4642_v22 = vpop.eup %2858  ;;  %2878 = vpow2.f32 %v802_v46  ;;  %v1356_v44 = vmul.f32 1.442695, %v1197_v55  ;;  %v562_v57 = vmax.f32 %v286_v7, %v287_v61  ;;  %v653_v10 = vsub.f32 %v6640_v40, %v4608_v36  ;;  %v4662_v55 = vld [vmem:[%s3918_s29 + $0x278] sm:$0xff] }
 0x125   : > { %6637 = vst [vmem:[#allocation22_spill] sm:$0xff] %v4642_v22  ;;  %1084 = vmax.xlane.f32.xlu1 %v6638_v52  ;;  %1573 = vadd.xlane.f32.xlu0 %v1572_v30  ;;  %v4647_v29 = vpop.eup %2860  ;;  %2880 = vpow2.f32 %v804_v34  ;;  %v806_v48 = vmul.f32 1.442695, %v650_v24  ;;  %v654_v3 = vsub.f32 %v6641_v17, %v506_v45  ;;  %v1892_v37 = vadd.f32 %v4587_v1, %v1891_v43  ;;  %v6644_v7 = vld [vmem:[#allocation36_spill] sm:$0xff]  ;;  %v6647_v52 = vld [vmem:[#allocation41_spill] sm:$0xff]  ;;  %v6648_v17 = vld [vmem:[#allocation43_spill] sm:$0xff] }
 0x126   : > { %6639 = vst [vmem:[#allocation23_spill] sm:$0xff] %v4647_v29  ;;  %v4652_v0 = vpop.eup %2862  ;;  %2882 = vpow2.f32 %v1350_v59  ;;  %v1575_v62 = vadd.f32 %v4647_v29, %v4642_v22  ;;  %v1895_v46 = vadd.f32 %v4624_v25, %v4616_v31  ;;  %v808_v34 = vmul.f32 1.442695, %v651_v60  ;;  %v3452_v31 = vld [vmem:[%s3911_s3 + $0x1c8] sm:$0xff]  ;;  %v6713_v22 = vld [vmem:[#allocation53_spill] sm:$0xff] }
 0x127   : > { %6642 = vst [vmem:[#allocation26_spill] sm:$0xff] %v4652_v0  ;;  %v4664_v36 = vpop.eup %2864  ;;  %2884 = vpow2.f32 %v1352_v51  ;;  %v810_v24 = vmul.f32 1.442695, %v652_v47  ;;  %v655_v61 = vsub.f32 %v6644_v7, %v506_v45  ;;  %v6646_v59 = vmax.f32 %v4331_v53, %v4338_v13  ;;  %v288_v51 = vld [vmem:[%s3911_s3 + $0x290] sm:$0xff]  ;;  %v6650_v7 = vld [vmem:[#allocation38_spill] sm:$0xff] }
 0x128   : > { %6643 = vst [vmem:[#allocation50_spill] sm:$0xff] %v4664_v36  ;;  %v4667_v30 = vpop.eup %2866  ;;  %2886 = vpow2.f32 %v1354_v58  ;;  %v1576_v43 = vadd.f32 %v4652_v0, %v1575_v62  ;;  %v656_v40 = vsub.f32 %v6647_v52, %v506_v45  ;;  %v657_v25 = vsub.f32 %v6648_v17, %v506_v45  ;;  %v6712_v0 = vld [vmem:[#allocation52_spill] sm:$0xff] }
 0x129   : > { %6645 = vst [vmem:[#allocation33_spill] sm:$0xff] %v4667_v30  ;;  %1893 = vadd.xlane.f32.xlu1 %v1892_v37  ;;  %545 = vmax.xlane.f32.xlu0 %v6646_v59  ;;  %v4676_v60 = vpop.eup %2868  ;;  %2888 = vpow2.f32 %v1356_v44  ;;  %v812_v47 = vmul.f32 1.442695, %v653_v10  ;;  %v1198_v58 = vsub.f32 %v6650_v7, %v4659_v6  ;;  %v814_v62 = vmul.f32 1.442695, %v654_v3  ;;  %v4686_v59 = vpop.xlane.xlu0 %510  ;;  %v3410_v10 = vld [vmem:[%s3918_s29 + $0x108] sm:$0xff] }
 0x12a   : > { %6649 = vst [vmem:[#allocation30_spill] sm:$0xff] %v4676_v60  ;;  %v4682_v53 = vpop.eup %2870  ;;  %2890 = vpow2.f32 %v806_v48  ;;  %v1577_v13 = vadd.f32 %v4664_v36, %v1576_v43  ;;  %v1896_v45 = vadd.f32 %v4632_v41, %v1895_v46  ;;  %v816_v44 = vmul.f32 1.442695, %v655_v61  ;;  %v6655_v43 = vld [vmem:[#allocation42_spill] sm:$0xff]  ;;  %v4702_v61 = vld [vmem:[%s3911_s3 + $0x298] sm:$0xff] }
 0x12b   : > { %6651 = vst [vmem:[#allocation31_spill] sm:$0xff] %v4682_v53  ;;  %v4688_v52 = vpop.eup %2872  ;;  %2892 = vpow2.f32 %v808_v34  ;;  %v1199_v17 = vsub.f32 %v3410_v10, %v4659_v6  ;;  %v4692_v7 = vmax.f32 %v562_v57, %v288_v51  ;;  %v6654_v3 = vmax.f32 %v4341_v20, %v4347_v16  ;;  %v6657_v57 = vld [vmem:[#allocation44_spill] sm:$0xff]  ;;  %v3411_v10 = vld [vmem:[%s3911_s3 + $0x120] sm:$0xff] }
 0x12c   : > { %6652 = vst [vmem:[#allocation37_spill] sm:$0xff] %v4688_v52  ;;  %v4694_v37 = vpop.eup %2874  ;;  %2894 = vpow2.f32 %v810_v24  ;;  %v818_v48 = vmul.f32 1.442695, %v656_v40  ;;  %v820_v46 = vmul.f32 1.442695, %v657_v25  ;;  %v1200_v34 = vsub.f32 %v6655_v43, %v4659_v6 }
 0x12d   : > { %6653 = vst [vmem:[#allocation39_spill] sm:$0xff] %v4694_v37  ;;  %1089 = vmax.xlane.f32.xlu1 %v6654_v3  ;;  %1578 = vadd.xlane.f32.xlu0 %v1577_v13  ;;  %v4704_v41 = vpop.eup %2876  ;;  %2896 = vpow2.f32 %v812_v47  ;;  %v1201_v51 = vsub.f32 %v6657_v57, %v4659_v6  ;;  %v1358_v24 = vmul.f32 1.442695, %v1198_v58  ;;  %v658_v20 = vsub.f32 %v3411_v10, %v4686_v59  ;;  %v4717_v47 = vpop.xlane.xlu1 %1054  ;;  %v3412_v58 = vld [vmem:[%s3911_s3 + $0x128] sm:$0xff]  ;;  %v3413_v10 = vld [vmem:[%s3911_s3 + $0x130] sm:$0xff] }
 0x12e   : > { %6656 = vst [vmem:[#allocation27_spill] sm:$0xff] %v4704_v41  ;;  %v4710_v16 = vpop.eup %2878  ;;  %2898 = vpow2.f32 %v814_v62  ;;  %v1897_v25 = vadd.f32 %v4636_v50, %v1896_v45  ;;  %v1580_v40 = vadd.f32 %v4704_v41, %v4694_v37  ;;  %v1900_v13 = vadd.f32 %v4676_v60, %v4667_v30  ;;  %v3414_v30 = vld [vmem:[%s3911_s3 + $0x138] sm:$0xff] }
 0x12f   : > { %6658 = vst [vmem:[#allocation28_spill] sm:$0xff] %v4710_v16  ;;  %v4719_v3 = vpop.eup %2880  ;;  %2900 = vpow2.f32 %v816_v44  ;;  %v1360_v6 = vmul.f32 1.442695, %v1199_v17  ;;  %v659_v62 = vsub.f32 %v3412_v58, %v4686_v59  ;;  %v6661_v57 = vmax.f32 %v4349_v63, %v4355_v28  ;;  %v4740_v63 = vld [vmem:[%s3918_s29 + $0x280] sm:$0xff]  ;;  %v4743_v28 = vld [vmem:[%s3918_s29 + $0x288] sm:$0xff] }
 0x130   : > { %6659 = vst [vmem:[#allocation34_spill] sm:$0xff] %v4719_v3  ;;  %v4725_v43 = vpop.eup %2882  ;;  %2902 = vpow2.f32 %v818_v48  ;;  %v1362_v44 = vmul.f32 1.442695, %v1200_v34  ;;  %v1581_v17 = vadd.f32 %v4710_v16, %v1580_v40  ;;  %v660_v60 = vsub.f32 %v3413_v10, %v4686_v59  ;;  %v3415_v48 = vld [vmem:[%s3918_s29 + $0x120] sm:$0xff]  ;;  %v3416_v10 = vld [vmem:[%s3918_s29 + $0x128] sm:$0xff]  ;;  %v3417_v16 = vld [vmem:[%s3918_s29 + $0x130] sm:$0xff] }
 0x131   : > { %6660 = vst [vmem:[#allocation40_spill] sm:$0xff] %v4725_v43  ;;  %1898 = vadd.xlane.f32.xlu1 %v1897_v25  ;;  %550 = vmax.xlane.f32.xlu0 %v6661_v57  ;;  %v4733_v58 = vpop.eup %2884  ;;  %2904 = vpow2.f32 %v820_v46  ;;  %v1364_v45 = vmul.f32 1.442695, %v1201_v51  ;;  %v661_v41 = vsub.f32 %v3414_v30, %v4686_v59  ;;  %v1202_v25 = vsub.f32 %v3415_v48, %v4717_v47  ;;  %v4749_v57 = vpop.xlane.xlu0 %515 }
 0x132   : > { %6662 = vst [vmem:[#allocation35_spill] sm:$0xff] %v4733_v58  ;;  %v4745_v34 = vpop.eup %2886  ;;  %2906 = vpow2.f32 %v1358_v24  ;;  %v1582_v40 = vadd.f32 %v4719_v3, %v1581_v17  ;;  %v822_v46 = vmul.f32 1.442695, %v658_v20  ;;  %v1901_v51 = vadd.f32 %v4682_v53, %v1900_v13  ;;  %v3418_v17 = vld [vmem:[%s3918_s29 + $0x138] sm:$0xff]  ;;  %v3419_v3 = vld [vmem:[%s3911_s3 + $0x140] sm:$0xff] }
 0x133   : > { %6663 = vst [vmem:[#allocation36_spill] sm:$0xff] %v4745_v34  ;;  %v4751_v30 = vpop.eup %2888  ;;  %2908 = vpow2.f32 %v1360_v6  ;;  %v824_v59 = vmul.f32 1.442695, %v659_v62  ;;  %v1203_v48 = vsub.f32 %v3416_v10, %v4717_v47  ;;  %v1204_v37 = vsub.f32 %v3417_v16, %v4717_v47 }
 0x134   : > { %6664 = vst [vmem:[#allocation41_spill] sm:$0xff] %v4751_v30  ;;  %v4757_v24 = vpop.eup %2890  ;;  %2910 = vpow2.f32 %v1362_v44  ;;  %v6666_v20 = vmax.f32 %v4380_v54, %v4392_v18  ;;  %v826_v13 = vmul.f32 1.442695, %v660_v60  ;;  %v1205_v6 = vsub.f32 %v3418_v17, %v4717_v47  ;;  %v4777_v47 = vpop.xlane.xlu1 %1059  ;;  %v3422_v17 = vld [vmem:[%s3911_s3 + $0x158] sm:$0xff] }
 0x135   : > { %6665 = vst [vmem:[#allocation43_spill] sm:$0xff] %v4757_v24  ;;  %1583 = vadd.xlane.f32.xlu0 %v1582_v40  ;;  %v1106_v62 = vmax.f32 %v4740_v63, %v4743_v28  ;;  %v4766_v53 = vpop.eup %2892  ;;  %2912 = vpow2.f32 %v1364_v45  ;;  %v828_v16 = vmul.f32 1.442695, %v661_v41  ;;  %v1366_v10 = vmul.f32 1.442695, %v1202_v25  ;;  %v3420_v25 = vld [vmem:[%s3911_s3 + $0x148] sm:$0xff] }
 0x136   : > { %1094 = vmax.xlane.f32.xlu1 %v6666_v20  ;;  %6667 = vst [vmem:[#allocation38_spill] sm:$0xff] %v4766_v53  ;;  %v662_v44 = vsub.f32 %v3419_v3, %v4749_v57  ;;  %v4770_v50 = vpop.eup %2894  ;;  %2914 = vpow2.f32 %v822_v46  ;;  %v1902_v54 = vadd.f32 %v4688_v52, %v1901_v51  ;;  %v1585_v18 = vadd.f32 %v4766_v53, %v4757_v24  ;;  %v3421_v20 = vld [vmem:[%s3911_s3 + $0x150] sm:$0xff] }
 0x137   : > { %6668 = vst [vmem:[#allocation42_spill] sm:$0xff] %v4770_v50  ;;  %v1905_v60 = vadd.f32 %v4733_v58, %v4725_v43  ;;  %v4779_v41 = vpop.eup %2896  ;;  %2916 = vpow2.f32 %v824_v59  ;;  %v1368_v3 = vmul.f32 1.442695, %v1203_v48  ;;  %v1370_v45 = vmul.f32 1.442695, %v1204_v37  ;;  %v416_v48 = vld [vmem:[%s3918_s29 + $0x290] sm:$0xff] }
 0x138   : > { %6669 = vst [vmem:[#allocation44_spill] sm:$0xff] %v4779_v41  ;;  %v663_v63 = vsub.f32 %v3420_v25, %v4749_v57  ;;  %v4783_v28 = vpop.eup %2898  ;;  %2918 = vpow2.f32 %v826_v13  ;;  %v6671_v40 = vmax.f32 %v4415_v27, %v4453_v38  ;;  %v1372_v46 = vmul.f32 1.442695, %v1205_v6  ;;  %v3449_v24 = vld [vmem:[%s3918_s29 + $0x1b0] sm:$0xff] }
 0x139   : > { %6670 = vst [vmem:[#allocation59_spill] sm:$0xff] %v4783_v28  ;;  %v1586_v51 = vadd.f32 %v4770_v50, %v1585_v18  ;;  %v664_v59 = vsub.f32 %v3421_v20, %v4749_v57  ;;  %v4792_v37 = vpop.eup %2900  ;;  %2920 = vpow2.f32 %v828_v16  ;;  %v665_v25 = vsub.f32 %v3422_v17, %v4749_v57  ;;  %v3424_v57 = vld [vmem:[%s3918_s29 + $0x148] sm:$0xff]  ;;  %v4808_v20 = vpop.xlane.xlu0 %520 }
 0x13a   : > { %1903 = vadd.xlane.f32.xlu1 %v1902_v54  ;;  %555 = vmax.xlane.f32.xlu0 %v6671_v40  ;;  %6672 = vst [vmem:[#allocation60_spill] sm:$0xff] %v4792_v37  ;;  %v830_v13 = vmul.f32 1.442695, %v662_v44  ;;  %v3423_v54 = vld [vmem:[%s3918_s29 + $0x140] sm:$0xff]  ;;  %v4798_v27 = vpop.eup %2902  ;;  %2922 = vpow2.f32 %v1366_v10  ;;  %v1906_v6 = vadd.f32 %v4745_v34, %v1905_v60  ;;  %v1590_v18 = vadd.f32 %v4792_v37, %v4783_v28 }
 0x13b   : > { %v1206_v58 = vsub.f32 %v3423_v54, %v4777_v47  ;;  %6673 = vst [vmem:[#allocation61_spill] sm:$0xff] %v4798_v27  ;;  %v1587_v38 = vadd.f32 %v4779_v41, %v1586_v51  ;;  %v4804_v40 = vpop.eup %2904  ;;  %2924 = vpow2.f32 %v1368_v3  ;;  %v832_v16 = vmul.f32 1.442695, %v663_v63  ;;  %v3425_v3 = vld [vmem:[%s3918_s29 + $0x150] sm:$0xff] }
 0x13c   : > { %6674 = vst [vmem:[#allocation62_spill] sm:$0xff] %v4804_v40  ;;  %v1207_v44 = vsub.f32 %v3424_v57, %v4777_v47  ;;  %v4810_v17 = vmax.f32 %v1106_v62, %v416_v48  ;;  %v4812_v10 = vpop.eup %2906  ;;  %2926 = vpow2.f32 %v1370_v45  ;;  %v6676_v60 = vmax.f32 %v4480_v33, %v4513_v56  ;;  %v3426_v45 = vld [vmem:[%s3918_s29 + $0x158] sm:$0xff] }
 0x13d   : > { %6675 = vst [vmem:[#allocation63_spill] sm:$0xff] %v4812_v10  ;;  %v834_v51 = vmul.f32 1.442695, %v664_v59  ;;  %v1208_v63 = vsub.f32 %v3425_v3, %v4777_v47  ;;  %v1591_v54 = vadd.f32 %v4798_v27, %v1590_v18  ;;  %v4820_v57 = vpop.eup %2908  ;;  %2928 = vpow2.f32 %v1372_v46  ;;  %v290_v3 = vld [vmem:[%s3911_s3 + $0x2a0] sm:$0xff]  ;;  %v291_v46 = vld [vmem:[%s3911_s3 + $0x2a8] sm:$0xff] }
 0x13e   : > { %1099 = vmax.xlane.f32.xlu1 %v6676_v60  ;;  %1588 = vadd.xlane.f32.xlu0 %v1587_v38  ;;  %6677 = vst [vmem:[#allocation64_spill] sm:$0xff] %v4820_v57  ;;  %v836_v62 = vmul.f32 1.442695, %v665_v25  ;;  %v1209_v33 = vsub.f32 %v3426_v45, %v4777_v47  ;;  %v1374_v56 = vmul.f32 1.442695, %v1206_v58  ;;  %v4824_v48 = vpop.eup %2910  ;;  %2930 = vpow2.f32 %v830_v13  ;;  %v3427_v38 = vld [vmem:[%s3911_s3 + $0x160] sm:$0xff] }
 0x13f   : > { %6678 = vst [vmem:[#allocation65_spill] sm:$0xff] %v4824_v48  ;;  %v1907_v59 = vadd.f32 %v4751_v30, %v1906_v6  ;;  %v666_v60 = vsub.f32 %v3427_v38, %v4808_v20  ;;  %v1910_v18 = vadd.f32 %v4820_v57, %v4812_v10  ;;  %v4833_v27 = vpop.eup %2912  ;;  %2932 = vpow2.f32 %v832_v16  ;;  %v3428_v47 = vld [vmem:[%s3911_s3 + $0x168] sm:$0xff]  ;;  %v3429_v45 = vld [vmem:[%s3911_s3 + $0x170] sm:$0xff]  ;;  %v4839_v6 = vpop.xlane.xlu1 %1064  ;;  %v3430_v10 = vld [vmem:[%s3911_s3 + $0x178] sm:$0xff] }
 0x140   : > { %6679 = vst [vmem:[#allocation66_spill] sm:$0xff] %v4833_v27  ;;  %v1376_v25 = vmul.f32 1.442695, %v1207_v44  ;;  %v667_v58 = vsub.f32 %v3428_v47, %v4808_v20  ;;  %v668_v13 = vsub.f32 %v3429_v45, %v4808_v20  ;;  %v4841_v37 = vpop.eup %2914  ;;  %2934 = vpow2.f32 %v834_v51 }
 0x141   : > { %6680 = vst [vmem:[#allocation67_spill] sm:$0xff] %v4841_v37  ;;  %v6681_v38 = vmax.f32 %v4545_v35, %v4562_v39  ;;  %v1378_v16 = vmul.f32 1.442695, %v1208_v63  ;;  %v1592_v44 = vadd.f32 %v4804_v40, %v1591_v54  ;;  %v1911_v47 = vadd.f32 %v4824_v48, %v1910_v18  ;;  %v4848_v57 = vpop.eup %2916  ;;  %v3431_v39 = vld [vmem:[%s3918_s29 + $0x160] sm:$0xff]  ;;  %v417_v54 = vld [vmem:[%s3918_s29 + $0x298] sm:$0xff] }
 0x142   : > { %1908 = vadd.xlane.f32.xlu1 %v1907_v59  ;;  %6682 = vst [vmem:[#allocation68_spill] sm:$0xff] %v4848_v57  ;;  %2936 = vpow2.f32 %v836_v62  ;;  %v1380_v45 = vmul.f32 1.442695, %v1209_v33  ;;  %v669_v51 = vsub.f32 %v3430_v10, %v4808_v20  ;;  %v567_v59 = vmax.f32 %v290_v3, %v291_v46  ;;  %v4852_v28 = vpop.eup %2918  ;;  %v3432_v10 = vld [vmem:[%s3918_s29 + $0x168] sm:$0xff] }
 0x143   : > { %560 = vmax.xlane.f32.xlu0 %v6681_v38  ;;  %6683 = vst [vmem:[#allocation69_spill] sm:$0xff] %v4852_v28  ;;  %2938 = vpow2.f32 %v1374_v56  ;;  %v838_v35 = vmul.f32 1.442695, %v666_v60  ;;  %v1210_v63 = vsub.f32 %v3431_v39, %v4839_v6  ;;  %v1595_v18 = vadd.f32 %v4848_v57, %v4841_v37  ;;  %v4859_v62 = vpop.eup %2920  ;;  %v292_v56 = vld [vmem:[%s3911_s3 + $0x2b0] sm:$0xff]  ;;  %v419_v57 = vld [vmem:[%s3918_s29 + $0x2a8] sm:$0xff] }
 0x144   : > { %6684 = vst [vmem:[#allocation70_spill] sm:$0xff] %v4859_v62  ;;  %2940 = vpow2.f32 %v1376_v25  ;;  %v840_v33 = vmul.f32 1.442695, %v667_v58  ;;  %v842_v20 = vmul.f32 1.442695, %v668_v13  ;;  %v1211_v3 = vsub.f32 %v3432_v10, %v4839_v6  ;;  %v4864_v60 = vpop.eup %2922  ;;  %v3433_v39 = vld [vmem:[%s3918_s29 + $0x170] sm:$0xff] }
 0x145   : > { %6685 = vst [vmem:[#allocation71_spill] sm:$0xff] %v4864_v60  ;;  %2942 = vpow2.f32 %v1378_v16  ;;  %v6686_v46 = vmax.f32 %v4628_v4, %v4662_v55  ;;  %v1912_v38 = vadd.f32 %v4833_v27, %v1911_v47  ;;  %v1212_v25 = vsub.f32 %v3433_v39, %v4839_v6  ;;  %v418_v13 = vld [vmem:[%s3918_s29 + $0x2a0] sm:$0xff]  ;;  %v4875_v10 = vpop.eup %2924  ;;  %v3440_v27 = vld [vmem:[%s3918_s29 + $0x188] sm:$0xff] }
 0x146   : > { %v1596_v58 = vadd.f32 %v4852_v28, %v1595_v18  ;;  %6687 = vst [vmem:[#allocation72_spill] sm:$0xff] %v4875_v10  ;;  %2944 = vpow2.f32 %v1380_v45  ;;  %v844_v37 = vmul.f32 1.442695, %v669_v51  ;;  %v1108_v16 = vmax.f32 %v4810_v17, %v417_v54  ;;  %v4878_v48 = vpop.eup %2926  ;;  %v3434_v18 = vld [vmem:[%s3918_s29 + $0x178] sm:$0xff] }
 0x147   : > { %1104 = vmax.xlane.f32.xlu1 %v6686_v46  ;;  %1593 = vadd.xlane.f32.xlu0 %v1592_v44  ;;  %6688 = vst [vmem:[#allocation73_spill] sm:$0xff] %v4878_v48  ;;  %2946 = vpow2.f32 %v838_v35  ;;  %v1382_v4 = vmul.f32 1.442695, %v1210_v63  ;;  %v1915_v55 = vadd.f32 %v4875_v10, %v4864_v60  ;;  %v568_v44 = vmax.f32 %v567_v59, %v292_v56  ;;  %v4882_v47 = vpop.eup %2928  ;;  %v293_v56 = vld [vmem:[%s3911_s3 + $0x2b8] sm:$0xff]  ;;  %v420_v46 = vld [vmem:[%s3918_s29 + $0x2b0] sm:$0xff] }
 0x148   : > { %6689 = vst [vmem:[#allocation74_spill] sm:$0xff] %v4882_v47  ;;  %2948 = vpow2.f32 %v840_v33  ;;  %v1213_v45 = vsub.f32 %v3434_v18, %v4839_v6  ;;  %v1384_v51 = vmul.f32 1.442695, %v1211_v3  ;;  %v1111_v17 = vmax.f32 %v418_v13, %v419_v57  ;;  %v4886_v54 = vpop.eup %2930  ;;  %v294_v57 = vld [vmem:[%s3911_s3 + $0x2c0] sm:$0xff]  ;;  %v295_v6 = vld [vmem:[%s3911_s3 + $0x2c8] sm:$0xff]  ;;  %v421_v13 = vld [vmem:[%s3918_s29 + $0x2b8] sm:$0xff] }
 0x149   : > { %6690 = vst [vmem:[#allocation75_spill] sm:$0xff] %v4886_v54  ;;  %2950 = vpow2.f32 %v842_v20  ;;  %v6691_v35 = vmax.f32 %v4692_v7, %v4702_v61  ;;  %v1386_v63 = vmul.f32 1.442695, %v1212_v25  ;;  %v1597_v59 = vadd.f32 %v4859_v62, %v1596_v58  ;;  %v4895_v39 = vpop.eup %2932  ;;  %v422_v18 = vld [vmem:[%s3918_s29 + $0x2c0] sm:$0xff]  ;;  %v5021_v60 = vld [vmem:[%s3918_s29 + $0x338] sm:$0xff] }
 0x14a   : > { %v1916_v33 = vadd.f32 %v4878_v48, %v1915_v55  ;;  %6692 = vst [vmem:[#allocation76_spill] sm:$0xff] %v4895_v39  ;;  %2952 = vpow2.f32 %v844_v37  ;;  %v4899_v3 = vpop.eup %2934  ;;  %v1600_v7 = vadd.f32 %v4895_v39, %v4886_v54  ;;  %v1388_v20 = vmul.f32 1.442695, %v1213_v45  ;;  %v5024_v62 = vld [vmem:[%s3911_s3 + $0x358] sm:$0xff] }
 0x14b   : > { %1913 = vadd.xlane.f32.xlu1 %v1912_v38  ;;  %565 = vmax.xlane.f32.xlu0 %v6691_v35  ;;  %6693 = vst [vmem:[#allocation77_spill] sm:$0xff] %v4899_v3  ;;  %2954 = vpow2.f32 %v1382_v4  ;;  %v569_v38 = vmax.f32 %v568_v44, %v293_v56  ;;  %v1112_v25 = vmax.f32 %v1111_v17, %v420_v46  ;;  %v423_v35 = vld [vmem:[%s3918_s29 + $0x2c8] sm:$0xff]  ;;  %v296_v44 = vld [vmem:[%s3911_s3 + $0x2d0] sm:$0xff]  ;;  %v5027_v28 = vld [vmem:[%s3918_s29 + $0x358] sm:$0xff] }
 0x14c   : > { %v4903_v61 = vpop.eup %2936  ;;  %2956 = vpow2.f32 %v1384_v51  ;;  %v1917_v37 = vadd.f32 %v4882_v47, %v1916_v33  ;;  %v1601_v4 = vadd.f32 %v4899_v3, %v1600_v7  ;;  %v572_v55 = vmax.f32 %v294_v57, %v295_v6  ;;  %v424_v57 = vld [vmem:[%s3918_s29 + $0x2d0] sm:$0xff]  ;;  %v298_v6 = vld [vmem:[%s3911_s3 + $0x2e0] sm:$0xff]  ;;  %v299_v7 = vld [vmem:[%s3911_s3 + $0x2e8] sm:$0xff] }
 0x14d   : > { %6694 = vst [vmem:[#allocation78_spill] sm:$0xff] %v4903_v61  ;;  %v4905_v58 = vpop.eup %2938  ;;  %2958 = vpow2.f32 %v1386_v63  ;;  %v1113_v17 = vmax.f32 %v1112_v25, %v421_v13  ;;  %v1116_v63 = vmax.f32 %v422_v18, %v423_v35  ;;  %v3435_v47 = vld [vmem:[%s3911_s3 + $0x180] sm:$0xff] }
 0x14e   : > { %6695 = vst [vmem:[#allocation79_spill] sm:$0xff] %v4905_v58  ;;  %v4912_v39 = vpop.eup %2940  ;;  %2960 = vpow2.f32 %v1388_v20  ;;  %v1602_v33 = vadd.f32 %v4903_v61, %v1601_v4  ;;  %v573_v46 = vmax.f32 %v572_v55, %v296_v44  ;;  %v297_v20 = vld [vmem:[%s3911_s3 + $0x2d8] sm:$0xff]  ;;  %v577_v4 = vmax.f32 %v298_v6, %v299_v7 }
 0x14f   : > { %1109 = vmax.xlane.f32.xlu1 %v1108_v16  ;;  %1598 = vadd.xlane.f32.xlu0 %v1597_v59  ;;  %6696 = vst [vmem:[#allocation80_spill] sm:$0xff] %v4912_v39  ;;  %v4915_v45 = vpop.eup %2942  ;;  %v1920_v16 = vadd.f32 %v4912_v39, %v4905_v58  ;;  %v1117_v13 = vmax.f32 %v1116_v63, %v424_v57  ;;  %v425_v44 = vld [vmem:[%s3918_s29 + $0x2d8] sm:$0xff] }
 0x150   : > { %6697 = vst [vmem:[#allocation81_spill] sm:$0xff] %v4915_v45  ;;  %v4919_v51 = vpop.eup %2944  ;;  %v574_v35 = vmax.f32 %v573_v46, %v297_v20  ;;  %v301_v7 = vld [vmem:[%s3911_s3 + $0x2f8] sm:$0xff]  ;;  %v428_v20 = vld [vmem:[%s3918_s29 + $0x2f0] sm:$0xff] }
 0x151   : > { %6698 = vst [vmem:[#allocation82_spill] sm:$0xff] %v4919_v51  ;;  %v4921_v59 = vpop.eup %2946  ;;  %v1921_v56 = vadd.f32 %v4915_v45, %v1920_v16  ;;  %v300_v45 = vld [vmem:[%s3911_s3 + $0x2f0] sm:$0xff] }
 0x152   : > { %6699 = vst [vmem:[#allocation83_spill] sm:$0xff] %v4921_v59  ;;  %v4928_v39 = vpop.eup %2948 }
 0x153   : > { %1918 = vadd.xlane.f32.xlu1 %v1917_v37  ;;  %570 = vmax.xlane.f32.xlu0 %v569_v38  ;;  %6700 = vst [vmem:[#allocation84_spill] sm:$0xff] %v4928_v39  ;;  %v4931_v25 = vpop.eup %2950  ;;  %v1605_v38 = vadd.f32 %v4928_v39, %v4921_v59  ;;  %v1922_v18 = vadd.f32 %v4919_v51, %v1921_v56  ;;  %v426_v39 = vld [vmem:[%s3918_s29 + $0x2e0] sm:$0xff]  ;;  %v427_v59 = vld [vmem:[%s3918_s29 + $0x2e8] sm:$0xff] }
 0x154   : > { %6701 = vst [vmem:[#allocation85_spill] sm:$0xff] %v4931_v25  ;;  %v4935_v37 = vpop.eup %2952  ;;  %v1121_v57 = vmax.f32 %v426_v39, %v427_v59  ;;  %v429_v39 = vld [vmem:[%s3918_s29 + $0x2f8] sm:$0xff] }
 0x155   : > { %6702 = vst [vmem:[#allocation86_spill] sm:$0xff] %v4935_v37  ;;  %v4937_v55 = vpop.eup %2954  ;;  %v1606_v16 = vadd.f32 %v4931_v25, %v1605_v38 }
 0x156   : > { %6703 = vst [vmem:[#allocation87_spill] sm:$0xff] %v4937_v55  ;;  %v4943_v58 = vpop.eup %2956 }
 0x157   : > { %1114 = vmax.xlane.f32.xlu1 %v1113_v17  ;;  %1603 = vadd.xlane.f32.xlu0 %v1602_v33  ;;  %6704 = vst [vmem:[#allocation88_spill] sm:$0xff] %v4943_v58  ;;  %v4947_v61 = vpop.eup %2958  ;;  %v1925_v63 = vadd.f32 %v4943_v58, %v4937_v55  ;;  %v1118_v17 = vmax.f32 %v1117_v13, %v425_v44  ;;  %v430_v44 = vld [vmem:[%s3918_s29 + $0x300] sm:$0xff]  ;;  %v432_v58 = vld [vmem:[%s3918_s29 + $0x310] sm:$0xff] }
 0x158   : > { %6705 = vst [vmem:[#allocation89_spill] sm:$0xff] %v4947_v61  ;;  %v578_v33 = vmax.f32 %v577_v4, %v300_v45  ;;  %v1607_v56 = vadd.f32 %v4935_v37, %v1606_v16  ;;  %v4953_v6 = vpop.eup %2960  ;;  %v1122_v13 = vmax.f32 %v1121_v57, %v428_v20  ;;  %v431_v16 = vld [vmem:[%s3918_s29 + $0x308] sm:$0xff]  ;;  %v438_v20 = vld [vmem:[%s3918_s29 + $0x340] sm:$0xff]  ;;  %v308_v55 = vld [vmem:[%s3911_s3 + $0x330] sm:$0xff] }
 0x159   : > { %v1926_v46 = vadd.f32 %v4947_v61, %v1925_v63  ;;  %6706 = vst [vmem:[#allocation90_spill] sm:$0xff] %v4953_v6  ;;  %v306_v63 = vld [vmem:[%s3911_s3 + $0x320] sm:$0xff]  ;;  %v311_v57 = vld [vmem:[%s3911_s3 + $0x348] sm:$0xff]  ;;  %v304_v61 = vld [vmem:[%s3911_s3 + $0x310] sm:$0xff] }
 0x15a   : > { %v579_v38 = vmax.f32 %v578_v33, %v301_v7  ;;  %v1123_v59 = vmax.f32 %v1122_v13, %v429_v39  ;;  %v434_v33 = vld [vmem:[%s3918_s29 + $0x320] sm:$0xff]  ;;  %v315_v13 = vld [vmem:[%s3911_s3 + $0x368] sm:$0xff] }
 0x15b   : > { %1923 = vadd.xlane.f32.xlu1 %v1922_v18  ;;  %575 = vmax.xlane.f32.xlu0 %v574_v35  ;;  %v1927_v45 = vadd.f32 %v4953_v6, %v1926_v46  ;;  %v302_v18 = vld [vmem:[%s3911_s3 + $0x300] sm:$0xff]  ;;  %v303_v35 = vld [vmem:[%s3911_s3 + $0x308] sm:$0xff]  ;;  %v1126_v6 = vmax.f32 %v430_v44, %v431_v16  ;;  %v440_v44 = vld [vmem:[%s3918_s29 + $0x350] sm:$0xff] }
 0x15c   : > { %v310_v46 = vld [vmem:[%s3911_s3 + $0x340] sm:$0xff]  ;;  %v582_v37 = vmax.f32 %v302_v18, %v303_v35  ;;  %v436_v18 = vld [vmem:[%s3918_s29 + $0x330] sm:$0xff] }
 0x15d   : > { %v442_v39 = vld [vmem:[%s3918_s29 + $0x360] sm:$0xff]  ;;  %v592_v51 = vmax.f32 %v310_v46, %v311_v57  ;;  %v312_v35 = vld [vmem:[%s3911_s3 + $0x350] sm:$0xff]  ;;  %v4993_v57 = vmax.f32 %v1126_v6, %v432_v58 }
 0x15e   : > { %v444_v46 = vld [vmem:[%s3918_s29 + $0x370] sm:$0xff] }
 0x15f   : > { %1119 = vmax.xlane.f32.xlu1 %v1118_v17  ;;  %1608 = vadd.xlane.f32.xlu0 %v1607_v56  ;;  %v307_v17 = vld [vmem:[%s3911_s3 + $0x328] sm:$0xff]  ;;  %v5012_v58 = vmax.f32 %v592_v51, %v312_v35 }
 0x160   : > { %v435_v56 = vld [vmem:[%s3918_s29 + $0x328] sm:$0xff]  ;;  %v587_v25 = vmax.f32 %v306_v63, %v307_v17 }
 0x161   : > { %v3436_v17 = vld [vmem:[%s3911_s3 + $0x188] sm:$0xff] }
 0x163   : > { %1928 = vadd.xlane.f32.xlu1 %v1927_v45  ;;  %580 = vmax.xlane.f32.xlu0 %v579_v38  ;;  %v439_v45 = vld [vmem:[%s3918_s29 + $0x348] sm:$0xff]  ;;  %v314_v38 = vld [vmem:[%s3911_s3 + $0x360] sm:$0xff] }
 0x164   : > { %v1136_v3 = vmax.f32 %v438_v20, %v439_v45  ;;  %v597_v16 = vmax.f32 %v314_v38, %v315_v13  ;;  %v4995_v20 = vmax.f32 %v587_v25, %v308_v55  ;;  %v318_v45 = vld [vmem:[%s3911_s3 + $0x380] sm:$0xff]  ;;  %v319_v38 = vld [vmem:[%s3911_s3 + $0x388] sm:$0xff]  ;;  %v3437_v13 = vld [vmem:[%s3911_s3 + $0x190] sm:$0xff] }
 0x166   : > { %v5014_v25 = vmax.f32 %v1136_v3, %v440_v44  ;;  %v5036_v44 = vld [vmem:[%s3911_s3 + $0x378] sm:$0xff] }
 0x167   : > { %1124 = vmax.xlane.f32.xlu1 %v1123_v59  ;;  %v443_v59 = vld [vmem:[%s3918_s29 + $0x368] sm:$0xff] }
 0x168   : > { %v1141_v63 = vmax.f32 %v442_v39, %v443_v59  ;;  %v5002_v39 = vld [vmem:[%s3911_s3 + $0x318] sm:$0xff] }
 0x169   : > { %v5005_v59 = vld [vmem:[%s3918_s29 + $0x318] sm:$0xff] }
 0x16a   : > { %v5031_v51 = vmax.f32 %v1141_v63, %v444_v46 }
 0x18d   : > { %v1554_v4 = vpop.xlane.xlu0 %1553 }
 0x18e   : > { %2962 = vrcp.f32 %v1554_v4  ;;  %v1131_v4 = vmax.f32 %v434_v33, %v435_v56  ;;  %v316_v56 = vld [vmem:[%s3911_s3 + $0x370] sm:$0xff] }
 0x191   : > { %v4969_v7 = vpop.xlane.xlu0 %525 }
 0x192   : > { %v670_v48 = vsub.f32 %v3435_v47, %v4969_v7  ;;  %v671_v33 = vsub.f32 %v3436_v17, %v4969_v7  ;;  %v4991_v47 = vmax.f32 %v582_v37, %v304_v61  ;;  %v5008_v17 = vld [vmem:[%s3911_s3 + $0x338] sm:$0xff]  ;;  %v5010_v61 = vmax.f32 %v1131_v4, %v436_v18  ;;  %v3439_v18 = vld [vmem:[%s3918_s29 + $0x180] sm:$0xff] }
 0x193   : > { %v3438_v37 = vld [vmem:[%s3911_s3 + $0x198] sm:$0xff]  ;;  %v5029_v4 = vmax.f32 %v597_v16, %v316_v56  ;;  %v320_v56 = vld [vmem:[%s3911_s3 + $0x390] sm:$0xff] }
 0x194   : > { %v673_v55 = vsub.f32 %v3438_v37, %v4969_v7  ;;  %v846_v6 = vmul.f32 1.442695, %v670_v48  ;;  %v848_v3 = vmul.f32 1.442695, %v671_v33  ;;  %v5039_v48 = vld [vmem:[%s3918_s29 + $0x378] sm:$0xff] }
 0x195   : > { %v1874_v54 = vpop.xlane.xlu1 %1873  ;;  %v4982_v10 = vpop.xlane.xlu0 %1558  ;;  %6707 = vst [vmem:[#allocation91_spill] sm:$0xff] %v5039_v48 }
 0x196   : > { %2964 = vrcp.f32 %v1874_v54  ;;  %v672_v54 = vsub.f32 %v3437_v13, %v4969_v7  ;;  %v602_v7 = vmax.f32 %v318_v45, %v319_v38  ;;  %v3441_v38 = vld [vmem:[%s3918_s29 + $0x190] sm:$0xff] }
 0x197   : > { %2966 = vpow2.f32 %v846_v6 }
 0x198   : > { %v2963_v37 = vpop.eup %2962  ;;  %v850_v46 = vmul.f32 1.442695, %v672_v54  ;;  %2968 = vpow2.f32 %v848_v3  ;;  %v5063_v34 = vmax.f32 %v602_v7, %v320_v56 }
 0x199   : > { %v5018_v13 = vpop.xlane.xlu1 %1069  ;;  %v1742_v54 = vmul.f32 %v2963_v37, %v4364_v14  ;;  %2970 = vrcp.f32 %v4982_v10  ;;  %v1744_v63 = vmul.f32 %v2963_v37, %v4376_v49  ;;  %v1745_v33 = vmul.f32 %v2963_v37, %v4382_v21  ;;  %v3442_v14 = vld [vmem:[%s3918_s29 + $0x198] sm:$0xff] }
 0x19a   : > { %v1214_v35 = vsub.f32 %v3439_v18, %v5018_v13  ;;  %v1215_v40 = vsub.f32 %v3440_v27, %v5018_v13  ;;  %v5043_v30 = vpop.xlane.xlu0 %530  ;;  %v852_v18 = vmul.f32 1.442695, %v673_v55  ;;  %6708 = vst [vmem:[#allocation92_spill] sm:$0xff] %v5063_v34  ;;  %v1743_v27 = vmul.f32 %v2963_v37, %v4371_v12  ;;  %v3451_v34 = vld [vmem:[%s3911_s3 + $0x1c0] sm:$0xff] }
 0x19b   : > { %v1216_v55 = vsub.f32 %v3441_v38, %v5018_v13  ;;  %2972 = vpow2.f32 %v850_v46  ;;  %v1217_v3 = vsub.f32 %v3442_v14, %v5018_v13  ;;  %v5084_v38 = vld [vmem:[%s3911_s3 + $0x398] sm:$0xff] }
 0x19c   : > { %v1390_v45 = vmul.f32 1.442695, %v1214_v35  ;;  %v1392_v6 = vmul.f32 1.442695, %v1215_v40  ;;  %2974 = vpow2.f32 %v852_v18  ;;  %v3443_v40 = vld [vmem:[%s3911_s3 + $0x1a0] sm:$0xff]  ;;  %6709 = vst [vmem:[#allocation93_spill] sm:$0xff] %v5084_v38 }
 0x19d   : > { %v1879_v16 = vpop.xlane.xlu1 %1878  ;;  %v674_v10 = vsub.f32 %v3443_v40, %v5043_v30  ;;  %v1394_v46 = vmul.f32 1.442695, %v1216_v55  ;;  %v5087_v18 = vld [vmem:[%s3918_s29 + $0x380] sm:$0xff]  ;;  %v1396_v14 = vmul.f32 1.442695, %v1217_v3 }
 0x19e   : > { %2976 = vpow2.f32 %v1390_v45  ;;  %v3446_v45 = vld [vmem:[%s3911_s3 + $0x1b8] sm:$0xff] }
 0x19f   : > { %2978 = vpow2.f32 %v1392_v6  ;;  %v677_v40 = vsub.f32 %v3446_v45, %v5043_v30  ;;  %v854_v53 = vmul.f32 1.442695, %v674_v10 }
 0x1a0   : > { %v2965_v43 = vpop.eup %2964  ;;  %2980 = vrcp.f32 %v1879_v16 }
 0x1a1   : > { %v2062_v35 = vmul.f32 %v2965_v43, %v4412_v42  ;;  %v2063_v12 = vmul.f32 %v2965_v43, %v4419_v26  ;;  %v5077_v49 = vpop.xlane.xlu0 %1563  ;;  %v2064_v21 = vmul.f32 %v2965_v43, %v4424_v23  ;;  %v2065_v13 = vmul.f32 %v2965_v43, %v4429_v5  ;;  %v3444_v42 = vld [vmem:[%s3911_s3 + $0x1a8] sm:$0xff]  ;;  %v3445_v5 = vld [vmem:[%s3911_s3 + $0x1b0] sm:$0xff]  ;;  %v5110_v45 = vpop.eup %2966 }
 0x1a2   : > { %v1075_v7 = vpop.xlane.xlu1 %1074  ;;  %v675_v26 = vsub.f32 %v3444_v42, %v5043_v30  ;;  %v5090_v23 = vld [vmem:[%s3918_s29 + $0x388] sm:$0xff]  ;;  %v676_v43 = vsub.f32 %v3445_v5, %v5043_v30  ;;  %2982 = vpow2.f32 %v1394_v46  ;;  %v860_v10 = vmul.f32 1.442695, %v677_v40 }
 0x1a3   : > { %v2190_v37 = vsub.f32 %v2062_v35, %v1742_v54  ;;  %v2191_v56 = vsub.f32 %v2063_v12, %v1743_v27  ;;  %v5097_v27 = vld [vmem:[%s3911_s3 + $0x3a0] sm:$0xff]  ;;  %v5100_v54 = vld [vmem:[%s3911_s3 + $0x3a8] sm:$0xff]  ;;  %v2192_v3 = vsub.f32 %v2064_v21, %v1744_v63  ;;  %v2193_v16 = vsub.f32 %v2065_v13, %v1745_v33  ;;  %v5118_v33 = vpop.eup %2968 }
 0x1a4   : > { %v3447_v35 = vld [vmem:[%s3918_s29 + $0x1a0] sm:$0xff]  ;;  %v3448_v42 = vld [vmem:[%s3918_s29 + $0x1a8] sm:$0xff]  ;;  %v856_v13 = vmul.f32 1.442695, %v675_v26  ;;  %v2971_v5 = vpop.eup %2970  ;;  %2984 = vpow2.f32 %v1396_v14 }
 0x1a5   : > { %v2318_v55 = vmul.f32 %v2190_v37, %v2190_v37  ;;  %v2319_v6 = vmul.f32 %v2191_v56, %v2191_v56  ;;  %v1218_v12 = vsub.f32 %v3447_v35, %v1075_v7  ;;  %v1219_v41 = vsub.f32 %v3448_v42, %v1075_v7  ;;  %v3450_v56 = vld [vmem:[%s3918_s29 + $0x1b8] sm:$0xff]  ;;  %v5114_v35 = vpop.xlane.xlu0 %535 }
 0x1a6   : > { %v5104_v50 = vpop.xlane.xlu1 %1883  ;;  %v1220_v37 = vsub.f32 %v3449_v24, %v1075_v7  ;;  %v1221_v52 = vsub.f32 %v3450_v56, %v1075_v7  ;;  %v858_v42 = vmul.f32 1.442695, %v676_v43  ;;  %v5120_v7 = vpop.eup %2972  ;;  %v2320_v56 = vmul.f32 %v2192_v3, %v2192_v3  ;;  %v3453_v43 = vld [vmem:[%s3911_s3 + $0x1d0] sm:$0xff] }
 0x1a7   : > { %v2446_v21 = vadd.f32 %v2319_v6, %v2318_v55  ;;  %v1398_v24 = vmul.f32 1.442695, %v1218_v12  ;;  %v1400_v30 = vmul.f32 1.442695, %v1219_v41  ;;  %v2321_v38 = vmul.f32 %v2193_v16, %v2193_v16  ;;  %v5126_v55 = vpop.eup %2974 }
 0x1a8   : > { %v678_v63 = vsub.f32 %v3451_v34, %v5114_v35  ;;  %v679_v36 = vsub.f32 %v3452_v31, %v5114_v35  ;;  %2986 = vpow2.f32 %v854_v53  ;;  %v1402_v26 = vmul.f32 1.442695, %v1220_v37  ;;  %v5130_v41 = vpop.eup %2976 }
 0x1a9   : > { %v1404_v46 = vmul.f32 1.442695, %v1221_v52  ;;  %v680_v14 = vsub.f32 %v3453_v43, %v5114_v35  ;;  %v2447_v40 = vadd.f32 %v2446_v21, %v2320_v56  ;;  %v1746_v6 = vmul.f32 %v2971_v5, %v4386_v15  ;;  %v5136_v31 = vpop.eup %2978  ;;  %v5140_v3 = vpop.xlane.xlu0 %1568  ;;  %v3454_v15 = vld [vmem:[%s3911_s3 + $0x1d8] sm:$0xff]  ;;  %v6711_v56 = vld [vmem:[#allocation51_spill] sm:$0xff] }
 0x1aa   : > { %v1747_v12 = vmul.f32 %v2971_v5, %v4394_v11  ;;  %2988 = vpow2.f32 %v856_v13  ;;  %v5134_v34 = vpop.xlane.xlu1 %1079  ;;  %6710 = vst [vmem:[#allocation94_spill] sm:$0xff] %v5136_v31  ;;  %v1748_v53 = vmul.f32 %v2971_v5, %v4399_v9  ;;  %v1749_v52 = vmul.f32 %v2971_v5, %v4407_v2  ;;  %v2981_v37 = vpop.eup %2980  ;;  %v3455_v2 = vld [vmem:[%s3918_s29 + $0x1c0] sm:$0xff] }
 0x1ab   : > { %2990 = vpow2.f32 %v858_v42  ;;  %v1610_v16 = vadd.f32 %v5118_v33, %v5110_v45  ;;  %v681_v11 = vsub.f32 %v3454_v15, %v5114_v35  ;;  %v862_v21 = vmul.f32 1.442695, %v678_v63 }
 0x1ac   : > { %2992 = vpow2.f32 %v860_v10  ;;  %v864_v13 = vmul.f32 1.442695, %v679_v36  ;;  %v2066_v43 = vmul.f32 %v2981_v37, %v6711_v56  ;;  %v2067_v9 = vmul.f32 %v2981_v37, %v6712_v0  ;;  %v5155_v15 = vpop.eup %2982  ;;  %v6715_v0 = vld [vmem:[#allocation54_spill] sm:$0xff] }
 0x1ad   : > { %v866_v29 = vmul.f32 1.442695, %v680_v14  ;;  %v1222_v5 = vsub.f32 %v3455_v2, %v5134_v34  ;;  %v2448_v42 = vadd.f32 %v2447_v40, %v2321_v38  ;;  %v2068_v48 = vmul.f32 %v2981_v37, %v6713_v22  ;;  %6714 = vst [vmem:[#allocation51_spill] sm:$0xff] %v5155_v15  ;;  %v3456_v38 = vld [vmem:[%s3918_s29 + $0x1c8] sm:$0xff] }
 0x1ae   : > { %2994 = vrcp.f32 %v5077_v49  ;;  %v1611_v10 = vadd.f32 %v5120_v7, %v1610_v16  ;;  %v2194_v35 = vsub.f32 %v2066_v43, %v1746_v6  ;;  %v2195_v63 = vsub.f32 %v2067_v9, %v1747_v12  ;;  %v5162_v40 = vpop.xlane.xlu1 %1888  ;;  %v5164_v6 = vpop.eup %2984  ;;  %v3457_v16 = vld [vmem:[%s3918_s29 + $0x1d0] sm:$0xff] }
 0x1af   : > { %2996 = vpow2.f32 %v1398_v24  ;;  %v1930_v36 = vadd.f32 %v5136_v31, %v5130_v41  ;;  %v2069_v14 = vmul.f32 %v2981_v37, %v6715_v0  ;;  %v1223_v22 = vsub.f32 %v3456_v38, %v5134_v34  ;;  %6716 = vst [vmem:[#allocation52_spill] sm:$0xff] %v5164_v6  ;;  %v5168_v43 = vpop.xlane.xlu0 %540 }
 0x1b0   : > { %2998 = vrcp.f32 %v5104_v50  ;;  %v1612_v49 = vadd.f32 %v5126_v55, %v1611_v10  ;;  %v2322_v24 = vmul.f32 %v2194_v35, %v2194_v35  ;;  %v868_v12 = vmul.f32 1.442695, %v681_v11  ;;  %v3458_v50 = vld [vmem:[%s3918_s29 + $0x1d8] sm:$0xff] }
 0x1b1   : > { %3000 = vpow2.f32 %v1400_v30  ;;  %v1224_v56 = vsub.f32 %v3457_v16, %v5134_v34  ;;  %v2196_v37 = vsub.f32 %v2068_v48, %v1748_v53  ;;  %v1225_v9 = vsub.f32 %v3458_v50, %v5134_v34  ;;  %v3459_v48 = vld [vmem:[%s3911_s3 + $0x1e0] sm:$0xff] }
 0x1b2   : > { %3002 = vpow2.f32 %v1402_v26  ;;  %v1406_v2 = vmul.f32 1.442695, %v1222_v5  ;;  %1613 = vadd.xlane.f32.xlu0 %v1612_v49  ;;  %v5172_v10 = vpop.eup %2986  ;;  %v2323_v0 = vmul.f32 %v2195_v63, %v2195_v63  ;;  %v2449_v38 = vadd.f32 %v2448_v42, %v2322_v24  ;;  %v3462_v24 = vld [vmem:[%s3911_s3 + $0x1f8] sm:$0xff] }
 0x1b3   : > { %6717 = vst [vmem:[#allocation53_spill] sm:$0xff] %v5172_v10  ;;  %3004 = vpow2.f32 %v1404_v46  ;;  %v1931_v30 = vadd.f32 %v5155_v15, %v1930_v36  ;;  %v2197_v35 = vsub.f32 %v2069_v14, %v1749_v52  ;;  %v1408_v16 = vmul.f32 1.442695, %v1223_v22  ;;  %v3460_v52 = vld [vmem:[%s3911_s3 + $0x1e8] sm:$0xff]  ;;  %v5189_v22 = vpop.xlane.xlu1 %1084 }
 0x1b4   : > { %v5175_v11 = vpop.eup %2988  ;;  %3006 = vpow2.f32 %v862_v21  ;;  %v682_v26 = vsub.f32 %v3459_v48, %v5168_v43  ;;  %v2450_v53 = vadd.f32 %v2449_v38, %v2323_v0  ;;  %v1410_v5 = vmul.f32 1.442695, %v1224_v56  ;;  %v6721_v0 = vld [vmem:[#allocation11_spill] sm:$0xff]  ;;  %v3463_v38 = vld [vmem:[%s3918_s29 + $0x1e0] sm:$0xff]  ;;  %v3464_v48 = vld [vmem:[%s3918_s29 + $0x1e8] sm:$0xff] }
 0x1b5   : > { %6718 = vst [vmem:[#allocation54_spill] sm:$0xff] %v5175_v11  ;;  %v5179_v34 = vpop.eup %2990  ;;  %3008 = vpow2.f32 %v864_v13  ;;  %v1932_v46 = vadd.f32 %v5164_v6, %v1931_v30  ;;  %v2324_v63 = vmul.f32 %v2196_v37, %v2196_v37  ;;  %v1412_v36 = vmul.f32 1.442695, %v1225_v9  ;;  %v3461_v13 = vld [vmem:[%s3911_s3 + $0x1f0] sm:$0xff]  ;;  %v6728_v6 = vld [vmem:[#allocation58_spill] sm:$0xff] }
 0x1b6   : > { %6719 = vst [vmem:[#allocation95_spill] sm:$0xff] %v5179_v34  ;;  %v5182_v42 = vpop.eup %2992  ;;  %3010 = vpow2.f32 %v866_v29  ;;  %v683_v21 = vsub.f32 %v3460_v52, %v5168_v43  ;;  %v6720_v14 = vmax.f32 %v4991_v47, %v5002_v39  ;;  %v684_v49 = vsub.f32 %v3461_v13, %v5168_v43 }
 0x1b7   : > { %3012 = vpow2.f32 %v868_v12  ;;  %v685_v56 = vsub.f32 %v3462_v24, %v5168_v43  ;;  %1933 = vadd.xlane.f32.xlu1 %v1932_v46  ;;  %v1615_v29 = vadd.f32 %v5175_v11, %v5172_v10  ;;  %v2325_v50 = vmul.f32 %v2197_v35, %v2197_v35  ;;  %v5204_v46 = vpop.xlane.xlu0 %1573  ;;  %v6727_v10 = vld [vmem:[#allocation57_spill] sm:$0xff] }
 0x1b8   : > { %585 = vmax.xlane.f32.xlu0 %v6720_v14  ;;  %v2995_v37 = vpop.eup %2994  ;;  %v2451_v9 = vadd.f32 %v2450_v53, %v2324_v63  ;;  %3014 = vpow2.f32 %v1406_v2  ;;  %v870_v47 = vmul.f32 1.442695, %v682_v26  ;;  %v1226_v30 = vsub.f32 %v3463_v38, %v5189_v22  ;;  %v6722_v14 = vld [vmem:[#allocation12_spill] sm:$0xff]  ;;  %v6723_v53 = vld [vmem:[#allocation45_spill] sm:$0xff] }
 0x1b9   : > { %v5197_v39 = vpop.eup %2996  ;;  %v1750_v12 = vmul.f32 %v2995_v37, %v6721_v0  ;;  %3016 = vpow2.f32 %v1408_v16  ;;  %v1227_v43 = vsub.f32 %v3464_v48, %v5189_v22  ;;  %v1751_v35 = vmul.f32 %v2995_v37, %v6722_v14  ;;  %v6724_v26 = vld [vmem:[#allocation16_spill] sm:$0xff]  ;;  %v6725_v16 = vld [vmem:[#allocation55_spill] sm:$0xff] }
 0x1ba   : > { %v2999_v52 = vpop.eup %2998  ;;  %v1752_v2 = vmul.f32 %v2995_v37, %v6723_v53  ;;  %v1753_v63 = vmul.f32 %v2995_v37, %v6724_v26  ;;  %v1616_v13 = vadd.f32 %v5179_v34, %v1615_v29  ;;  %v6726_v38 = vld [vmem:[#allocation56_spill] sm:$0xff]  ;;  %v6729_v31 = vmax.f32 %v4993_v57, %v5005_v59  ;;  %v3465_v29 = vld [vmem:[%s3918_s29 + $0x1f0] sm:$0xff] }
 0x1bb   : > { %v5210_v24 = vpop.eup %3000  ;;  %v2070_v0 = vmul.f32 %v2999_v52, %v6725_v16  ;;  %v2071_v11 = vmul.f32 %v2999_v52, %v6726_v38  ;;  %v2072_v48 = vmul.f32 %v2999_v52, %v6727_v10  ;;  %v2073_v15 = vmul.f32 %v2999_v52, %v6728_v6 }
 0x1bc   : > { %1129 = vmax.xlane.f32.xlu1 %v6729_v31  ;;  %v5219_v14 = vpop.eup %3002  ;;  %v2452_v53 = vadd.f32 %v2451_v9, %v2325_v50  ;;  %3018 = vrcp.f32 %v5140_v3  ;;  %v1228_v37 = vsub.f32 %v3465_v29, %v5189_v22  ;;  %v1617_v26 = vadd.f32 %v5182_v42, %v1616_v13  ;;  %v5243_v13 = vpop.xlane.xlu1 %1893  ;;  %v3467_v29 = vld [vmem:[%s3911_s3 + $0x200] sm:$0xff] }
 0x1bd   : > { %v5225_v16 = vpop.eup %3004  ;;  %v2198_v10 = vsub.f32 %v2070_v0, %v1750_v12  ;;  %v2199_v38 = vsub.f32 %v2071_v11, %v1751_v35  ;;  %v2200_v6 = vsub.f32 %v2072_v48, %v1752_v2  ;;  %v2201_v52 = vsub.f32 %v2073_v15, %v1753_v63  ;;  %v3466_v11 = vld [vmem:[%s3918_s29 + $0x1f8] sm:$0xff]  ;;  %v5236_v12 = vpop.xlane.xlu0 %545  ;;  %v324_v0 = vld [vmem:[%s3911_s3 + $0x3b0] sm:$0xff] }
 0x1be   : > { %v5227_v34 = vpop.eup %3006  ;;  %3020 = vrcp.f32 %v5162_v40  ;;  %v872_v57 = vmul.f32 1.442695, %v683_v21  ;;  %v874_v59 = vmul.f32 1.442695, %v684_v49  ;;  %1618 = vadd.xlane.f32.xlu0 %v1617_v26  ;;  %v1935_v31 = vadd.f32 %v5210_v24, %v5197_v39 }
 0x1bf   : > { %v5232_v3 = vpop.eup %3008  ;;  %v2326_v50 = vmul.f32 %v2198_v10, %v2198_v10  ;;  %3022 = vpow2.f32 %v1410_v5  ;;  %v876_v9 = vmul.f32 1.442695, %v685_v56  ;;  %v1229_v15 = vsub.f32 %v3466_v11, %v5189_v22  ;;  %v448_v22 = vld [vmem:[%s3918_s29 + $0x390] sm:$0xff] }
 0x1c0   : > { %v5238_v40 = vpop.eup %3010  ;;  %3024 = vpow2.f32 %v1412_v36  ;;  %v1414_v21 = vmul.f32 1.442695, %v1226_v30  ;;  %v1416_v49 = vmul.f32 1.442695, %v1227_v43  ;;  %v1936_v35 = vadd.f32 %v5219_v14, %v1935_v31  ;;  %v3468_v30 = vld [vmem:[%s3911_s3 + $0x208] sm:$0xff] }
 0x1c1   : > { %v5241_v2 = vpop.eup %3012  ;;  %v2327_v5 = vmul.f32 %v2199_v38, %v2199_v38  ;;  %v2453_v63 = vadd.f32 %v2452_v53, %v2326_v50  ;;  %3026 = vpow2.f32 %v870_v47  ;;  %v1418_v56 = vmul.f32 1.442695, %v1228_v37 }
 0x1c2   : > { %v5247_v48 = vpop.eup %3014  ;;  %3028 = vpow2.f32 %v872_v57  ;;  %v686_v36 = vsub.f32 %v3467_v29, %v5236_v12  ;;  %v687_v43 = vsub.f32 %v3468_v30, %v5236_v12  ;;  %v1937_v26 = vadd.f32 %v5225_v16, %v1936_v35  ;;  %v6735_v30 = vld [vmem:[#allocation17_spill] sm:$0xff] }
 0x1c3   : > { %v6730_v53 = vmax.f32 %v4995_v20, %v5008_v17  ;;  %v5257_v47 = vpop.eup %3016  ;;  %v2328_v37 = vmul.f32 %v2200_v6, %v2200_v6  ;;  %v2454_v10 = vadd.f32 %v2453_v63, %v2327_v5  ;;  %3030 = vpow2.f32 %v874_v59  ;;  %v3470_v5 = vld [vmem:[%s3911_s3 + $0x218] sm:$0xff] }
 0x1c4   : > { %v1620_v38 = vadd.f32 %v5232_v3, %v5227_v34  ;;  %3032 = vpow2.f32 %v876_v9  ;;  %v1420_v57 = vmul.f32 1.442695, %v1229_v15  ;;  %1938 = vadd.xlane.f32.xlu1 %v1937_v26  ;;  %v6731_v31 = vmax.f32 %v5087_v18, %v5090_v23  ;;  %v3469_v9 = vld [vmem:[%s3911_s3 + $0x210] sm:$0xff] }
 0x1c5   : > { %590 = vmax.xlane.f32.xlu0 %v6730_v53  ;;  %v6732_v20 = vmax.f32 %v5097_v27, %v5100_v54  ;;  %v2329_v6 = vmul.f32 %v2201_v52, %v2201_v52  ;;  %v2455_v11 = vadd.f32 %v2454_v10, %v2328_v37  ;;  %3034 = vpow2.f32 %v1414_v21  ;;  %v5277_v54 = vpop.xlane.xlu1 %1089  ;;  %v5279_v52 = vpop.xlane.xlu0 %1578  ;;  %v6738_v37 = vld [vmem:[#allocation13_spill] sm:$0xff] }
 0x1c6   : > { %v5264_v50 = vmax.f32 %v6731_v31, %v448_v22  ;;  %v1621_v59 = vadd.f32 %v5238_v40, %v1620_v38  ;;  %v3019_v35 = vpop.eup %3018  ;;  %3036 = vpow2.f32 %v1416_v49  ;;  %v688_v15 = vsub.f32 %v3469_v9, %v5236_v12  ;;  %v6733_v22 = vld [vmem:[#allocation24_spill] sm:$0xff]  ;;  %v6734_v49 = vld [vmem:[#allocation15_spill] sm:$0xff]  ;;  %v6739_v38 = vld [vmem:[#allocation14_spill] sm:$0xff] }
 0x1c7   : > { %v5269_v17 = vmax.f32 %v6732_v20, %v324_v0  ;;  %v689_v18 = vsub.f32 %v3470_v5, %v5236_v12  ;;  %v878_v23 = vmul.f32 1.442695, %v686_v36  ;;  %v2456_v63 = vadd.f32 %v2455_v11, %v2329_v6  ;;  %v6736_v12 = vld [vmem:[#allocation19_spill] sm:$0xff]  ;;  %v6740_v20 = vld [vmem:[#allocation18_spill] sm:$0xff]  ;;  %v5295_v9 = vld [vmem:[%s3918_s29 + $0x3a0] sm:$0xff] }
 0x1c8   : > { %v1754_v29 = vmul.f32 %v3019_v35, %v6733_v22  ;;  %3038 = vpow2.f32 %v1418_v56  ;;  %v880_v27 = vmul.f32 1.442695, %v687_v43  ;;  %v3021_v21 = vpop.eup %3020  ;;  %v1755_v0 = vmul.f32 %v3019_v35, %v6734_v49  ;;  %v5298_v5 = vld [vmem:[%s3918_s29 + $0x3a8] sm:$0xff] }
 0x1c9   : > { %v1756_v26 = vmul.f32 %v3019_v35, %v6735_v30  ;;  %v1757_v36 = vmul.f32 %v3019_v35, %v6736_v12  ;;  %v6737_v53 = vmax.f32 %v5010_v61, %v5021_v60  ;;  %v1622_v56 = vadd.f32 %v5241_v2, %v1621_v59  ;;  %v5288_v43 = vpop.eup %3022  ;;  %v3471_v60 = vld [vmem:[%s3918_s29 + $0x200] sm:$0xff]  ;;  %v3472_v59 = vld [vmem:[%s3918_s29 + $0x208] sm:$0xff] }
 0x1ca   : > { %v2074_v10 = vmul.f32 %v3021_v21, %v6738_v37  ;;  %v2075_v31 = vmul.f32 %v3021_v21, %v6739_v38  ;;  %v2076_v6 = vmul.f32 %v3021_v21, %v6740_v20  ;;  %v2077_v11 = vmul.f32 %v3021_v21, %v4534_v19  ;;  %v5300_v35 = vpop.eup %3024 }
 0x1cb   : > { %1134 = vmax.xlane.f32.xlu1 %v6737_v53  ;;  %3040 = vrcp.f32 %v5204_v46  ;;  %v1230_v61 = vsub.f32 %v3471_v60, %v5277_v54  ;;  %v1231_v22 = vsub.f32 %v3472_v59, %v5277_v54  ;;  %1623 = vadd.xlane.f32.xlu0 %v1622_v56  ;;  %v1940_v49 = vadd.f32 %v5257_v47, %v5247_v48  ;;  %v5309_v19 = vpop.eup %3026 }
 0x1cc   : > { %6741 = vst [vmem:[#allocation11_spill] sm:$0xff] %v5309_v19  ;;  %v2202_v21 = vsub.f32 %v2074_v10, %v1754_v29  ;;  %v2203_v30 = vsub.f32 %v2075_v31, %v1755_v0  ;;  %v2204_v12 = vsub.f32 %v2076_v6, %v1756_v26  ;;  %v2205_v53 = vsub.f32 %v2077_v11, %v1757_v36  ;;  %v5311_v37 = vpop.eup %3028  ;;  %v3473_v29 = vld [vmem:[%s3918_s29 + $0x210] sm:$0xff]  ;;  %v5321_v26 = vpop.xlane.xlu0 %550 }
 0x1cd   : > { %6742 = vst [vmem:[#allocation12_spill] sm:$0xff] %v5311_v37  ;;  %3042 = vrcp.f32 %v5243_v13  ;;  %v882_v46 = vmul.f32 1.442695, %v688_v15  ;;  %v1941_v38 = vadd.f32 %v5288_v43, %v1940_v49  ;;  %v5317_v20 = vpop.eup %3030  ;;  %v884_v59 = vmul.f32 1.442695, %v689_v18  ;;  %v3474_v13 = vld [vmem:[%s3918_s29 + $0x218] sm:$0xff] }
 0x1ce   : > { %v2330_v60 = vmul.f32 %v2202_v21, %v2202_v21  ;;  %3044 = vpow2.f32 %v1420_v57  ;;  %v1232_v0 = vsub.f32 %v3473_v29, %v5277_v54  ;;  %v5323_v36 = vpop.eup %3032  ;;  %v1233_v15 = vsub.f32 %v3474_v13, %v5277_v54  ;;  %v1899_v21 = vpop.xlane.xlu1 %1898  ;;  %v3475_v29 = vld [vmem:[%s3911_s3 + $0x220] sm:$0xff] }
 0x1cf   : > { %3046 = vpow2.f32 %v878_v23  ;;  %v1422_v10 = vmul.f32 1.442695, %v1230_v61  ;;  %v1942_v31 = vadd.f32 %v5300_v35, %v1941_v38  ;;  %v6743_v57 = vmax.f32 %v5012_v58, %v5024_v62  ;;  %v5331_v18 = vpop.eup %3034  ;;  %v3476_v61 = vld [vmem:[%s3911_s3 + $0x228] sm:$0xff] }
 0x1d0   : > { %v2331_v6 = vmul.f32 %v2203_v30, %v2203_v30  ;;  %v2457_v11 = vadd.f32 %v2456_v63, %v2330_v60  ;;  %3048 = vpow2.f32 %v880_v27  ;;  %v1424_v49 = vmul.f32 1.442695, %v1231_v22  ;;  %v5333_v23 = vpop.eup %3036 }
 0x1d1   : > { %595 = vmax.xlane.f32.xlu0 %v6743_v57  ;;  %3050 = vpow2.f32 %v882_v46  ;;  %v690_v54 = vsub.f32 %v3475_v29, %v5321_v26  ;;  %v691_v38 = vsub.f32 %v3476_v61, %v5321_v26  ;;  %1943 = vadd.xlane.f32.xlu1 %v1942_v31  ;;  %v1625_v62 = vadd.f32 %v5311_v37, %v5309_v19  ;;  %v3477_v46 = vld [vmem:[%s3911_s3 + $0x230] sm:$0xff]  ;;  %v3478_v31 = vld [vmem:[%s3911_s3 + $0x238] sm:$0xff] }
 0x1d2   : > { %v5341_v58 = vpop.eup %3038  ;;  %v2332_v63 = vmul.f32 %v2204_v12, %v2204_v12  ;;  %v2458_v27 = vadd.f32 %v2457_v11, %v2331_v6  ;;  %3052 = vpow2.f32 %v884_v59  ;;  %v1426_v22 = vmul.f32 1.442695, %v1232_v0  ;;  %v5358_v11 = vpop.xlane.xlu0 %1583 }
 0x1d3   : > { %3054 = vpow2.f32 %v1422_v10  ;;  %v1428_v30 = vmul.f32 1.442695, %v1233_v15  ;;  %v692_v60 = vsub.f32 %v3477_v46, %v5321_v26  ;;  %v1626_v13 = vadd.f32 %v5317_v20, %v1625_v62  ;;  %v6745_v10 = vld [vmem:[#allocation20_spill] sm:$0xff]  ;;  %v6748_v62 = vld [vmem:[#allocation47_spill] sm:$0xff]  ;;  %v6750_v46 = vld [vmem:[#allocation25_spill] sm:$0xff] }
 0x1d4   : > { %v2333_v57 = vmul.f32 %v2205_v53, %v2205_v53  ;;  %v2459_v29 = vadd.f32 %v2458_v27, %v2332_v63  ;;  %3056 = vpow2.f32 %v1424_v49  ;;  %v693_v61 = vsub.f32 %v3478_v31, %v5321_v26  ;;  %v5356_v26 = vpop.xlane.xlu1 %1094  ;;  %v6746_v49 = vld [vmem:[#allocation21_spill] sm:$0xff]  ;;  %v6749_v27 = vld [vmem:[#allocation46_spill] sm:$0xff] }
 0x1d5   : > { %v3041_v56 = vpop.eup %3040  ;;  %v886_v37 = vmul.f32 1.442695, %v690_v54  ;;  %v888_v19 = vmul.f32 1.442695, %v691_v38  ;;  %v6744_v12 = vmax.f32 %v5014_v25, %v5027_v28  ;;  %v1627_v59 = vadd.f32 %v5323_v36, %v1626_v13 }
 0x1d6   : > { %v1945_v0 = vadd.f32 %v5333_v23, %v5331_v18  ;;  %v2460_v15 = vadd.f32 %v2459_v29, %v2333_v57  ;;  %v1758_v53 = vmul.f32 %v3041_v56, %v4593_v8  ;;  %v1759_v6 = vmul.f32 %v3041_v56, %v6745_v10  ;;  %v5370_v29 = vld [vmem:[%s3918_s29 + $0x398] sm:$0xff]  ;;  %v452_v10 = vld [vmem:[%s3918_s29 + $0x3b0] sm:$0xff] }
 0x1d7   : > { %1139 = vmax.xlane.f32.xlu1 %v6744_v12  ;;  %3058 = vpow2.f32 %v1426_v22  ;;  %v3043_v28 = vpop.eup %3042  ;;  %v1760_v25 = vmul.f32 %v3041_v56, %v4603_v32  ;;  %v1761_v54 = vmul.f32 %v3041_v56, %v6746_v49  ;;  %1628 = vadd.xlane.f32.xlu0 %v1627_v59  ;;  %v5373_v32 = vld [vmem:[%s3911_s3 + $0x3b8] sm:$0xff]  ;;  %v3480_v12 = vld [vmem:[%s3918_s29 + $0x228] sm:$0xff] }
 0x1d8   : > { %3060 = vpow2.f32 %v1428_v30  ;;  %v1946_v8 = vadd.f32 %v5341_v58, %v1945_v0  ;;  %v5363_v38 = vpop.eup %3044  ;;  %v2078_v63 = vmul.f32 %v3043_v28, %v6748_v62  ;;  %v2079_v22 = vmul.f32 %v3043_v28, %v6749_v27  ;;  %v3479_v30 = vld [vmem:[%s3918_s29 + $0x220] sm:$0xff] }
 0x1d9   : > { %6747 = vst [vmem:[#allocation45_spill] sm:$0xff] %v5363_v38  ;;  %v2080_v13 = vmul.f32 %v3043_v28, %v6750_v46  ;;  %v2081_v57 = vmul.f32 %v3043_v28, %v4587_v1  ;;  %v5375_v56 = vpop.eup %3046  ;;  %3062 = vrcp.f32 %v5279_v52  ;;  %v1234_v31 = vsub.f32 %v3479_v30, %v5356_v26 }
 0x1da   : > { %6751 = vst [vmem:[#allocation16_spill] sm:$0xff] %v5375_v56  ;;  %v1235_v59 = vsub.f32 %v3480_v12, %v5356_v26  ;;  %v1947_v0 = vadd.f32 %v5363_v38, %v1946_v8  ;;  %v5384_v49 = vpop.eup %3048  ;;  %v2206_v1 = vsub.f32 %v2078_v63, %v1758_v53  ;;  %v2207_v28 = vsub.f32 %v2079_v22, %v1759_v6  ;;  %v3482_v22 = vld [vmem:[%s3918_s29 + $0x238] sm:$0xff]  ;;  %v6764_v8 = vld [vmem:[#allocation23_spill] sm:$0xff] }
 0x1db   : > { %6752 = vst [vmem:[#allocation55_spill] sm:$0xff] %v5384_v49  ;;  %v2208_v62 = vsub.f32 %v2080_v13, %v1760_v25  ;;  %v2209_v27 = vsub.f32 %v2081_v57, %v1761_v54  ;;  %v5386_v46 = vpop.eup %3050  ;;  %3064 = vrcp.f32 %v1899_v21  ;;  %v890_v52 = vmul.f32 1.442695, %v692_v60  ;;  %v3481_v54 = vld [vmem:[%s3918_s29 + $0x230] sm:$0xff]  ;;  %v5399_v21 = vpop.xlane.xlu0 %555  ;;  %v3490_v38 = vld [vmem:[%s3918_s29 + $0x258] sm:$0xff] }
 0x1dc   : > { %6753 = vst [vmem:[#allocation56_spill] sm:$0xff] %v5386_v46  ;;  %1948 = vadd.xlane.f32.xlu1 %v1947_v0  ;;  %v6754_v30 = vmax.f32 %v5029_v4, %v5036_v44  ;;  %v5395_v53 = vpop.eup %3052  ;;  %v2334_v6 = vmul.f32 %v2206_v1, %v2206_v1  ;;  %v892_v25 = vmul.f32 1.442695, %v693_v61  ;;  %v1236_v63 = vsub.f32 %v3481_v54, %v5356_v26 }
 0x1dd   : > { %6755 = vst [vmem:[#allocation57_spill] sm:$0xff] %v5395_v53  ;;  %v6756_v4 = vmax.f32 %v5295_v9, %v5298_v5  ;;  %v5406_v60 = vpop.eup %3054  ;;  %3066 = vpow2.f32 %v886_v37  ;;  %v1237_v13 = vsub.f32 %v3482_v22, %v5356_v26  ;;  %v1430_v57 = vmul.f32 1.442695, %v1234_v31  ;;  %v5414_v9 = vpop.xlane.xlu1 %1903  ;;  %v3483_v5 = vld [vmem:[%s3911_s3 + $0x240] sm:$0xff]  ;;  %v3484_v37 = vld [vmem:[%s3911_s3 + $0x248] sm:$0xff]  ;;  %v6759_v26 = vld [vmem:[#allocation91_spill] sm:$0xff] }
 0x1de   : > { %600 = vmax.xlane.f32.xlu0 %v6754_v30  ;;  %6757 = vst [vmem:[#allocation58_spill] sm:$0xff] %v5406_v60  ;;  %v1630_v61 = vadd.f32 %v5384_v49, %v5375_v56  ;;  %v5412_v0 = vpop.eup %3056  ;;  %v2335_v1 = vmul.f32 %v2207_v28, %v2207_v28  ;;  %v2461_v30 = vadd.f32 %v2460_v15, %v2334_v6  ;;  %3068 = vpow2.f32 %v888_v19 }
 0x1df   : > { %v5404_v44 = vmax.f32 %v6756_v4, %v452_v10  ;;  %6758 = vst [vmem:[#allocation24_spill] sm:$0xff] %v5412_v0  ;;  %v1432_v54 = vmul.f32 1.442695, %v1235_v59  ;;  %3070 = vpow2.f32 %v890_v52  ;;  %v694_v10 = vsub.f32 %v3483_v5, %v5399_v21 }
 0x1e0   : > { %v695_v4 = vsub.f32 %v3484_v37, %v5399_v21  ;;  %v6760_v31 = vmax.f32 %v5031_v51, %v6759_v26  ;;  %v1631_v22 = vadd.f32 %v5386_v46, %v1630_v61  ;;  %v2336_v19 = vmul.f32 %v2208_v62, %v2208_v62  ;;  %v3485_v61 = vld [vmem:[%s3911_s3 + $0x250] sm:$0xff]  ;;  %v3486_v62 = vld [vmem:[%s3911_s3 + $0x258] sm:$0xff] }
 0x1e1   : > { %v5424_v28 = vpop.eup %3058  ;;  %v2462_v15 = vadd.f32 %v2461_v30, %v2335_v1  ;;  %3072 = vpow2.f32 %v892_v25  ;;  %v1434_v59 = vmul.f32 1.442695, %v1236_v63  ;;  %v1436_v6 = vmul.f32 1.442695, %v1237_v13  ;;  %v6763_v30 = vld [vmem:[#allocation22_spill] sm:$0xff] }
 0x1e2   : > { %1144 = vmax.xlane.f32.xlu1 %v6760_v31  ;;  %6761 = vst [vmem:[#allocation15_spill] sm:$0xff] %v5424_v28  ;;  %v5426_v52 = vpop.eup %3060  ;;  %3074 = vpow2.f32 %v1430_v57  ;;  %v1632_v5 = vadd.f32 %v5395_v53, %v1631_v22  ;;  %v1950_v51 = vadd.f32 %v5412_v0, %v5406_v60  ;;  %v2337_v37 = vmul.f32 %v2209_v27, %v2209_v27  ;;  %v5450_v0 = vld [vmem:[%s3918_s29 + $0x3b8] sm:$0xff] }
 0x1e3   : > { %6762 = vst [vmem:[#allocation17_spill] sm:$0xff] %v5426_v52  ;;  %v2463_v26 = vadd.f32 %v2462_v15, %v2336_v19  ;;  %3076 = vpow2.f32 %v1432_v54  ;;  %v696_v31 = vsub.f32 %v3485_v61, %v5399_v21  ;;  %v3063_v12 = vpop.eup %3062  ;;  %v697_v25 = vsub.f32 %v3486_v62, %v5399_v21  ;;  %v5438_v54 = vpop.xlane.xlu1 %1099  ;;  %v6765_v21 = vld [vmem:[#allocation26_spill] sm:$0xff]  ;;  %v6769_v61 = vld [vmem:[#allocation29_spill] sm:$0xff] }
 0x1e4   : > { %v894_v63 = vmul.f32 1.442695, %v694_v10  ;;  %v896_v1 = vmul.f32 1.442695, %v695_v4  ;;  %1633 = vadd.xlane.f32.xlu0 %v1632_v5  ;;  %v1951_v13 = vadd.f32 %v5424_v28, %v1950_v51  ;;  %v1762_v22 = vmul.f32 %v3063_v12, %v6763_v30  ;;  %v5440_v19 = vpop.xlane.xlu0 %1588  ;;  %v6766_v4 = vld [vmem:[#allocation50_spill] sm:$0xff]  ;;  %v6770_v30 = vld [vmem:[#allocation32_spill] sm:$0xff] }
 0x1e5   : > { %v2464_v57 = vadd.f32 %v2463_v26, %v2337_v37  ;;  %v1763_v27 = vmul.f32 %v3063_v12, %v6764_v8  ;;  %3078 = vpow2.f32 %v1434_v59  ;;  %v3065_v15 = vpop.eup %3064  ;;  %v1764_v10 = vmul.f32 %v3063_v12, %v6765_v21  ;;  %v6767_v37 = vld [vmem:[#allocation48_spill] sm:$0xff]  ;;  %v6768_v8 = vld [vmem:[#allocation49_spill] sm:$0xff] }
 0x1e6   : > { %v1765_v5 = vmul.f32 %v3063_v12, %v6766_v4  ;;  %3080 = vpow2.f32 %v1436_v6  ;;  %v1952_v51 = vadd.f32 %v5426_v52, %v1951_v13  ;;  %v2082_v26 = vmul.f32 %v3065_v15, %v6767_v37  ;;  %v3487_v12 = vld [vmem:[%s3918_s29 + $0x240] sm:$0xff]  ;;  %v3488_v13 = vld [vmem:[%s3918_s29 + $0x248] sm:$0xff]  ;;  %v3489_v4 = vld [vmem:[%s3918_s29 + $0x250] sm:$0xff] }
 0x1e7   : > { %v2083_v59 = vmul.f32 %v3065_v15, %v6768_v8  ;;  %v2084_v62 = vmul.f32 %v3065_v15, %v6769_v61  ;;  %v2085_v28 = vmul.f32 %v3065_v15, %v6770_v30  ;;  %v5452_v60 = vpop.eup %3066  ;;  %3082 = vrcp.f32 %v5358_v11  ;;  %v6771_v8 = vld [vmem:[#allocation92_spill] sm:$0xff]  ;;  %v6772_v61 = vld [vmem:[#allocation93_spill] sm:$0xff]  ;;  %v327_v30 = vld [vmem:[%s3911_s3 + $0x3c8] sm:$0xff] }
 0x1e8   : > { %v1238_v6 = vsub.f32 %v3487_v12, %v5438_v54  ;;  %v1239_v21 = vsub.f32 %v3488_v13, %v5438_v54  ;;  %v1240_v37 = vsub.f32 %v3489_v4, %v5438_v54  ;;  %1953 = vadd.xlane.f32.xlu1 %v1952_v51  ;;  %v6773_v52 = vmax.f32 %v6771_v8, %v6772_v61  ;;  %v326_v15 = vld [vmem:[%s3911_s3 + $0x3c0] sm:$0xff]  ;;  %v5466_v53 = vpop.eup %3068 }
 0x1e9   : > { %v2210_v11 = vsub.f32 %v2082_v26, %v1762_v22  ;;  %v2211_v46 = vsub.f32 %v2083_v59, %v1763_v27  ;;  %v2212_v49 = vsub.f32 %v2084_v62, %v1764_v10  ;;  %v2213_v12 = vsub.f32 %v2085_v28, %v1765_v5  ;;  %v5468_v56 = vpop.eup %3070  ;;  %v5479_v28 = vpop.xlane.xlu1 %1908 }
 0x1ea   : > { %605 = vmax.xlane.f32.xlu0 %v6773_v52  ;;  %3084 = vrcp.f32 %v5414_v9  ;;  %v898_v13 = vmul.f32 1.442695, %v696_v31  ;;  %v1635_v51 = vadd.f32 %v5466_v53, %v5452_v60  ;;  %v900_v61 = vmul.f32 1.442695, %v697_v25  ;;  %v5481_v9 = vpop.xlane.xlu0 %560  ;;  %v3494_v52 = vld [vmem:[%s3911_s3 + $0x278] sm:$0xff] }
 0x1eb   : > { %v5475_v4 = vpop.eup %3072  ;;  %v2338_v8 = vmul.f32 %v2210_v11, %v2210_v11  ;;  %v1241_v22 = vsub.f32 %v3490_v38, %v5438_v54  ;;  %v612_v31 = vmax.f32 %v326_v15, %v327_v30  ;;  %3086 = vpow2.f32 %v894_v63  ;;  %v328_v15 = vld [vmem:[%s3911_s3 + $0x3d0] sm:$0xff]  ;;  %v5493_v30 = vld [vmem:[%s3918_s29 + $0x3c0] sm:$0xff]  ;;  %v5496_v11 = vld [vmem:[%s3918_s29 + $0x3c8] sm:$0xff] }
 0x1ec   : > { %6774 = vst [vmem:[#allocation19_spill] sm:$0xff] %v5475_v4  ;;  %v5483_v27 = vpop.eup %3074  ;;  %v1438_v10 = vmul.f32 1.442695, %v1238_v6  ;;  %v1440_v5 = vmul.f32 1.442695, %v1239_v21  ;;  %v6776_v25 = vmax.f32 %v5264_v50, %v5370_v29  ;;  %v1636_v38 = vadd.f32 %v5468_v56, %v1635_v51  ;;  %v3491_v63 = vld [vmem:[%s3911_s3 + $0x260] sm:$0xff] }
 0x1ed   : > { %6775 = vst [vmem:[#allocation13_spill] sm:$0xff] %v5483_v27  ;;  %v5489_v54 = vpop.eup %3076  ;;  %v2339_v26 = vmul.f32 %v2211_v46, %v2211_v46  ;;  %v2465_v59 = vadd.f32 %v2464_v57, %v2338_v8  ;;  %3088 = vpow2.f32 %v896_v1  ;;  %v1442_v62 = vmul.f32 1.442695, %v1240_v37  ;;  %v3492_v21 = vld [vmem:[%s3911_s3 + $0x268] sm:$0xff] }
 0x1ee   : > { %1149 = vmax.xlane.f32.xlu1 %v6776_v25  ;;  %6777 = vst [vmem:[#allocation14_spill] sm:$0xff] %v5489_v54  ;;  %3090 = vpow2.f32 %v898_v13  ;;  %v698_v6 = vsub.f32 %v3491_v63, %v5481_v9  ;;  %v699_v50 = vsub.f32 %v3492_v21, %v5481_v9  ;;  %v1637_v29 = vadd.f32 %v5475_v4, %v1636_v38 }
 0x1ef   : > { %v5503_v51 = vpop.eup %3078  ;;  %v2340_v46 = vmul.f32 %v2212_v49, %v2212_v49  ;;  %v2466_v1 = vadd.f32 %v2465_v59, %v2339_v26  ;;  %3092 = vpow2.f32 %v900_v61  ;;  %v1955_v57 = vadd.f32 %v5489_v54, %v5483_v27  ;;  %v5513_v49 = vpop.xlane.xlu1 %1104  ;;  %v3493_v59 = vld [vmem:[%s3911_s3 + $0x270] sm:$0xff] }
 0x1f0   : > { %6778 = vst [vmem:[#allocation18_spill] sm:$0xff] %v5503_v51  ;;  %v5507_v37 = vpop.eup %3080  ;;  %3094 = vpow2.f32 %v1438_v10  ;;  %v1444_v13 = vmul.f32 1.442695, %v1241_v22  ;;  %1638 = vadd.xlane.f32.xlu0 %v1637_v29  ;;  %v5509_v8 = vmax.f32 %v612_v31, %v328_v15  ;;  %v1156_v25 = vmax.f32 %v5493_v30, %v5496_v11  ;;  %v6780_v29 = vld [vmem:[#allocation39_spill] sm:$0xff] }
 0x1f1   : > { %6779 = vst [vmem:[#allocation20_spill] sm:$0xff] %v5507_v37  ;;  %v2341_v38 = vmul.f32 %v2213_v12, %v2213_v12  ;;  %v2467_v63 = vadd.f32 %v2466_v1, %v2340_v46  ;;  %3096 = vpow2.f32 %v1440_v5  ;;  %v1956_v61 = vadd.f32 %v5503_v51, %v1955_v57  ;;  %v3083_v26 = vpop.eup %3082  ;;  %v6781_v12 = vld [vmem:[#allocation27_spill] sm:$0xff]  ;;  %v5522_v5 = vpop.xlane.xlu0 %1593  ;;  %v6782_v1 = vld [vmem:[#allocation28_spill] sm:$0xff] }
 0x1f2   : > { %v700_v21 = vsub.f32 %v3493_v59, %v5481_v9  ;;  %v701_v22 = vsub.f32 %v3494_v52, %v5481_v9  ;;  %v902_v10 = vmul.f32 1.442695, %v698_v6  ;;  %v904_v31 = vmul.f32 1.442695, %v699_v50  ;;  %v6783_v59 = vld [vmem:[#allocation34_spill] sm:$0xff]  ;;  %v6785_v6 = vld [vmem:[#allocation33_spill] sm:$0xff] }
 0x1f3   : > { %v2468_v15 = vadd.f32 %v2467_v63, %v2341_v38  ;;  %v1766_v30 = vmul.f32 %v3083_v26, %v6780_v29  ;;  %v1767_v11 = vmul.f32 %v3083_v26, %v6781_v12  ;;  %3098 = vpow2.f32 %v1442_v62  ;;  %v6786_v62 = vld [vmem:[#allocation30_spill] sm:$0xff]  ;;  %v6787_v63 = vld [vmem:[#allocation31_spill] sm:$0xff]  ;;  %v6788_v12 = vld [vmem:[#allocation37_spill] sm:$0xff] }
 0x1f4   : > { %v3085_v46 = vpop.eup %3084  ;;  %v1768_v57 = vmul.f32 %v3083_v26, %v6782_v1  ;;  %v1769_v51 = vmul.f32 %v3083_v26, %v6783_v59  ;;  %3100 = vpow2.f32 %v1444_v13  ;;  %v1957_v52 = vadd.f32 %v5507_v37, %v1956_v61  ;;  %v5535_v1 = vld [vmem:[%s3911_s3 + $0x3d8] sm:$0xff]  ;;  %v3495_v13 = vld [vmem:[%s3918_s29 + $0x260] sm:$0xff]  ;;  %v3497_v26 = vld [vmem:[%s3918_s29 + $0x270] sm:$0xff]  ;;  %v5549_v37 = vpop.xlane.xlu1 %1913 }
 0x1f5   : > { %v6784_v9 = vmax.f32 %v5269_v17, %v5373_v32  ;;  %v2086_v50 = vmul.f32 %v3085_v46, %v6785_v6  ;;  %v2087_v38 = vmul.f32 %v3085_v46, %v6786_v62  ;;  %v2088_v29 = vmul.f32 %v3085_v46, %v6787_v63  ;;  %v5537_v27 = vpop.eup %3086  ;;  %v3496_v17 = vld [vmem:[%s3918_s29 + $0x268] sm:$0xff] }
 0x1f6   : > { %v2089_v54 = vmul.f32 %v3085_v46, %v6788_v12  ;;  %3102 = vrcp.f32 %v5440_v19  ;;  %v1242_v61 = vsub.f32 %v3495_v13, %v5513_v49  ;;  %v1243_v32 = vsub.f32 %v3496_v17, %v5513_v49  ;;  %1958 = vadd.xlane.f32.xlu1 %v1957_v52 }
 0x1f7   : > { %610 = vmax.xlane.f32.xlu0 %v6784_v9  ;;  %v1244_v59 = vsub.f32 %v3497_v26, %v5513_v49  ;;  %v456_v9 = vld [vmem:[%s3918_s29 + $0x3d0] sm:$0xff]  ;;  %v5547_v6 = vpop.eup %3088  ;;  %v2214_v46 = vsub.f32 %v2086_v50, %v1766_v30  ;;  %v2215_v62 = vsub.f32 %v2087_v38, %v1767_v11  ;;  %v2216_v63 = vsub.f32 %v2088_v29, %v1768_v57  ;;  %v3498_v11 = vld [vmem:[%s3918_s29 + $0x278] sm:$0xff] }
 0x1f8   : > { %v2217_v12 = vsub.f32 %v2089_v54, %v1769_v51  ;;  %v5551_v19 = vpop.eup %3090  ;;  %3104 = vrcp.f32 %v5479_v28  ;;  %v906_v13 = vmul.f32 1.442695, %v700_v21  ;;  %v1640_v17 = vadd.f32 %v5547_v6, %v5537_v27  ;;  %v5562_v51 = vpop.xlane.xlu0 %565 }
 0x1f9   : > { %6789 = vst [vmem:[#allocation21_spill] sm:$0xff] %v5551_v19  ;;  %v614_v52 = vmax.f32 %v5509_v8, %v5535_v1  ;;  %v5558_v26 = vpop.eup %3092  ;;  %v2342_v4 = vmul.f32 %v2214_v46, %v2214_v46  ;;  %v908_v30 = vmul.f32 1.442695, %v701_v22  ;;  %v1245_v54 = vsub.f32 %v3498_v11, %v5513_v49 }
 0x1fa   : > { %6790 = vst [vmem:[#allocation47_spill] sm:$0xff] %v5558_v26  ;;  %v5564_v57 = vmax.f32 %v1156_v25, %v456_v9  ;;  %v5566_v28 = vpop.eup %3094  ;;  %3106 = vpow2.f32 %v902_v10  ;;  %v1446_v21 = vmul.f32 1.442695, %v1242_v61  ;;  %v1448_v50 = vmul.f32 1.442695, %v1243_v32  ;;  %v3499_v25 = vld [vmem:[%s3911_s3 + $0x280] sm:$0xff] }
 0x1fb   : > { %6791 = vst [vmem:[#allocation46_spill] sm:$0xff] %v5566_v28  ;;  %v6792_v8 = vmax.f32 %v5404_v44, %v5450_v0  ;;  %v1641_v38 = vadd.f32 %v5551_v19, %v1640_v17  ;;  %v5572_v22 = vpop.eup %3096  ;;  %v2343_v29 = vmul.f32 %v2215_v62, %v2215_v62  ;;  %v2469_v1 = vadd.f32 %v2468_v15, %v2342_v4  ;;  %v3501_v62 = vld [vmem:[%s3911_s3 + $0x290] sm:$0xff]  ;;  %v457_v17 = vld [vmem:[%s3918_s29 + $0x3d8] sm:$0xff] }
 0x1fc   : > { %6793 = vst [vmem:[#allocation25_spill] sm:$0xff] %v5572_v22  ;;  %3108 = vpow2.f32 %v904_v31  ;;  %v1450_v49 = vmul.f32 1.442695, %v1244_v59  ;;  %v702_v10 = vsub.f32 %v3499_v25, %v5562_v51  ;;  %v1960_v44 = vadd.f32 %v5572_v22, %v5566_v28  ;;  %v5581_v31 = vpop.xlane.xlu1 %1109  ;;  %v3500_v59 = vld [vmem:[%s3911_s3 + $0x288] sm:$0xff]  ;;  %v6796_v22 = vld [vmem:[#allocation43_spill] sm:$0xff] }
 0x1fd   : > { %1154 = vmax.xlane.f32.xlu1 %v6792_v8  ;;  %3110 = vpow2.f32 %v906_v13  ;;  %v1642_v61 = vadd.f32 %v5558_v26, %v1641_v38  ;;  %v5579_v0 = vpop.eup %3098  ;;  %v2344_v32 = vmul.f32 %v2216_v63, %v2216_v63  ;;  %v2470_v9 = vadd.f32 %v2469_v1, %v2343_v29  ;;  %v3504_v25 = vld [vmem:[%s3918_s29 + $0x288] sm:$0xff] }
 0x1fe   : > { %6794 = vst [vmem:[#allocation91_spill] sm:$0xff] %v5579_v0  ;;  %3112 = vpow2.f32 %v908_v30  ;;  %v1452_v4 = vmul.f32 1.442695, %v1245_v54  ;;  %v5583_v15 = vpop.eup %3100  ;;  %v703_v46 = vsub.f32 %v3500_v59, %v5562_v51  ;;  %v704_v13 = vsub.f32 %v3501_v62, %v5562_v51  ;;  %v3502_v54 = vld [vmem:[%s3911_s3 + $0x298] sm:$0xff]  ;;  %v331_v28 = vld [vmem:[%s3911_s3 + $0x3e8] sm:$0xff] }
 0x1ff   : > { %6795 = vst [vmem:[#allocation22_spill] sm:$0xff] %v5583_v15  ;;  %3114 = vpow2.f32 %v1446_v21  ;;  %1643 = vadd.xlane.f32.xlu0 %v1642_v61  ;;  %v1961_v63 = vadd.f32 %v5579_v0, %v1960_v44  ;;  %v2345_v11 = vmul.f32 %v2217_v12, %v2217_v12  ;;  %v2471_v30 = vadd.f32 %v2470_v9, %v2344_v32  ;;  %v3503_v21 = vld [vmem:[%s3918_s29 + $0x280] sm:$0xff]  ;;  %v5599_v12 = vpop.xlane.xlu0 %1598  ;;  %v6798_v9 = vld [vmem:[#allocation42_spill] sm:$0xff] }
 0x200   : > { %3116 = vpow2.f32 %v1448_v50  ;;  %v705_v8 = vsub.f32 %v3502_v54, %v5562_v51  ;;  %v3103_v38 = vpop.eup %3102  ;;  %v910_v29 = vmul.f32 1.442695, %v702_v10  ;;  %v1246_v1 = vsub.f32 %v3503_v21, %v5581_v31  ;;  %v6797_v10 = vld [vmem:[#allocation38_spill] sm:$0xff]  ;;  %v6799_v21 = vld [vmem:[#allocation44_spill] sm:$0xff]  ;;  %v6803_v0 = vld [vmem:[#allocation41_spill] sm:$0xff] }
 0x201   : > { %v1247_v59 = vsub.f32 %v3504_v25, %v5581_v31  ;;  %v1962_v62 = vadd.f32 %v5583_v15, %v1961_v63  ;;  %v2472_v61 = vadd.f32 %v2471_v30, %v2345_v11  ;;  %v1770_v44 = vmul.f32 %v3103_v38, %v6796_v22  ;;  %v6800_v63 = vld [vmem:[#allocation40_spill] sm:$0xff]  ;;  %v6801_v11 = vld [vmem:[#allocation35_spill] sm:$0xff] }
 0x202   : > { %3118 = vpow2.f32 %v1450_v49  ;;  %v1158_v51 = vmax.f32 %v5564_v57, %v457_v17  ;;  %v3105_v50 = vpop.eup %3104  ;;  %v1771_v32 = vmul.f32 %v3103_v38, %v6797_v10  ;;  %v1772_v54 = vmul.f32 %v3103_v38, %v6798_v9  ;;  %v6802_v30 = vld [vmem:[#allocation36_spill] sm:$0xff]  ;;  %v330_v17 = vld [vmem:[%s3911_s3 + $0x3e0] sm:$0xff] }
 0x203   : > { %v1773_v25 = vmul.f32 %v3103_v38, %v6799_v21  ;;  %3120 = vpow2.f32 %v1452_v4  ;;  %1963 = vadd.xlane.f32.xlu1 %v1962_v62  ;;  %615 = vmax.xlane.f32.xlu0 %v614_v52  ;;  %v2090_v22 = vmul.f32 %v3105_v50, %v6800_v63  ;;  %v2091_v49 = vmul.f32 %v3105_v50, %v6801_v11  ;;  %v3505_v38 = vld [vmem:[%s3918_s29 + $0x290] sm:$0xff]  ;;  %v3506_v52 = vld [vmem:[%s3918_s29 + $0x298] sm:$0xff] }
 0x204   : > { %v2092_v15 = vmul.f32 %v3105_v50, %v6802_v30  ;;  %v2093_v57 = vmul.f32 %v3105_v50, %v6803_v0  ;;  %v5611_v10 = vpop.eup %3106  ;;  %3122 = vrcp.f32 %v5522_v5  ;;  %v912_v9 = vmul.f32 1.442695, %v703_v46  ;;  %v332_v0 = vld [vmem:[%s3911_s3 + $0x3f0] sm:$0xff] }
 0x205   : > { %v1248_v4 = vsub.f32 %v3505_v38, %v5581_v31  ;;  %v1249_v62 = vsub.f32 %v3506_v52, %v5581_v31  ;;  %v2218_v63 = vsub.f32 %v2090_v22, %v1770_v44  ;;  %v2219_v11 = vsub.f32 %v2091_v49, %v1771_v32  ;;  %v5628_v32 = vpop.xlane.xlu0 %570  ;;  %v3507_v49 = vld [vmem:[%s3911_s3 + $0x2a0] sm:$0xff] }
 0x206   : > { %v5618_v21 = vpop.eup %3108  ;;  %v2220_v30 = vsub.f32 %v2092_v15, %v1772_v54  ;;  %v2221_v26 = vsub.f32 %v2093_v57, %v1773_v25  ;;  %3124 = vrcp.f32 %v5549_v37  ;;  %v914_v19 = vmul.f32 1.442695, %v704_v13 }
 0x207   : > { %v5621_v50 = vpop.eup %3110  ;;  %1159 = vmax.xlane.f32.xlu1 %v1158_v51  ;;  %v1645_v5 = vadd.f32 %v5618_v21, %v5611_v10  ;;  %v617_v46 = vmax.f32 %v330_v17, %v331_v28  ;;  %v2346_v31 = vmul.f32 %v2218_v63, %v2218_v63  ;;  %v916_v52 = vmul.f32 1.442695, %v705_v8  ;;  %v459_v63 = vld [vmem:[%s3918_s29 + $0x3e8] sm:$0xff] }
 0x208   : > { %6804 = vst [vmem:[#allocation23_spill] sm:$0xff] %v5621_v50  ;;  %v5626_v38 = vpop.eup %3112  ;;  %v1454_v44 = vmul.f32 1.442695, %v1246_v1  ;;  %v1456_v15 = vmul.f32 1.442695, %v1247_v59  ;;  %3126 = vpow2.f32 %v910_v29  ;;  %v2347_v25 = vmul.f32 %v2219_v11, %v2219_v11  ;;  %v5635_v1 = vpop.xlane.xlu1 %1918  ;;  %v333_v59 = vld [vmem:[%s3911_s3 + $0x3f8] sm:$0xff] }
 0x209   : > { %6805 = vst [vmem:[#allocation26_spill] sm:$0xff] %v5626_v38  ;;  %v5630_v54 = vpop.eup %3114  ;;  %v1458_v37 = vmul.f32 1.442695, %v1248_v4  ;;  %v1646_v13 = vadd.f32 %v5621_v50, %v1645_v5  ;;  %v618_v51 = vmax.f32 %v617_v46, %v332_v0  ;;  %v2473_v22 = vadd.f32 %v2472_v61, %v2346_v31  ;;  %v458_v4 = vld [vmem:[%s3918_s29 + $0x3e0] sm:$0xff]  ;;  %v3509_v5 = vld [vmem:[%s3911_s3 + $0x2b0] sm:$0xff]  ;;  %v6811_v50 = vld [vmem:[#allocation60_spill] sm:$0xff] }
 0x20a   : > { %6806 = vst [vmem:[#allocation50_spill] sm:$0xff] %v5630_v54  ;;  %v5633_v28 = vpop.eup %3116  ;;  %3128 = vpow2.f32 %v912_v9  ;;  %v1460_v8 = vmul.f32 1.442695, %v1249_v62  ;;  %v706_v29 = vsub.f32 %v3507_v49, %v5628_v32  ;;  %v2348_v61 = vmul.f32 %v2220_v30, %v2220_v30  ;;  %v3508_v62 = vld [vmem:[%s3911_s3 + $0x2a8] sm:$0xff]  ;;  %v460_v30 = vld [vmem:[%s3918_s29 + $0x3f0] sm:$0xff] }
 0x20b   : > { %6807 = vst [vmem:[#allocation48_spill] sm:$0xff] %v5633_v28  ;;  %3130 = vpow2.f32 %v914_v19  ;;  %v1647_v57 = vadd.f32 %v5626_v38, %v1646_v13  ;;  %v1965_v17 = vadd.f32 %v5633_v28, %v5630_v54  ;;  %v2474_v9 = vadd.f32 %v2473_v22, %v2347_v25  ;;  %v3510_v22 = vld [vmem:[%s3911_s3 + $0x2b8] sm:$0xff] }
 0x20c   : > { %v5645_v11 = vpop.eup %3118  ;;  %3132 = vpow2.f32 %v916_v52  ;;  %v707_v19 = vsub.f32 %v3508_v62, %v5628_v32  ;;  %v708_v46 = vsub.f32 %v3509_v5, %v5628_v32  ;;  %v619_v13 = vmax.f32 %v618_v51, %v333_v59  ;;  %v6810_v5 = vld [vmem:[#allocation59_spill] sm:$0xff]  ;;  %v461_v59 = vld [vmem:[%s3918_s29 + $0x3f8] sm:$0xff] }
 0x20d   : > { %6808 = vst [vmem:[#allocation49_spill] sm:$0xff] %v5645_v11  ;;  %v5649_v0 = vpop.eup %3120  ;;  %3134 = vpow2.f32 %v1454_v44  ;;  %1648 = vadd.xlane.f32.xlu0 %v1647_v57  ;;  %v1966_v31 = vadd.f32 %v5645_v11, %v1965_v17  ;;  %v2349_v49 = vmul.f32 %v2221_v26, %v2221_v26  ;;  %v2475_v28 = vadd.f32 %v2474_v9, %v2348_v61  ;;  %v1115_v26 = vpop.xlane.xlu1 %1114  ;;  %v6812_v61 = vld [vmem:[#allocation61_spill] sm:$0xff] }
 0x20e   : > { %6809 = vst [vmem:[#allocation29_spill] sm:$0xff] %v5649_v0  ;;  %3136 = vpow2.f32 %v1456_v15  ;;  %v1161_v52 = vmax.f32 %v458_v4, %v459_v63  ;;  %v3123_v25 = vpop.eup %3122  ;;  %v709_v62 = vsub.f32 %v3510_v22, %v5628_v32  ;;  %v918_v54 = vmul.f32 1.442695, %v706_v29  ;;  %v5663_v32 = vpop.xlane.xlu0 %1603  ;;  %v6814_v29 = vld [vmem:[#allocation63_spill] sm:$0xff]  ;;  %v6817_v22 = vld [vmem:[#allocation66_spill] sm:$0xff] }
 0x20f   : > { %3138 = vpow2.f32 %v1458_v37  ;;  %v1967_v44 = vadd.f32 %v5649_v0, %v1966_v31  ;;  %v2476_v38 = vadd.f32 %v2475_v28, %v2349_v49  ;;  %v1774_v57 = vmul.f32 %v3123_v25, %v6810_v5  ;;  %v6813_v37 = vld [vmem:[#allocation62_spill] sm:$0xff]  ;;  %v6815_v31 = vld [vmem:[#allocation64_spill] sm:$0xff] }
 0x210   : > { %v1775_v17 = vmul.f32 %v3123_v25, %v6811_v50  ;;  %v920_v51 = vmul.f32 1.442695, %v707_v19  ;;  %v3125_v15 = vpop.eup %3124  ;;  %v1776_v4 = vmul.f32 %v3123_v25, %v6812_v61  ;;  %v1777_v63 = vmul.f32 %v3123_v25, %v6813_v37  ;;  %v6816_v19 = vld [vmem:[#allocation65_spill] sm:$0xff]  ;;  %v3512_v61 = vld [vmem:[%s3918_s29 + $0x2a8] sm:$0xff] }
 0x211   : > { %3140 = vpow2.f32 %v1460_v8  ;;  %1968 = vadd.xlane.f32.xlu1 %v1967_v44  ;;  %620 = vmax.xlane.f32.xlu0 %v619_v13  ;;  %v1162_v28 = vmax.f32 %v1161_v52, %v460_v30  ;;  %v2094_v9 = vmul.f32 %v3125_v15, %v6814_v29  ;;  %v2095_v50 = vmul.f32 %v3125_v15, %v6815_v31  ;;  %v3511_v25 = vld [vmem:[%s3918_s29 + $0x2a0] sm:$0xff] }
 0x212   : > { %v2096_v49 = vmul.f32 %v3125_v15, %v6816_v19  ;;  %v2097_v5 = vmul.f32 %v3125_v15, %v6817_v22  ;;  %v5669_v0 = vpop.eup %3126  ;;  %3142 = vrcp.f32 %v5599_v12  ;;  %v1250_v8 = vsub.f32 %v3511_v25, %v1115_v26  ;;  %v3513_v22 = vld [vmem:[%s3918_s29 + $0x2b0] sm:$0xff] }
 0x213   : > { %6818 = vst [vmem:[#allocation32_spill] sm:$0xff] %v5669_v0  ;;  %v1251_v37 = vsub.f32 %v3512_v61, %v1115_v26  ;;  %v1163_v44 = vmax.f32 %v1162_v28, %v461_v59  ;;  %v2222_v30 = vsub.f32 %v2094_v9, %v1774_v57  ;;  %v2223_v52 = vsub.f32 %v2095_v50, %v1775_v17  ;;  %v3514_v17 = vld [vmem:[%s3918_s29 + $0x2b8] sm:$0xff]  ;;  %v5687_v9 = vpop.xlane.xlu0 %575  ;;  %v1924_v61 = vpop.xlane.xlu1 %1923 }
 0x214   : > { %v5674_v13 = vpop.eup %3128  ;;  %v2224_v29 = vsub.f32 %v2096_v49, %v1776_v4  ;;  %v2225_v31 = vsub.f32 %v2097_v5, %v1777_v63  ;;  %3144 = vrcp.f32 %v5635_v1  ;;  %v922_v15 = vmul.f32 1.442695, %v708_v46 }
 0x215   : > { %6819 = vst [vmem:[#allocation92_spill] sm:$0xff] %v5674_v13  ;;  %v5676_v19 = vpop.eup %3130  ;;  %v1252_v11 = vsub.f32 %v3513_v22, %v1115_v26  ;;  %1164 = vmax.xlane.f32.xlu1 %v1163_v44  ;;  %v1650_v12 = vadd.f32 %v5674_v13, %v5669_v0  ;;  %v2350_v59 = vmul.f32 %v2222_v30, %v2222_v30  ;;  %v924_v28 = vmul.f32 1.442695, %v709_v62  ;;  %v3515_v22 = vld [vmem:[%s3911_s3 + $0x2c0] sm:$0xff] }
 0x216   : > { %6820 = vst [vmem:[#allocation93_spill] sm:$0xff] %v5676_v19  ;;  %v5682_v25 = vpop.eup %3132  ;;  %3146 = vpow2.f32 %v918_v54  ;;  %v1253_v4 = vsub.f32 %v3514_v17, %v1115_v26  ;;  %v1462_v63 = vmul.f32 1.442695, %v1250_v8  ;;  %v2351_v50 = vmul.f32 %v2223_v52, %v2223_v52 }
 0x217   : > { %6821 = vst [vmem:[#allocation39_spill] sm:$0xff] %v5682_v25  ;;  %v5684_v57 = vpop.eup %3134  ;;  %v1651_v1 = vadd.f32 %v5676_v19, %v1650_v12  ;;  %v2477_v49 = vadd.f32 %v2476_v38, %v2350_v59  ;;  %3148 = vpow2.f32 %v920_v51  ;;  %v1464_v5 = vmul.f32 1.442695, %v1251_v37 }
 0x218   : > { %v5690_v46 = vpop.eup %3136  ;;  %3150 = vpow2.f32 %v922_v15  ;;  %v1466_v62 = vmul.f32 1.442695, %v1252_v11  ;;  %v2352_v8 = vmul.f32 %v2224_v29, %v2224_v29  ;;  %v710_v38 = vsub.f32 %v3515_v22, %v5687_v9  ;;  %v3516_v29 = vld [vmem:[%s3911_s3 + $0x2c8] sm:$0xff] }
 0x219   : > { %6822 = vst [vmem:[#allocation27_spill] sm:$0xff] %v5690_v46  ;;  %v5692_v44 = vpop.eup %3138  ;;  %v1652_v54 = vadd.f32 %v5682_v25, %v1651_v1  ;;  %v1970_v26 = vadd.f32 %v5690_v46, %v5684_v57  ;;  %v2478_v30 = vadd.f32 %v2477_v49, %v2351_v50  ;;  %3152 = vpow2.f32 %v924_v28  ;;  %v3517_v28 = vld [vmem:[%s3911_s3 + $0x2d0] sm:$0xff] }
 0x21a   : > { %6823 = vst [vmem:[#allocation28_spill] sm:$0xff] %v5692_v44  ;;  %3154 = vpow2.f32 %v1462_v63  ;;  %v1468_v37 = vmul.f32 1.442695, %v1253_v4  ;;  %v2353_v52 = vmul.f32 %v2225_v31, %v2225_v31  ;;  %v711_v59 = vsub.f32 %v3516_v29, %v5687_v9  ;;  %v6825_v63 = vld [vmem:[#allocation67_spill] sm:$0xff]  ;;  %v3518_v4 = vld [vmem:[%s3911_s3 + $0x2d8] sm:$0xff]  ;;  %v1120_v31 = vpop.xlane.xlu1 %1119  ;;  %v6828_v29 = vld [vmem:[#allocation70_spill] sm:$0xff] }
 0x21b   : > { %v5699_v51 = vpop.eup %3140  ;;  %1653 = vadd.xlane.f32.xlu0 %v1652_v54  ;;  %v1971_v11 = vadd.f32 %v5692_v44, %v1970_v26  ;;  %v2479_v15 = vadd.f32 %v2478_v30, %v2352_v8  ;;  %3156 = vpow2.f32 %v1464_v5  ;;  %v712_v17 = vsub.f32 %v3517_v28, %v5687_v9  ;;  %v6826_v8 = vld [vmem:[#allocation68_spill] sm:$0xff]  ;;  %v6827_v30 = vld [vmem:[#allocation69_spill] sm:$0xff]  ;;  %v5713_v28 = vpop.xlane.xlu0 %1608 }
 0x21c   : > { %6824 = vst [vmem:[#allocation34_spill] sm:$0xff] %v5699_v51  ;;  %v3143_v12 = vpop.eup %3142  ;;  %3158 = vpow2.f32 %v1466_v62  ;;  %v713_v54 = vsub.f32 %v3518_v4, %v5687_v9  ;;  %v926_v26 = vmul.f32 1.442695, %v710_v38  ;;  %v6831_v9 = vld [vmem:[#allocation73_spill] sm:$0xff]  ;;  %v6832_v4 = vld [vmem:[#allocation74_spill] sm:$0xff] }
 0x21d   : > { %v1972_v1 = vadd.f32 %v5699_v51, %v1971_v11  ;;  %v2480_v50 = vadd.f32 %v2479_v15, %v2353_v52  ;;  %v1778_v49 = vmul.f32 %v3143_v12, %v6825_v63  ;;  %v1779_v62 = vmul.f32 %v3143_v12, %v6826_v8  ;;  %v6829_v11 = vld [vmem:[#allocation71_spill] sm:$0xff]  ;;  %v6830_v15 = vld [vmem:[#allocation72_spill] sm:$0xff] }
 0x21e   : > { %v3145_v5 = vpop.eup %3144  ;;  %v1780_v22 = vmul.f32 %v3143_v12, %v6827_v30  ;;  %v1781_v25 = vmul.f32 %v3143_v12, %v6828_v29  ;;  %3160 = vpow2.f32 %v1468_v37  ;;  %v928_v8 = vmul.f32 1.442695, %v711_v59  ;;  %v3519_v30 = vld [vmem:[%s3918_s29 + $0x2c0] sm:$0xff]  ;;  %v3520_v37 = vld [vmem:[%s3918_s29 + $0x2c8] sm:$0xff] }
 0x21f   : > { %1973 = vadd.xlane.f32.xlu1 %v1972_v1  ;;  %v2098_v52 = vmul.f32 %v3145_v5, %v6829_v11  ;;  %v2099_v63 = vmul.f32 %v3145_v5, %v6830_v15  ;;  %v2100_v38 = vmul.f32 %v3145_v5, %v6831_v9  ;;  %v2101_v51 = vmul.f32 %v3145_v5, %v6832_v4  ;;  %v3521_v4 = vld [vmem:[%s3918_s29 + $0x2d0] sm:$0xff] }
 0x220   : > { %v5719_v19 = vpop.eup %3146  ;;  %3162 = vrcp.f32 %v5663_v32  ;;  %v1254_v12 = vsub.f32 %v3519_v30, %v1120_v31  ;;  %v1255_v29 = vsub.f32 %v3520_v37, %v1120_v31  ;;  %v930_v5 = vmul.f32 1.442695, %v712_v17 }
 0x221   : > { %6833 = vst [vmem:[#allocation33_spill] sm:$0xff] %v5719_v19  ;;  %v5724_v44 = vpop.eup %3148  ;;  %v2226_v1 = vsub.f32 %v2098_v52, %v1778_v49  ;;  %v2227_v11 = vsub.f32 %v2099_v63, %v1779_v62  ;;  %v2228_v15 = vsub.f32 %v2100_v38, %v1780_v22  ;;  %v2229_v13 = vsub.f32 %v2101_v51, %v1781_v25  ;;  %v3522_v49 = vld [vmem:[%s3918_s29 + $0x2d8] sm:$0xff]  ;;  %v5736_v25 = vpop.xlane.xlu0 %580 }
 0x222   : > { %6834 = vst [vmem:[#allocation30_spill] sm:$0xff] %v5724_v44  ;;  %v5726_v9 = vpop.eup %3150  ;;  %3164 = vrcp.f32 %v1924_v61  ;;  %v1256_v46 = vsub.f32 %v3521_v4, %v1120_v31  ;;  %v1655_v32 = vadd.f32 %v5724_v44, %v5719_v19  ;;  %v932_v37 = vmul.f32 1.442695, %v713_v54  ;;  %v1929_v38 = vpop.xlane.xlu1 %1928  ;;  %v3528_v44 = vld [vmem:[%s3918_s29 + $0x2e8] sm:$0xff] }
 0x223   : > { %6835 = vst [vmem:[#allocation31_spill] sm:$0xff] %v5726_v9  ;;  %v5731_v59 = vpop.eup %3152  ;;  %v2354_v30 = vmul.f32 %v2226_v1, %v2226_v1  ;;  %3166 = vpow2.f32 %v926_v26  ;;  %v1257_v62 = vsub.f32 %v3522_v49, %v1120_v31  ;;  %v1470_v22 = vmul.f32 1.442695, %v1254_v12 }
 0x224   : > { %6836 = vst [vmem:[#allocation37_spill] sm:$0xff] %v5731_v59  ;;  %v5733_v0 = vpop.eup %3154  ;;  %v1656_v61 = vadd.f32 %v5726_v9, %v1655_v32  ;;  %v2355_v17 = vmul.f32 %v2227_v11, %v2227_v11  ;;  %3168 = vpow2.f32 %v928_v8  ;;  %v1472_v63 = vmul.f32 1.442695, %v1255_v29  ;;  %v3523_v32 = vld [vmem:[%s3911_s3 + $0x2e0] sm:$0xff] }
 0x225   : > { %v5739_v51 = vpop.eup %3156  ;;  %v2481_v52 = vadd.f32 %v2480_v50, %v2354_v30  ;;  %3170 = vpow2.f32 %v930_v5  ;;  %v1474_v54 = vmul.f32 1.442695, %v1256_v46  ;;  %v2356_v12 = vmul.f32 %v2228_v15, %v2228_v15  ;;  %v3524_v15 = vld [vmem:[%s3911_s3 + $0x2e8] sm:$0xff] }
 0x226   : > { %6837 = vst [vmem:[#allocation43_spill] sm:$0xff] %v5739_v51  ;;  %v5741_v1 = vpop.eup %3158  ;;  %v1657_v26 = vadd.f32 %v5731_v59, %v1656_v61  ;;  %v1975_v31 = vadd.f32 %v5739_v51, %v5733_v0  ;;  %3172 = vpow2.f32 %v932_v37  ;;  %v714_v50 = vsub.f32 %v3523_v32, %v5736_v25  ;;  %v3525_v37 = vld [vmem:[%s3911_s3 + $0x2f0] sm:$0xff]  ;;  %v6843_v59 = vld [vmem:[#allocation78_spill] sm:$0xff] }
 0x227   : > { %6838 = vst [vmem:[#allocation38_spill] sm:$0xff] %v5741_v1  ;;  %v2482_v4 = vadd.f32 %v2481_v52, %v2355_v17  ;;  %3174 = vpow2.f32 %v1470_v22  ;;  %v1476_v29 = vmul.f32 1.442695, %v1257_v62  ;;  %v2357_v11 = vmul.f32 %v2229_v13, %v2229_v13  ;;  %v6840_v22 = vld [vmem:[#allocation75_spill] sm:$0xff]  ;;  %v3526_v62 = vld [vmem:[%s3911_s3 + $0x2f8] sm:$0xff] }
 0x228   : > { %v5748_v8 = vpop.eup %3160  ;;  %1658 = vadd.xlane.f32.xlu0 %v1657_v26  ;;  %v1976_v46 = vadd.f32 %v5741_v1, %v1975_v31  ;;  %3176 = vpow2.f32 %v1472_v63  ;;  %v715_v49 = vsub.f32 %v3524_v15, %v5736_v25  ;;  %v716_v61 = vsub.f32 %v3525_v37, %v5736_v25  ;;  %v1125_v31 = vpop.xlane.xlu1 %1124  ;;  %v3527_v1 = vld [vmem:[%s3918_s29 + $0x2e0] sm:$0xff] }
 0x229   : > { %6839 = vst [vmem:[#allocation42_spill] sm:$0xff] %v5748_v8  ;;  %v2483_v5 = vadd.f32 %v2482_v4, %v2356_v12  ;;  %3178 = vpow2.f32 %v1474_v54  ;;  %v717_v26 = vsub.f32 %v3526_v62, %v5736_v25  ;;  %v934_v13 = vmul.f32 1.442695, %v714_v50  ;;  %v6841_v54 = vld [vmem:[#allocation76_spill] sm:$0xff]  ;;  %v6842_v4 = vld [vmem:[#allocation77_spill] sm:$0xff]  ;;  %v6847_v25 = vld [vmem:[#allocation82_spill] sm:$0xff] }
 0x22a   : > { %v3163_v30 = vpop.eup %3162  ;;  %v1977_v17 = vadd.f32 %v5748_v8, %v1976_v46  ;;  %3180 = vpow2.f32 %v1476_v29  ;;  %v6844_v46 = vld [vmem:[#allocation79_spill] sm:$0xff] }
 0x22b   : > { %v2484_v52 = vadd.f32 %v2483_v5, %v2357_v11  ;;  %v1782_v32 = vmul.f32 %v3163_v30, %v6840_v22  ;;  %v1783_v12 = vmul.f32 %v3163_v30, %v6841_v54  ;;  %v1784_v15 = vmul.f32 %v3163_v30, %v6842_v4  ;;  %v6845_v5 = vld [vmem:[#allocation80_spill] sm:$0xff]  ;;  %v6846_v22 = vld [vmem:[#allocation81_spill] sm:$0xff] }
 0x22c   : > { %v3165_v63 = vpop.eup %3164  ;;  %v1785_v9 = vmul.f32 %v3163_v30, %v6843_v59  ;;  %1978 = vadd.xlane.f32.xlu1 %v1977_v17  ;;  %3182 = vrcp.f32 %v5713_v28  ;;  %v936_v54 = vmul.f32 1.442695, %v715_v49  ;;  %v1258_v4 = vsub.f32 %v3527_v1, %v1125_v31 }
 0x22d   : > { %v2102_v11 = vmul.f32 %v3165_v63, %v6844_v46  ;;  %v2103_v37 = vmul.f32 %v3165_v63, %v6845_v5  ;;  %v2104_v8 = vmul.f32 %v3165_v63, %v6846_v22  ;;  %v2105_v62 = vmul.f32 %v3165_v63, %v6847_v25  ;;  %v5766_v50 = vpop.eup %3166  ;;  %v3529_v25 = vld [vmem:[%s3918_s29 + $0x2f0] sm:$0xff] }
 0x22e   : > { %v1259_v59 = vsub.f32 %v3528_v44, %v1125_v31  ;;  %v5771_v29 = vpop.eup %3168  ;;  %3184 = vrcp.f32 %v1929_v38  ;;  %v938_v63 = vmul.f32 1.442695, %v716_v61  ;;  %v1260_v51 = vsub.f32 %v3529_v25, %v1125_v31 }
 0x22f   : > { %v2230_v30 = vsub.f32 %v2102_v11, %v1782_v32  ;;  %v2231_v17 = vsub.f32 %v2103_v37, %v1783_v12  ;;  %v2232_v46 = vsub.f32 %v2104_v8, %v1784_v15  ;;  %v2233_v5 = vsub.f32 %v2105_v62, %v1785_v9  ;;  %v5773_v22 = vpop.eup %3170  ;;  %v3530_v32 = vld [vmem:[%s3918_s29 + $0x2f8] sm:$0xff] }
 0x230   : > { %v1660_v28 = vadd.f32 %v5771_v29, %v5766_v50  ;;  %v5778_v49 = vpop.eup %3172  ;;  %v940_v44 = vmul.f32 1.442695, %v717_v26  ;;  %3186 = vpow2.f32 %v934_v13  ;;  %v1261_v12 = vsub.f32 %v3530_v32, %v1125_v31 }
 0x231   : > { %6848 = vst [vmem:[#allocation44_spill] sm:$0xff] %v5778_v49  ;;  %v2358_v1 = vmul.f32 %v2230_v30, %v2230_v30  ;;  %v5780_v19 = vpop.eup %3174  ;;  %v1478_v8 = vmul.f32 1.442695, %v1258_v4  ;;  %v2359_v38 = vmul.f32 %v2231_v17, %v2231_v17  ;;  %3188 = vpow2.f32 %v936_v54 }
 0x232   : > { %v1661_v9 = vadd.f32 %v5773_v22, %v1660_v28  ;;  %v5784_v15 = vpop.eup %3176  ;;  %v1480_v11 = vmul.f32 1.442695, %v1259_v59  ;;  %3190 = vpow2.f32 %v938_v63  ;;  %v1482_v62 = vmul.f32 1.442695, %v1260_v51 }
 0x233   : > { %v2485_v61 = vadd.f32 %v2484_v52, %v2358_v1  ;;  %v5786_v37 = vpop.eup %3178  ;;  %v1980_v13 = vadd.f32 %v5784_v15, %v5780_v19  ;;  %v2360_v30 = vmul.f32 %v2232_v46, %v2232_v46  ;;  %3192 = vpow2.f32 %v940_v44  ;;  %v6849_v1 = vld [vmem:[#allocation83_spill] sm:$0xff]  ;;  %v6850_v44 = vld [vmem:[#allocation84_spill] sm:$0xff] }
 0x234   : > { %v1662_v26 = vadd.f32 %v5778_v49, %v1661_v9  ;;  %v5791_v4 = vpop.eup %3180  ;;  %3194 = vpow2.f32 %v1478_v8  ;;  %v1484_v25 = vmul.f32 1.442695, %v1261_v12  ;;  %v2361_v54 = vmul.f32 %v2233_v5, %v2233_v5  ;;  %v6851_v8 = vld [vmem:[#allocation87_spill] sm:$0xff]  ;;  %v6852_v9 = vld [vmem:[#allocation88_spill] sm:$0xff] }
 0x235   : > { %v2486_v31 = vadd.f32 %v2485_v61, %v2359_v38  ;;  %v1981_v52 = vadd.f32 %v5786_v37, %v1980_v13  ;;  %3196 = vpow2.f32 %v1480_v11  ;;  %v6853_v61 = vld [vmem:[#allocation89_spill] sm:$0xff] }
 0x236   : > { %1663 = vadd.xlane.f32.xlu0 %v1662_v26  ;;  %v3183_v17 = vpop.eup %3182  ;;  %3198 = vpow2.f32 %v1482_v62  ;;  %v6856_v62 = vld [vmem:[#allocation85_spill] sm:$0xff] }
 0x237   : > { %v2487_v59 = vadd.f32 %v2486_v31, %v2360_v30  ;;  %v1982_v51 = vadd.f32 %v5791_v4, %v1981_v52  ;;  %v1786_v46 = vmul.f32 %v3183_v17, %v6849_v1  ;;  %3200 = vpow2.f32 %v1484_v25  ;;  %v6857_v30 = vld [vmem:[#allocation90_spill] sm:$0xff] }
 0x238   : > { %v3185_v28 = vpop.eup %3184  ;;  %v1787_v32 = vmul.f32 %v3183_v17, %v6850_v44  ;;  %v1788_v13 = vmul.f32 %v3183_v17, %v6856_v62  ;;  %v6860_v1 = vld [vmem:[#allocation86_spill] sm:$0xff] }
 0x239   : > { %v2488_v63 = vadd.f32 %v2487_v59, %v2361_v54  ;;  %1983 = vadd.xlane.f32.xlu1 %v1982_v51  ;;  %v2106_v12 = vmul.f32 %v3185_v28, %v6851_v8  ;;  %v2107_v38 = vmul.f32 %v3185_v28, %v6852_v9  ;;  %v2108_v5 = vmul.f32 %v3185_v28, %v6853_v61 }
 0x23a   : > { %v5800_v26 = vpop.eup %3186  ;;  %v2109_v31 = vmul.f32 %v3185_v28, %v6857_v30  ;;  %v1789_v44 = vmul.f32 %v3183_v17, %v6860_v1 }
 0x23b   : > { %6854 = vst [vmem:[#allocation40_spill] sm:$0xff] %v5800_v26  ;;  %v5802_v11 = vpop.eup %3188  ;;  %v2234_v52 = vsub.f32 %v2106_v12, %v1786_v46  ;;  %v2235_v54 = vsub.f32 %v2107_v38, %v1787_v32  ;;  %v2236_v8 = vsub.f32 %v2108_v5, %v1788_v13 }
 0x23c   : > { %6855 = vst [vmem:[#allocation35_spill] sm:$0xff] %v5802_v11  ;;  %v5806_v25 = vpop.eup %3190  ;;  %v1665_v59 = vadd.f32 %v5802_v11, %v5800_v26  ;;  %v2237_v28 = vsub.f32 %v2109_v31, %v1789_v44 }
 0x23d   : > { %6858 = vst [vmem:[#allocation36_spill] sm:$0xff] %v5806_v25  ;;  %v5810_v51 = vpop.eup %3192  ;;  %v2362_v9 = vmul.f32 %v2234_v52, %v2234_v52  ;;  %v2363_v46 = vmul.f32 %v2235_v54, %v2235_v54  ;;  %v2364_v5 = vmul.f32 %v2236_v8, %v2236_v8  ;;  %v3533_v8 = vld [vmem:[%s3911_s3 + $0x310] sm:$0xff] }
 0x23e   : > { %6859 = vst [vmem:[#allocation41_spill] sm:$0xff] %v5810_v51  ;;  %v5813_v61 = vpop.eup %3194  ;;  %v1666_v49 = vadd.f32 %v5806_v25, %v1665_v59  ;;  %v2365_v31 = vmul.f32 %v2237_v28, %v2237_v28 }
 0x23f   : > { %v5816_v62 = vpop.eup %3196  ;;  %v2489_v32 = vadd.f32 %v2488_v63, %v2362_v9  ;;  %v1614_v12 = vpop.xlane.xlu0 %1613 }
 0x240   : > { %6861 = vst [vmem:[#allocation59_spill] sm:$0xff] %v5816_v62  ;;  %v5818_v38 = vpop.eup %3198  ;;  %v1667_v30 = vadd.f32 %v5810_v51, %v1666_v49  ;;  %v1985_v17 = vadd.f32 %v5816_v62, %v5813_v61  ;;  %3202 = vrcp.f32 %v1614_v12  ;;  %v3531_v49 = vld [vmem:[%s3911_s3 + $0x300] sm:$0xff]  ;;  %v3532_v51 = vld [vmem:[%s3911_s3 + $0x308] sm:$0xff]  ;;  %v3534_v12 = vld [vmem:[%s3911_s3 + $0x318] sm:$0xff] }
 0x241   : > { %6862 = vst [vmem:[#allocation60_spill] sm:$0xff] %v5818_v38  ;;  %v2490_v13 = vadd.f32 %v2489_v32, %v2363_v46  ;;  %v5823_v52 = vpop.eup %3200 }
 0x242   : > { %6863 = vst [vmem:[#allocation61_spill] sm:$0xff] %v5823_v52  ;;  %1668 = vadd.xlane.f32.xlu0 %v1667_v30  ;;  %v1986_v63 = vadd.f32 %v5818_v38, %v1985_v17 }
 0x243   : > { %v2491_v54 = vadd.f32 %v2490_v13, %v2364_v5 }
 0x244   : > { %v1987_v1 = vadd.f32 %v5823_v52, %v1986_v63  ;;  %v1934_v44 = vpop.xlane.xlu1 %1933  ;;  %v3536_v52 = vld [vmem:[%s3918_s29 + $0x308] sm:$0xff] }
 0x245   : > { %v586_v59 = vpop.xlane.xlu0 %585  ;;  %v5830_v32 = vadd.f32 %v2491_v54, %v2365_v31  ;;  %3204 = vrcp.f32 %v1934_v44  ;;  %v3538_v44 = vld [vmem:[%s3918_s29 + $0x318] sm:$0xff] }
 0x246   : > { %v718_v9 = vsub.f32 %v3531_v49, %v586_v59  ;;  %v719_v25 = vsub.f32 %v3532_v51, %v586_v59  ;;  %v720_v46 = vsub.f32 %v3533_v8, %v586_v59  ;;  %v721_v30 = vsub.f32 %v3534_v12, %v586_v59  ;;  %1988 = vadd.xlane.f32.xlu1 %v1987_v1  ;;  %v3535_v49 = vld [vmem:[%s3918_s29 + $0x300] sm:$0xff]  ;;  %v3537_v8 = vld [vmem:[%s3918_s29 + $0x310] sm:$0xff] }
 0x248   : > { %v942_v28 = vmul.f32 1.442695, %v718_v9  ;;  %v944_v17 = vmul.f32 1.442695, %v719_v25  ;;  %v946_v5 = vmul.f32 1.442695, %v720_v46 }
 0x249   : > { %v948_v13 = vmul.f32 1.442695, %v721_v30  ;;  %v1130_v63 = vpop.xlane.xlu1 %1129 }
 0x24a   : > { %3206 = vpow2.f32 %v942_v28  ;;  %v1262_v51 = vsub.f32 %v3535_v49, %v1130_v63  ;;  %v1263_v38 = vsub.f32 %v3536_v52, %v1130_v63  ;;  %v1264_v31 = vsub.f32 %v3537_v8, %v1130_v63  ;;  %v3203_v54 = vpop.eup %3202  ;;  %v6865_v49 = vld [vmem:[#allocation51_spill] sm:$0xff] }
 0x24b   : > { %3208 = vpow2.f32 %v944_v17  ;;  %v1265_v11 = vsub.f32 %v3538_v44, %v1130_v63  ;;  %v1619_v59 = vpop.xlane.xlu0 %1618  ;;  %v1790_v46 = vmul.f32 %v3203_v54, %v5110_v45  ;;  %v1791_v12 = vmul.f32 %v3203_v54, %v5118_v33  ;;  %v6866_v45 = vld [vmem:[#allocation52_spill] sm:$0xff] }
 0x24c   : > { %3210 = vpow2.f32 %v946_v5  ;;  %v1486_v1 = vmul.f32 1.442695, %v1262_v51  ;;  %v1488_v9 = vmul.f32 1.442695, %v1263_v38  ;;  %v1490_v25 = vmul.f32 1.442695, %v1264_v31 }
 0x24d   : > { %3212 = vpow2.f32 %v948_v13  ;;  %v1792_v30 = vmul.f32 %v3203_v54, %v5120_v7  ;;  %v1793_v28 = vmul.f32 %v3203_v54, %v5126_v55  ;;  %v1492_v17 = vmul.f32 1.442695, %v1265_v11  ;;  %v6864_v13 = vld [vmem:[#allocation94_spill] sm:$0xff]  ;;  %v3539_v31 = vld [vmem:[%s3911_s3 + $0x320] sm:$0xff] }
 0x24e   : > { %3214 = vrcp.f32 %v1619_v59  ;;  %v3540_v59 = vld [vmem:[%s3911_s3 + $0x328] sm:$0xff] }
 0x24f   : > { %3216 = vpow2.f32 %v1486_v1  ;;  %v3205_v52 = vpop.eup %3204  ;;  %v3541_v1 = vld [vmem:[%s3911_s3 + $0x330] sm:$0xff] }
 0x250   : > { %3218 = vpow2.f32 %v1488_v9  ;;  %v2110_v38 = vmul.f32 %v3205_v52, %v5130_v41  ;;  %v2111_v63 = vmul.f32 %v3205_v52, %v6864_v13  ;;  %v2112_v51 = vmul.f32 %v3205_v52, %v6865_v49  ;;  %v3542_v49 = vld [vmem:[%s3911_s3 + $0x338] sm:$0xff] }
 0x251   : > { %v2113_v33 = vmul.f32 %v3205_v52, %v6866_v45  ;;  %3220 = vpow2.f32 %v1490_v25  ;;  %v1939_v8 = vpop.xlane.xlu1 %1938 }
 0x252   : > { %v591_v5 = vpop.xlane.xlu0 %590  ;;  %v2238_v11 = vsub.f32 %v2110_v38, %v1790_v46  ;;  %v2239_v9 = vsub.f32 %v2111_v63, %v1791_v12  ;;  %v2240_v41 = vsub.f32 %v2112_v51, %v1792_v30  ;;  %3222 = vpow2.f32 %v1492_v17  ;;  %v3543_v63 = vld [vmem:[%s3918_s29 + $0x320] sm:$0xff] }
 0x253   : > { %v722_v44 = vsub.f32 %v3539_v31, %v591_v5  ;;  %v723_v7 = vsub.f32 %v3540_v59, %v591_v5  ;;  %v724_v55 = vsub.f32 %v3541_v1, %v591_v5  ;;  %v2241_v62 = vsub.f32 %v2113_v33, %v1793_v28  ;;  %v3544_v33 = vld [vmem:[%s3918_s29 + $0x328] sm:$0xff] }
 0x254   : > { %v5848_v54 = vpop.eup %3206  ;;  %v725_v26 = vsub.f32 %v3542_v49, %v591_v5  ;;  %v2366_v45 = vmul.f32 %v2238_v11, %v2238_v11  ;;  %v2367_v59 = vmul.f32 %v2239_v9, %v2239_v9  ;;  %3224 = vrcp.f32 %v1939_v8  ;;  %v3546_v11 = vld [vmem:[%s3918_s29 + $0x338] sm:$0xff] }
 0x255   : > { %6867 = vst [vmem:[#allocation62_spill] sm:$0xff] %v5848_v54  ;;  %v5850_v13 = vpop.eup %3208  ;;  %v950_v25 = vmul.f32 1.442695, %v722_v44  ;;  %v952_v31 = vmul.f32 1.442695, %v723_v7  ;;  %v3545_v7 = vld [vmem:[%s3918_s29 + $0x330] sm:$0xff] }
 0x256   : > { %6868 = vst [vmem:[#allocation63_spill] sm:$0xff] %v5850_v13  ;;  %v5853_v52 = vpop.eup %3210  ;;  %v954_v46 = vmul.f32 1.442695, %v724_v55  ;;  %v1670_v30 = vadd.f32 %v5850_v13, %v5848_v54  ;;  %v2493_v5 = vadd.f32 %v5830_v32, %v2366_v45  ;;  %v956_v38 = vmul.f32 1.442695, %v725_v26 }
 0x257   : > { %6869 = vst [vmem:[#allocation64_spill] sm:$0xff] %v5853_v52  ;;  %v5857_v28 = vpop.eup %3212  ;;  %3226 = vpow2.f32 %v950_v25  ;;  %v2368_v13 = vmul.f32 %v2240_v41, %v2240_v41  ;;  %v2369_v26 = vmul.f32 %v2241_v62, %v2241_v62 }
 0x258   : > { %v1135_v12 = vpop.xlane.xlu1 %1134  ;;  %6870 = vst [vmem:[#allocation65_spill] sm:$0xff] %v5857_v28  ;;  %v3215_v17 = vpop.eup %3214  ;;  %v1671_v9 = vadd.f32 %v5853_v52, %v1670_v30  ;;  %v2494_v54 = vadd.f32 %v2493_v5, %v2367_v59  ;;  %3228 = vpow2.f32 %v952_v31  ;;  %v6873_v59 = vld [vmem:[#allocation53_spill] sm:$0xff] }
 0x259   : > { %v1266_v51 = vsub.f32 %v3543_v63, %v1135_v12  ;;  %v1267_v44 = vsub.f32 %v3544_v33, %v1135_v12  ;;  %v1268_v1 = vsub.f32 %v3545_v7, %v1135_v12  ;;  %v1269_v8 = vsub.f32 %v3546_v11, %v1135_v12  ;;  %v1624_v55 = vpop.xlane.xlu0 %1623  ;;  %v5865_v49 = vpop.eup %3216  ;;  %v3547_v5 = vld [vmem:[%s3911_s3 + $0x340] sm:$0xff] }
 0x25a   : > { %v5867_v32 = vpop.eup %3218  ;;  %3230 = vpow2.f32 %v954_v46  ;;  %v2495_v25 = vadd.f32 %v2494_v54, %v2368_v13  ;;  %v1672_v41 = vadd.f32 %v5857_v28, %v1671_v9  ;;  %v1794_v46 = vmul.f32 %v3215_v17, %v6873_v59  ;;  %v6875_v9 = vld [vmem:[#allocation54_spill] sm:$0xff] }
 0x25b   : > { %6871 = vst [vmem:[#allocation66_spill] sm:$0xff] %v5867_v32  ;;  %v1494_v45 = vmul.f32 1.442695, %v1266_v51  ;;  %v1496_v63 = vmul.f32 1.442695, %v1267_v44  ;;  %3232 = vpow2.f32 %v956_v38  ;;  %v5869_v7 = vpop.eup %3220  ;;  %v1990_v31 = vadd.f32 %v5867_v32, %v5865_v49  ;;  %v3548_v38 = vld [vmem:[%s3911_s3 + $0x348] sm:$0xff] }
 0x25c   : > { %v1498_v33 = vmul.f32 1.442695, %v1268_v1  ;;  %v1500_v12 = vmul.f32 1.442695, %v1269_v8  ;;  %6872 = vst [vmem:[#allocation67_spill] sm:$0xff] %v5869_v7  ;;  %v2496_v62 = vadd.f32 %v2495_v25, %v2369_v26  ;;  %v3549_v44 = vld [vmem:[%s3911_s3 + $0x350] sm:$0xff]  ;;  %1673 = vadd.xlane.f32.xlu0 %v1672_v41  ;;  %v5879_v8 = vpop.eup %3222 }
 0x25d   : > { %3234 = vpow2.f32 %v1494_v45  ;;  %v1991_v11 = vadd.f32 %v5869_v7, %v1990_v31  ;;  %6874 = vst [vmem:[#allocation68_spill] sm:$0xff] %v5879_v8  ;;  %v1795_v45 = vmul.f32 %v3215_v17, %v6875_v9  ;;  %v6876_v26 = vld [vmem:[#allocation95_spill] sm:$0xff] }
 0x25e   : > { %v596_v30 = vpop.xlane.xlu0 %595  ;;  %3236 = vpow2.f32 %v1496_v63  ;;  %v1944_v13 = vpop.xlane.xlu1 %1943  ;;  %v1796_v25 = vmul.f32 %v3215_v17, %v6876_v26  ;;  %v1797_v63 = vmul.f32 %v3215_v17, %v5182_v42 }
 0x25f   : > { %v726_v54 = vsub.f32 %v3547_v5, %v596_v30  ;;  %3238 = vpow2.f32 %v1498_v33  ;;  %v727_v51 = vsub.f32 %v3548_v38, %v596_v30  ;;  %v728_v1 = vsub.f32 %v3549_v44, %v596_v30  ;;  %v3225_v59 = vpop.eup %3224  ;;  %v3550_v33 = vld [vmem:[%s3911_s3 + $0x358] sm:$0xff] }
 0x260   : > { %3240 = vpow2.f32 %v1500_v12  ;;  %v729_v5 = vsub.f32 %v3550_v33, %v596_v30  ;;  %v1992_v38 = vadd.f32 %v5879_v8, %v1991_v11  ;;  %v2114_v41 = vmul.f32 %v3225_v59, %v5197_v39  ;;  %v3552_v33 = vld [vmem:[%s3918_s29 + $0x348] sm:$0xff] }
 0x261   : > { %3242 = vrcp.f32 %v1624_v55  ;;  %v958_v28 = vmul.f32 1.442695, %v726_v54  ;;  %v2115_v31 = vmul.f32 %v3225_v59, %v5210_v24  ;;  %v2116_v44 = vmul.f32 %v3225_v59, %v5219_v14  ;;  %v5890_v26 = vpop.eup %3226 }
 0x262   : > { %v2117_v9 = vmul.f32 %v3225_v59, %v5225_v16  ;;  %3244 = vrcp.f32 %v1944_v13  ;;  %v960_v42 = vmul.f32 1.442695, %v727_v51  ;;  %v962_v17 = vmul.f32 1.442695, %v728_v1  ;;  %1993 = vadd.xlane.f32.xlu1 %v1992_v38  ;;  %v5892_v12 = vpop.eup %3228  ;;  %v3551_v16 = vld [vmem:[%s3918_s29 + $0x340] sm:$0xff]  ;;  %v3553_v13 = vld [vmem:[%s3918_s29 + $0x350] sm:$0xff] }
 0x263   : > { %6877 = vst [vmem:[#allocation69_spill] sm:$0xff] %v5892_v12  ;;  %v2242_v30 = vsub.f32 %v2114_v41, %v1794_v46  ;;  %v2243_v39 = vsub.f32 %v2115_v31, %v1795_v45  ;;  %v2244_v54 = vsub.f32 %v2116_v44, %v1796_v25  ;;  %v964_v14 = vmul.f32 1.442695, %v729_v5  ;;  %v3554_v45 = vld [vmem:[%s3918_s29 + $0x358] sm:$0xff] }
 0x264   : > { %v1140_v55 = vpop.xlane.xlu1 %1139  ;;  %v2245_v24 = vsub.f32 %v2117_v9, %v1797_v63  ;;  %v5894_v11 = vpop.eup %3230  ;;  %3246 = vpow2.f32 %v958_v28  ;;  %v1675_v9 = vadd.f32 %v5892_v12, %v5890_v26 }
 0x265   : > { %6878 = vst [vmem:[#allocation70_spill] sm:$0xff] %v5894_v11  ;;  %v1270_v59 = vsub.f32 %v3551_v16, %v1140_v55  ;;  %v1271_v8 = vsub.f32 %v3552_v33, %v1140_v55  ;;  %v1272_v52 = vsub.f32 %v3553_v13, %v1140_v55  ;;  %v1629_v51 = vpop.xlane.xlu0 %1628  ;;  %v5899_v1 = vpop.eup %3232  ;;  %v2370_v38 = vmul.f32 %v2242_v30, %v2242_v30  ;;  %v3556_v16 = vld [vmem:[%s3911_s3 + $0x368] sm:$0xff]  ;;  %v3558_v13 = vld [vmem:[%s3911_s3 + $0x378] sm:$0xff] }
 0x266   : > { %6879 = vst [vmem:[#allocation71_spill] sm:$0xff] %v5899_v1  ;;  %v2371_v7 = vmul.f32 %v2243_v39, %v2243_v39  ;;  %v2372_v32 = vmul.f32 %v2244_v54, %v2244_v54  ;;  %3248 = vpow2.f32 %v960_v42  ;;  %v1273_v25 = vsub.f32 %v3554_v45, %v1140_v55 }
 0x267   : > { %v5901_v46 = vpop.eup %3234  ;;  %v1502_v63 = vmul.f32 1.442695, %v1270_v59  ;;  %v1504_v5 = vmul.f32 1.442695, %v1271_v8  ;;  %v2373_v31 = vmul.f32 %v2245_v24, %v2245_v24  ;;  %v2497_v44 = vadd.f32 %v2496_v62, %v2370_v38 }
 0x268   : > { %v5904_v41 = vpop.eup %3236  ;;  %3250 = vpow2.f32 %v962_v17  ;;  %v1506_v28 = vmul.f32 1.442695, %v1272_v52  ;;  %v1508_v42 = vmul.f32 1.442695, %v1273_v25  ;;  %v3555_v17 = vld [vmem:[%s3911_s3 + $0x360] sm:$0xff]  ;;  %v1676_v45 = vadd.f32 %v5894_v11, %v1675_v9 }
 0x269   : > { %6880 = vst [vmem:[#allocation72_spill] sm:$0xff] %v5904_v41  ;;  %v5908_v30 = vpop.eup %3238  ;;  %3252 = vpow2.f32 %v964_v14  ;;  %v1949_v55 = vpop.xlane.xlu1 %1948  ;;  %v5912_v8 = vadd.f32 %v5904_v41, %v5901_v46  ;;  %v2498_v62 = vadd.f32 %v2497_v44, %v2371_v7  ;;  %v3557_v14 = vld [vmem:[%s3911_s3 + $0x370] sm:$0xff] }
 0x26a   : > { %6881 = vst [vmem:[#allocation73_spill] sm:$0xff] %v5908_v30  ;;  %v5914_v54 = vpop.eup %3240  ;;  %3254 = vpow2.f32 %v1502_v63 }
 0x26b   : > { %v601_v39 = vpop.xlane.xlu0 %600  ;;  %6882 = vst [vmem:[#allocation74_spill] sm:$0xff] %v5914_v54  ;;  %v3243_v33 = vpop.eup %3242  ;;  %3256 = vpow2.f32 %v1504_v5  ;;  %v2499_v25 = vadd.f32 %v2498_v62, %v2372_v32 }
 0x26c   : > { %v730_v24 = vsub.f32 %v3555_v17, %v601_v39  ;;  %v731_v59 = vsub.f32 %v3556_v16, %v601_v39  ;;  %v732_v52 = vsub.f32 %v3557_v14, %v601_v39  ;;  %v733_v38 = vsub.f32 %v3558_v13, %v601_v39  ;;  %v3245_v63 = vpop.eup %3244 }
 0x26d   : > { %v1798_v12 = vmul.f32 %v3243_v33, %v5227_v34  ;;  %v1799_v41 = vmul.f32 %v3243_v33, %v5232_v3  ;;  %v1800_v7 = vmul.f32 %v3243_v33, %v5238_v40  ;;  %v1801_v44 = vmul.f32 %v3243_v33, %v5241_v2 }
 0x26e   : > { %3258 = vpow2.f32 %v1506_v28  ;;  %v966_v17 = vmul.f32 1.442695, %v730_v24  ;;  %v968_v16 = vmul.f32 1.442695, %v731_v59  ;;  %v2500_v5 = vadd.f32 %v2499_v25, %v2373_v31  ;;  %v5929_v62 = vpop.eup %3246  ;;  %v3560_v59 = vld [vmem:[%s3918_s29 + $0x368] sm:$0xff] }
 0x26f   : > { %v2118_v14 = vmul.f32 %v3245_v63, %v5247_v48  ;;  %v2119_v39 = vmul.f32 %v3245_v63, %v5257_v47  ;;  %v2120_v32 = vmul.f32 %v3245_v63, %v5288_v43  ;;  %v1145_v34 = vpop.xlane.xlu1 %1144  ;;  %v2121_v3 = vmul.f32 %v3245_v63, %v5300_v35  ;;  %6883 = vst [vmem:[#allocation75_spill] sm:$0xff] %v5929_v62  ;;  %v3559_v47 = vld [vmem:[%s3918_s29 + $0x360] sm:$0xff] }
 0x270   : > { %3260 = vpow2.f32 %v1508_v42  ;;  %v970_v40 = vmul.f32 1.442695, %v732_v52  ;;  %v972_v9 = vmul.f32 1.442695, %v733_v38  ;;  %v5931_v31 = vpop.eup %3248  ;;  %v1274_v43 = vsub.f32 %v3559_v47, %v1145_v34  ;;  %v3564_v47 = vld [vmem:[%s3911_s3 + $0x388] sm:$0xff] }
 0x271   : > { %v2246_v2 = vsub.f32 %v2118_v14, %v1798_v12  ;;  %v2247_v28 = vsub.f32 %v2119_v39, %v1799_v41  ;;  %v2248_v24 = vsub.f32 %v2120_v32, %v1800_v7  ;;  %3262 = vrcp.f32 %v1629_v51  ;;  %6884 = vst [vmem:[#allocation76_spill] sm:$0xff] %v5931_v31  ;;  %v1634_v35 = vpop.xlane.xlu0 %1633  ;;  %v3561_v41 = vld [vmem:[%s3918_s29 + $0x370] sm:$0xff]  ;;  %v3562_v7 = vld [vmem:[%s3918_s29 + $0x378] sm:$0xff] }
 0x272   : > { %v2249_v48 = vsub.f32 %v2121_v3, %v1801_v44  ;;  %3264 = vrcp.f32 %v1949_v55  ;;  %v1275_v33 = vsub.f32 %v3560_v59, %v1145_v34  ;;  %v5935_v42 = vpop.eup %3250  ;;  %v1276_v25 = vsub.f32 %v3561_v41, %v1145_v34 }
 0x273   : > { %v2374_v52 = vmul.f32 %v2246_v2, %v2246_v2  ;;  %v2375_v13 = vmul.f32 %v2247_v28, %v2247_v28  ;;  %v2376_v38 = vmul.f32 %v2248_v24, %v2248_v24  ;;  %3266 = vpow2.f32 %v966_v17  ;;  %v5937_v12 = vpop.eup %3252 }
 0x274   : > { %6885 = vst [vmem:[#allocation77_spill] sm:$0xff] %v5937_v12  ;;  %v2377_v51 = vmul.f32 %v2249_v48, %v2249_v48  ;;  %3268 = vpow2.f32 %v968_v16  ;;  %v1277_v55 = vsub.f32 %v3562_v7, %v1145_v34  ;;  %v5941_v63 = vpop.eup %3254  ;;  %v1510_v14 = vmul.f32 1.442695, %v1274_v43  ;;  %v3563_v34 = vld [vmem:[%s3911_s3 + $0x380] sm:$0xff]  ;;  %v3565_v43 = vld [vmem:[%s3911_s3 + $0x390] sm:$0xff] }
 0x275   : > { %6886 = vst [vmem:[#allocation78_spill] sm:$0xff] %v5941_v63  ;;  %v2501_v44 = vadd.f32 %v2500_v5, %v2374_v52  ;;  %3270 = vpow2.f32 %v970_v40  ;;  %v1512_v39 = vmul.f32 1.442695, %v1275_v33  ;;  %v5943_v32 = vpop.eup %3256  ;;  %v1514_v17 = vmul.f32 1.442695, %v1276_v25  ;;  %v1954_v2 = vpop.xlane.xlu1 %1953 }
 0x276   : > { %6887 = vst [vmem:[#allocation79_spill] sm:$0xff] %v5943_v32  ;;  %3272 = vpow2.f32 %v972_v9  ;;  %v1516_v3 = vmul.f32 1.442695, %v1277_v55  ;;  %v1677_v16 = vadd.f32 %v5899_v1, %v1676_v45  ;;  %v3566_v9 = vld [vmem:[%s3911_s3 + $0x398] sm:$0xff]  ;;  %v1996_v45 = vadd.f32 %v5908_v30, %v5912_v8  ;;  %v3568_v8 = vld [vmem:[%s3918_s29 + $0x388] sm:$0xff] }
 0x277   : > { %v606_v28 = vpop.xlane.xlu0 %605  ;;  %v2502_v24 = vadd.f32 %v2501_v44, %v2375_v13  ;;  %3274 = vpow2.f32 %v1510_v14 }
 0x278   : > { %v734_v48 = vsub.f32 %v3563_v34, %v606_v28  ;;  %v735_v5 = vsub.f32 %v3564_v47, %v606_v28  ;;  %v5948_v40 = vpop.eup %3258  ;;  %3276 = vpow2.f32 %v1512_v39  ;;  %1678 = vadd.xlane.f32.xlu0 %v1677_v16  ;;  %v736_v59 = vsub.f32 %v3565_v43, %v606_v28 }
 0x279   : > { %v737_v33 = vsub.f32 %v3566_v9, %v606_v28  ;;  %v2503_v52 = vadd.f32 %v2502_v24, %v2376_v38  ;;  %3278 = vpow2.f32 %v1514_v17  ;;  %v1997_v44 = vadd.f32 %v5914_v54, %v1996_v45  ;;  %v3567_v28 = vld [vmem:[%s3918_s29 + $0x380] sm:$0xff]  ;;  %v6888_v17 = vld [vmem:[#allocation11_spill] sm:$0xff] }
 0x27a   : > { %v974_v13 = vmul.f32 1.442695, %v734_v48  ;;  %v976_v41 = vmul.f32 1.442695, %v735_v5  ;;  %v5954_v25 = vpop.eup %3260  ;;  %3280 = vpow2.f32 %v1516_v3  ;;  %v978_v7 = vmul.f32 1.442695, %v736_v59 }
 0x27b   : > { %v980_v55 = vmul.f32 1.442695, %v737_v33  ;;  %v1150_v14 = vpop.xlane.xlu1 %1149  ;;  %v3263_v39 = vpop.eup %3262  ;;  %v2504_v16 = vadd.f32 %v2503_v52, %v2377_v51  ;;  %3282 = vrcp.f32 %v1634_v35  ;;  %v6889_v48 = vld [vmem:[#allocation12_spill] sm:$0xff]  ;;  %1998 = vadd.xlane.f32.xlu1 %v1997_v44  ;;  %v6891_v33 = vld [vmem:[#allocation45_spill] sm:$0xff] }
 0x27c   : > { %v1278_v34 = vsub.f32 %v3567_v28, %v1150_v14  ;;  %v1279_v47 = vsub.f32 %v3568_v8, %v1150_v14  ;;  %v3265_v38 = vpop.eup %3264  ;;  %v1802_v24 = vmul.f32 %v3263_v39, %v6888_v17  ;;  %v1803_v5 = vmul.f32 %v3263_v39, %v6889_v48  ;;  %v3569_v28 = vld [vmem:[%s3918_s29 + $0x390] sm:$0xff]  ;;  %v3570_v17 = vld [vmem:[%s3918_s29 + $0x398] sm:$0xff] }
 0x27d   : > { %v1804_v3 = vmul.f32 %v3263_v39, %v5317_v20  ;;  %v1805_v43 = vmul.f32 %v3263_v39, %v5323_v36  ;;  %v5963_v59 = vpop.eup %3266  ;;  %v2122_v35 = vmul.f32 %v3265_v38, %v5331_v18  ;;  %v2123_v51 = vmul.f32 %v3265_v38, %v5333_v23  ;;  %v5973_v36 = vpop.xlane.xlu0 %1638 }
 0x27e   : > { %6890 = vst [vmem:[#allocation80_spill] sm:$0xff] %v5963_v59  ;;  %v2124_v9 = vmul.f32 %v3265_v38, %v5341_v58  ;;  %v2125_v45 = vmul.f32 %v3265_v38, %v6891_v33  ;;  %v5969_v52 = vpop.eup %3268  ;;  %3284 = vrcp.f32 %v1954_v2  ;;  %v1280_v8 = vsub.f32 %v3569_v28, %v1150_v14 }
 0x27f   : > { %6892 = vst [vmem:[#allocation81_spill] sm:$0xff] %v5969_v52  ;;  %v1281_v20 = vsub.f32 %v3570_v17, %v1150_v14  ;;  %v1518_v48 = vmul.f32 1.442695, %v1278_v34  ;;  %v5975_v44 = vpop.eup %3270  ;;  %v2250_v39 = vsub.f32 %v2122_v35, %v1802_v24  ;;  %v2251_v18 = vsub.f32 %v2123_v51, %v1803_v5  ;;  %v3572_v51 = vld [vmem:[%s3911_s3 + $0x3a8] sm:$0xff] }
 0x280   : > { %6893 = vst [vmem:[#allocation82_spill] sm:$0xff] %v5975_v44  ;;  %v2252_v1 = vsub.f32 %v2124_v9, %v1804_v3  ;;  %v2253_v23 = vsub.f32 %v2125_v45, %v1805_v43  ;;  %v5977_v54 = vpop.eup %3272  ;;  %3286 = vpow2.f32 %v974_v13  ;;  %v1520_v58 = vmul.f32 1.442695, %v1279_v47 }
 0x281   : > { %6894 = vst [vmem:[#allocation83_spill] sm:$0xff] %v5977_v54  ;;  %v1522_v38 = vmul.f32 1.442695, %v1280_v8  ;;  %v1524_v2 = vmul.f32 1.442695, %v1281_v20  ;;  %v5979_v33 = vpop.eup %3274  ;;  %v2378_v14 = vmul.f32 %v2250_v39, %v2250_v39  ;;  %v2379_v34 = vmul.f32 %v2251_v18, %v2251_v18  ;;  %v3573_v20 = vld [vmem:[%s3911_s3 + $0x3b0] sm:$0xff] }
 0x282   : > { %6895 = vst [vmem:[#allocation84_spill] sm:$0xff] %v5979_v33  ;;  %v2380_v28 = vmul.f32 %v2252_v1, %v2252_v1  ;;  %v2381_v17 = vmul.f32 %v2253_v23, %v2253_v23  ;;  %v5981_v11 = vpop.eup %3276  ;;  %3288 = vpow2.f32 %v976_v41  ;;  %v1680_v24 = vadd.f32 %v5931_v31, %v5929_v62  ;;  %v3571_v1 = vld [vmem:[%s3911_s3 + $0x3a0] sm:$0xff]  ;;  %v3574_v18 = vld [vmem:[%s3911_s3 + $0x3b8] sm:$0xff] }
 0x283   : > { %6896 = vst [vmem:[#allocation87_spill] sm:$0xff] %v5981_v11  ;;  %v2000_v13 = vadd.f32 %v5943_v32, %v5941_v63  ;;  %v1685_v47 = vadd.f32 %v5969_v52, %v5963_v59  ;;  %v5989_v3 = vpop.eup %3278  ;;  %v2505_v43 = vadd.f32 %v2504_v16, %v2378_v14  ;;  %3290 = vpow2.f32 %v978_v7  ;;  %v1959_v8 = vpop.xlane.xlu1 %1958  ;;  %v6899_v7 = vld [vmem:[#allocation16_spill] sm:$0xff]  ;;  %v6902_v62 = vld [vmem:[#allocation57_spill] sm:$0xff] }
 0x284   : > { %v611_v5 = vpop.xlane.xlu0 %610  ;;  %6897 = vst [vmem:[#allocation88_spill] sm:$0xff] %v5989_v3  ;;  %v5993_v9 = vpop.eup %3280  ;;  %3292 = vpow2.f32 %v980_v55  ;;  %v1681_v45 = vadd.f32 %v5935_v42, %v1680_v24 }
 0x285   : > { %v738_v35 = vsub.f32 %v3571_v1, %v611_v5  ;;  %v739_v41 = vsub.f32 %v3572_v51, %v611_v5  ;;  %6898 = vst [vmem:[#allocation89_spill] sm:$0xff] %v5993_v9  ;;  %v740_v39 = vsub.f32 %v3573_v20, %v611_v5  ;;  %v741_v23 = vsub.f32 %v3574_v18, %v611_v5  ;;  %v3283_v32 = vpop.eup %3282  ;;  %v6900_v1 = vld [vmem:[#allocation55_spill] sm:$0xff]  ;;  %v6901_v51 = vld [vmem:[#allocation56_spill] sm:$0xff]  ;;  %v6903_v18 = vld [vmem:[#allocation58_spill] sm:$0xff] }
 0x286   : > { %v2506_v52 = vadd.f32 %v2505_v43, %v2379_v34  ;;  %3294 = vpow2.f32 %v1518_v48  ;;  %v1806_v14 = vmul.f32 %v3283_v32, %v6899_v7  ;;  %v1807_v63 = vmul.f32 %v3283_v32, %v6900_v1  ;;  %v6904_v1 = vld [vmem:[#allocation24_spill] sm:$0xff] }
 0x287   : > { %v982_v59 = vmul.f32 1.442695, %v738_v35  ;;  %v984_v16 = vmul.f32 1.442695, %v739_v41  ;;  %v1808_v31 = vmul.f32 %v3283_v32, %v6901_v51  ;;  %v1809_v55 = vmul.f32 %v3283_v32, %v6902_v62  ;;  %v6905_v62 = vld [vmem:[#allocation15_spill] sm:$0xff] }
 0x288   : > { %v2507_v30 = vadd.f32 %v2506_v52, %v2380_v28  ;;  %3296 = vpow2.f32 %v1520_v58  ;;  %v1682_v24 = vadd.f32 %v5937_v12, %v1681_v45  ;;  %v986_v20 = vmul.f32 1.442695, %v740_v39  ;;  %v3285_v5 = vpop.eup %3284  ;;  %v6906_v58 = vld [vmem:[#allocation17_spill] sm:$0xff] }
 0x289   : > { %3298 = vpow2.f32 %v1522_v38  ;;  %v988_v34 = vmul.f32 1.442695, %v741_v23  ;;  %v2001_v48 = vadd.f32 %v5948_v40, %v2000_v13  ;;  %v1686_v35 = vadd.f32 %v5975_v44, %v1685_v47  ;;  %v3575_v13 = vld [vmem:[%s3918_s29 + $0x3a0] sm:$0xff] }
 0x28a   : > { %v1155_v43 = vpop.xlane.xlu1 %1154  ;;  %v2508_v41 = vadd.f32 %v2507_v30, %v2381_v17  ;;  %v2126_v7 = vmul.f32 %v3285_v5, %v6903_v18  ;;  %v2127_v51 = vmul.f32 %v3285_v5, %v6904_v1  ;;  %v2128_v32 = vmul.f32 %v3285_v5, %v6905_v62  ;;  %1683 = vadd.xlane.f32.xlu0 %v1682_v24  ;;  %v6008_v52 = vpop.eup %3286  ;;  %v3576_v24 = vld [vmem:[%s3918_s29 + $0x3a8] sm:$0xff]  ;;  %v3577_v1 = vld [vmem:[%s3918_s29 + $0x3b0] sm:$0xff] }
 0x28b   : > { %v2129_v38 = vmul.f32 %v3285_v5, %v6906_v58  ;;  %3300 = vpow2.f32 %v1524_v2  ;;  %v2002_v28 = vadd.f32 %v5954_v25, %v2001_v48  ;;  %v1282_v45 = vsub.f32 %v3575_v13, %v1155_v43 }
 0x28c   : > { %v2254_v47 = vsub.f32 %v2126_v7, %v1806_v14  ;;  %v2255_v30 = vsub.f32 %v2127_v51, %v1807_v63  ;;  %v2256_v17 = vsub.f32 %v2128_v32, %v1808_v31  ;;  %3302 = vrcp.f32 %v5973_v36  ;;  %v6014_v39 = vpop.eup %3288  ;;  %v1644_v2 = vpop.xlane.xlu0 %1643  ;;  %v3578_v36 = vld [vmem:[%s3918_s29 + $0x3b8] sm:$0xff] }
 0x28d   : > { %6907 = vst [vmem:[#allocation85_spill] sm:$0xff] %v6014_v39  ;;  %v2257_v23 = vsub.f32 %v2129_v38, %v1809_v55  ;;  %3304 = vrcp.f32 %v1959_v8  ;;  %2003 = vadd.xlane.f32.xlu1 %v2002_v28  ;;  %v1283_v18 = vsub.f32 %v3576_v24, %v1155_v43  ;;  %v1284_v5 = vsub.f32 %v3577_v1, %v1155_v43  ;;  %v6018_v62 = vpop.eup %3290 }
 0x28e   : > { %6908 = vst [vmem:[#allocation90_spill] sm:$0xff] %v6018_v62  ;;  %v2382_v48 = vmul.f32 %v2254_v47, %v2254_v47  ;;  %v2383_v58 = vmul.f32 %v2255_v30, %v2255_v30  ;;  %3306 = vpow2.f32 %v982_v59  ;;  %v6020_v63 = vpop.eup %3292  ;;  %v2384_v31 = vmul.f32 %v2256_v17, %v2256_v17  ;;  %v3579_v47 = vld [vmem:[%s3911_s3 + $0x3c0] sm:$0xff] }
 0x28f   : > { %3308 = vpow2.f32 %v984_v16  ;;  %v1285_v14 = vsub.f32 %v3578_v36, %v1155_v43  ;;  %v1526_v55 = vmul.f32 1.442695, %v1282_v45  ;;  %v1528_v51 = vmul.f32 1.442695, %v1283_v18  ;;  %v3581_v18 = vld [vmem:[%s3911_s3 + $0x3d0] sm:$0xff] }
 0x290   : > { %v6023_v8 = vpop.eup %3294  ;;  %v2509_v7 = vadd.f32 %v2508_v41, %v2382_v48  ;;  %3310 = vpow2.f32 %v986_v20  ;;  %v1530_v32 = vmul.f32 1.442695, %v1284_v5  ;;  %v1687_v28 = vadd.f32 %v5977_v54, %v1686_v35  ;;  %v1964_v59 = vpop.xlane.xlu1 %1963  ;;  %v3580_v20 = vld [vmem:[%s3911_s3 + $0x3c8] sm:$0xff]  ;;  %v3582_v5 = vld [vmem:[%s3911_s3 + $0x3d8] sm:$0xff] }
 0x291   : > { %3312 = vpow2.f32 %v988_v34  ;;  %v1532_v38 = vmul.f32 1.442695, %v1285_v14  ;;  %v616_v13 = vpop.xlane.xlu0 %615  ;;  %v2005_v16 = vadd.f32 %v5981_v11, %v5979_v33  ;;  %v2385_v34 = vmul.f32 %v2257_v23, %v2257_v23 }
 0x292   : > { %v6028_v43 = vpop.eup %3296  ;;  %v2510_v45 = vadd.f32 %v2509_v7, %v2383_v58  ;;  %3314 = vpow2.f32 %v1526_v55  ;;  %v742_v41 = vsub.f32 %v3579_v47, %v616_v13  ;;  %v743_v30 = vsub.f32 %v3580_v20, %v616_v13  ;;  %1688 = vadd.xlane.f32.xlu0 %v1687_v28  ;;  %v3583_v28 = vld [vmem:[%s3918_s29 + $0x3c0] sm:$0xff] }
 0x293   : > { %v6032_v17 = vpop.eup %3298  ;;  %3316 = vpow2.f32 %v1528_v51  ;;  %v2006_v35 = vadd.f32 %v5989_v3, %v2005_v16  ;;  %v744_v1 = vsub.f32 %v3581_v18, %v616_v13  ;;  %v745_v48 = vsub.f32 %v3582_v5, %v616_v13  ;;  %v6914_v18 = vld [vmem:[#allocation18_spill] sm:$0xff] }
 0x294   : > { %6909 = vst [vmem:[#allocation86_spill] sm:$0xff] %v6032_v17  ;;  %v2511_v24 = vadd.f32 %v2510_v45, %v2384_v31  ;;  %3318 = vpow2.f32 %v1530_v32  ;;  %v990_v36 = vmul.f32 1.442695, %v742_v41  ;;  %v992_v14 = vmul.f32 1.442695, %v743_v30  ;;  %v1160_v23 = vpop.xlane.xlu1 %1159  ;;  %v3584_v31 = vld [vmem:[%s3918_s29 + $0x3c8] sm:$0xff] }
 0x295   : > { %v6037_v58 = vpop.eup %3300  ;;  %3320 = vpow2.f32 %v1532_v38  ;;  %v2007_v55 = vadd.f32 %v5993_v9, %v2006_v35  ;;  %v1286_v16 = vsub.f32 %v3583_v28, %v1160_v23  ;;  %v1287_v32 = vsub.f32 %v3584_v31, %v1160_v23  ;;  %v6910_v41 = vld [vmem:[#allocation19_spill] sm:$0xff]  ;;  %v6913_v35 = vld [vmem:[#allocation14_spill] sm:$0xff]  ;;  %v6915_v28 = vld [vmem:[#allocation20_spill] sm:$0xff] }
 0x296   : > { %v3303_v7 = vpop.eup %3302  ;;  %v2512_v51 = vadd.f32 %v2511_v24, %v2385_v34  ;;  %3322 = vrcp.f32 %v1644_v2  ;;  %v6912_v34 = vld [vmem:[#allocation13_spill] sm:$0xff] }
 0x297   : > { %v3305_v45 = vpop.eup %3304  ;;  %v1810_v13 = vmul.f32 %v3303_v7, %v5452_v60  ;;  %v1811_v47 = vmul.f32 %v3303_v7, %v5466_v53  ;;  %v1812_v38 = vmul.f32 %v3303_v7, %v5468_v56  ;;  %v1813_v20 = vmul.f32 %v3303_v7, %v6910_v41  ;;  %2008 = vadd.xlane.f32.xlu1 %v2007_v55  ;;  %v3585_v53 = vld [vmem:[%s3918_s29 + $0x3d0] sm:$0xff]  ;;  %v3586_v56 = vld [vmem:[%s3918_s29 + $0x3d8] sm:$0xff] }
 0x298   : > { %v6046_v30 = vpop.eup %3306  ;;  %v2130_v2 = vmul.f32 %v3305_v45, %v6912_v34  ;;  %v2131_v24 = vmul.f32 %v3305_v45, %v6913_v35  ;;  %v2132_v5 = vmul.f32 %v3305_v45, %v6914_v18  ;;  %v2133_v31 = vmul.f32 %v3305_v45, %v6915_v28 }
 0x299   : > { %6911 = vst [vmem:[#allocation94_spill] sm:$0xff] %v6046_v30  ;;  %v6052_v54 = vpop.eup %3308  ;;  %3324 = vrcp.f32 %v1964_v59  ;;  %v994_v60 = vmul.f32 1.442695, %v744_v1  ;;  %v1288_v9 = vsub.f32 %v3585_v53, %v1160_v23  ;;  %v1289_v44 = vsub.f32 %v3586_v56, %v1160_v23 }
 0x29a   : > { %6916 = vst [vmem:[#allocation51_spill] sm:$0xff] %v6052_v54  ;;  %v6056_v7 = vpop.eup %3310  ;;  %v2258_v55 = vsub.f32 %v2130_v2, %v1810_v13  ;;  %v2259_v41 = vsub.f32 %v2131_v24, %v1811_v47  ;;  %v2260_v3 = vsub.f32 %v2132_v5, %v1812_v38  ;;  %v2261_v34 = vsub.f32 %v2133_v31, %v1813_v20  ;;  %v1649_v28 = vpop.xlane.xlu0 %1648 }
 0x29b   : > { %6917 = vst [vmem:[#allocation52_spill] sm:$0xff] %v6056_v7  ;;  %v6058_v11 = vpop.eup %3312  ;;  %3326 = vpow2.f32 %v990_v36  ;;  %v996_v35 = vmul.f32 1.442695, %v745_v48  ;;  %v1534_v18 = vmul.f32 1.442695, %v1286_v16  ;;  %v1690_v13 = vadd.f32 %v6014_v39, %v6008_v52 }
 0x29c   : > { %v1536_v45 = vmul.f32 1.442695, %v1287_v32  ;;  %v6060_v33 = vpop.eup %3314  ;;  %v2386_v59 = vmul.f32 %v2258_v55, %v2258_v55  ;;  %v2387_v1 = vmul.f32 %v2259_v41, %v2259_v41  ;;  %v1538_v53 = vmul.f32 1.442695, %v1288_v9 }
 0x29d   : > { %v1540_v12 = vmul.f32 1.442695, %v1289_v44  ;;  %v6062_v23 = vpop.eup %3316  ;;  %3328 = vpow2.f32 %v992_v14  ;;  %v2010_v47 = vadd.f32 %v6028_v43, %v6023_v8  ;;  %v1695_v48 = vadd.f32 %v6052_v54, %v6046_v30 }
 0x29e   : > { %v6070_v36 = vpop.eup %3318  ;;  %v2388_v16 = vmul.f32 %v2260_v3, %v2260_v3  ;;  %v2389_v32 = vmul.f32 %v2261_v34, %v2261_v34  ;;  %v2513_v9 = vadd.f32 %v2512_v51, %v2386_v59  ;;  %3330 = vpow2.f32 %v994_v60  ;;  %v1969_v38 = vpop.xlane.xlu1 %1968  ;;  %v3587_v3 = vld [vmem:[%s3911_s3 + $0x3e0] sm:$0xff]  ;;  %v3588_v60 = vld [vmem:[%s3911_s3 + $0x3e8] sm:$0xff]  ;;  %v6919_v59 = vld [vmem:[#allocation47_spill] sm:$0xff] }
 0x29f   : > { %v6072_v44 = vpop.eup %3320  ;;  %3332 = vpow2.f32 %v996_v35  ;;  %v1691_v14 = vadd.f32 %v6018_v62, %v1690_v13  ;;  %v621_v20 = vpop.xlane.xlu0 %620  ;;  %v2011_v2 = vadd.f32 %v6032_v17, %v2010_v47  ;;  %v6077_v24 = vadd.f32 %v6056_v7, %v1695_v48  ;;  %v6918_v34 = vld [vmem:[#allocation21_spill] sm:$0xff]  ;;  %v3589_v7 = vld [vmem:[%s3911_s3 + $0x3f0] sm:$0xff] }
 0x2a0   : > { %v3323_v5 = vpop.eup %3322  ;;  %v2514_v31 = vadd.f32 %v2513_v9, %v2387_v1  ;;  %3334 = vpow2.f32 %v1534_v18  ;;  %v746_v51 = vsub.f32 %v3587_v3, %v621_v20  ;;  %v747_v56 = vsub.f32 %v3588_v60, %v621_v20  ;;  %v3590_v9 = vld [vmem:[%s3911_s3 + $0x3f8] sm:$0xff] }
 0x2a1   : > { %v1814_v55 = vmul.f32 %v3323_v5, %v5537_v27  ;;  %v1815_v41 = vmul.f32 %v3323_v5, %v5547_v6  ;;  %v1816_v35 = vmul.f32 %v3323_v5, %v6918_v34  ;;  %v1817_v13 = vmul.f32 %v3323_v5, %v6919_v59  ;;  %v6920_v27 = vld [vmem:[#allocation46_spill] sm:$0xff]  ;;  %v6921_v6 = vld [vmem:[#allocation25_spill] sm:$0xff]  ;;  %v6922_v34 = vld [vmem:[#allocation91_spill] sm:$0xff] }
 0x2a2   : > { %v2515_v47 = vadd.f32 %v2514_v31, %v2388_v16  ;;  %3336 = vpow2.f32 %v1536_v45  ;;  %v1692_v48 = vadd.f32 %v6020_v63, %v1691_v14  ;;  %v748_v1 = vsub.f32 %v3589_v7, %v621_v20  ;;  %v1165_v45 = vpop.xlane.xlu1 %1164  ;;  %v6923_v14 = vld [vmem:[#allocation22_spill] sm:$0xff] }
 0x2a3   : > { %v3325_v18 = vpop.eup %3324  ;;  %3338 = vpow2.f32 %v1538_v53  ;;  %v749_v3 = vsub.f32 %v3590_v9, %v621_v20  ;;  %v998_v54 = vmul.f32 1.442695, %v746_v51  ;;  %v1000_v60 = vmul.f32 1.442695, %v747_v56 }
 0x2a4   : > { %v2516_v30 = vadd.f32 %v2515_v47, %v2389_v32  ;;  %v2134_v62 = vmul.f32 %v3325_v18, %v6920_v27  ;;  %v2135_v17 = vmul.f32 %v3325_v18, %v6921_v6  ;;  %v2136_v39 = vmul.f32 %v3325_v18, %v6922_v34  ;;  %1693 = vadd.xlane.f32.xlu0 %v1692_v48  ;;  %v3591_v47 = vld [vmem:[%s3918_s29 + $0x3e0] sm:$0xff] }
 0x2a5   : > { %v6091_v16 = vpop.eup %3326  ;;  %v2137_v7 = vmul.f32 %v3325_v18, %v6923_v14  ;;  %3340 = vpow2.f32 %v1540_v12  ;;  %v1002_v53 = vmul.f32 1.442695, %v748_v1  ;;  %v1004_v5 = vmul.f32 1.442695, %v749_v3 }
 0x2a6   : > { %v2262_v20 = vsub.f32 %v2134_v62, %v1814_v55  ;;  %v2263_v31 = vsub.f32 %v2135_v17, %v1815_v41  ;;  %v2264_v51 = vsub.f32 %v2136_v39, %v1816_v35  ;;  %3342 = vrcp.f32 %v1649_v28  ;;  %v3592_v28 = vld [vmem:[%s3918_s29 + $0x3e8] sm:$0xff]  ;;  %v3593_v55 = vld [vmem:[%s3918_s29 + $0x3f0] sm:$0xff] }
 0x2a7   : > { %v6094_v32 = vpop.eup %3328  ;;  %v2265_v56 = vsub.f32 %v2137_v7, %v1817_v13  ;;  %3344 = vrcp.f32 %v1969_v38  ;;  %v2012_v59 = vadd.f32 %v6037_v58, %v2011_v2  ;;  %v1290_v48 = vsub.f32 %v3591_v47, %v1165_v45  ;;  %v3594_v13 = vld [vmem:[%s3918_s29 + $0x3f8] sm:$0xff] }
 0x2a8   : > { %v6098_v9 = vpop.eup %3330  ;;  %v2390_v12 = vmul.f32 %v2262_v20, %v2262_v20  ;;  %v2391_v1 = vmul.f32 %v2263_v31, %v2263_v31  ;;  %3346 = vpow2.f32 %v998_v54  ;;  %v2015_v39 = vadd.f32 %v6062_v23, %v6060_v33 }
 0x2a9   : > { %v6102_v62 = vpop.eup %3332  ;;  %v2392_v17 = vmul.f32 %v2264_v51, %v2264_v51  ;;  %3348 = vpow2.f32 %v1000_v60  ;;  %2013 = vadd.xlane.f32.xlu1 %v2012_v59  ;;  %v1291_v38 = vsub.f32 %v3592_v28, %v1165_v45  ;;  %v1292_v2 = vsub.f32 %v3593_v55, %v1165_v45  ;;  %v6925_v28 = vld [vmem:[#allocation26_spill] sm:$0xff] }
 0x2aa   : > { %v6106_v41 = vpop.eup %3334  ;;  %v2517_v35 = vadd.f32 %v2516_v30, %v2390_v12  ;;  %3350 = vpow2.f32 %v1002_v53  ;;  %v1293_v18 = vsub.f32 %v3594_v13, %v1165_v45  ;;  %v1542_v3 = vmul.f32 1.442695, %v1290_v48  ;;  %v6927_v13 = vld [vmem:[#allocation48_spill] sm:$0xff] }
 0x2ab   : > { %3352 = vpow2.f32 %v1004_v5  ;;  %v1544_v54 = vmul.f32 1.442695, %v1291_v38  ;;  %v1546_v27 = vmul.f32 1.442695, %v1292_v2  ;;  %v1697_v6 = vadd.f32 %v6058_v11, %v6077_v24  ;;  %v6926_v2 = vld [vmem:[#allocation50_spill] sm:$0xff] }
 0x2ac   : > { %v6111_v34 = vpop.eup %3336  ;;  %v2518_v60 = vadd.f32 %v2517_v35, %v2391_v1  ;;  %3354 = vpow2.f32 %v1542_v3  ;;  %v1548_v14 = vmul.f32 1.442695, %v1293_v18  ;;  %v2016_v7 = vadd.f32 %v6070_v36, %v2015_v39  ;;  %v6928_v3 = vld [vmem:[#allocation49_spill] sm:$0xff] }
 0x2ad   : > { %v6114_v20 = vpop.eup %3338  ;;  %3356 = vpow2.f32 %v1544_v54  ;;  %1698 = vadd.xlane.f32.xlu0 %v1697_v6  ;;  %v1700_v30 = vadd.f32 %v6094_v32, %v6091_v16  ;;  %v2020_v45 = vadd.f32 %v6111_v34, %v6106_v41  ;;  %v2393_v53 = vmul.f32 %v2265_v56, %v2265_v56  ;;  %v6924_v56 = vld [vmem:[#allocation23_spill] sm:$0xff] }
 0x2ae   : > { %v2519_v5 = vadd.f32 %v2518_v60, %v2392_v17  ;;  %v2017_v24 = vadd.f32 %v6072_v44, %v2016_v7  ;;  %3358 = vpow2.f32 %v1546_v27  ;;  %v6929_v27 = vld [vmem:[#allocation29_spill] sm:$0xff]  ;;  %v1974_v60 = vpop.xlane.xlu1 %1973 }
 0x2af   : > { %v6121_v31 = vpop.eup %3340  ;;  %v1701_v51 = vadd.f32 %v6098_v9, %v1700_v30  ;;  %v2021_v59 = vadd.f32 %v6114_v20, %v2020_v45  ;;  %3360 = vpow2.f32 %v1548_v14 }
 0x2b0   : > { %v3343_v47 = vpop.eup %3342  ;;  %v2520_v48 = vadd.f32 %v2519_v5, %v2393_v53  ;;  %2018 = vadd.xlane.f32.xlu1 %v2017_v24  ;;  %v1654_v24 = vpop.xlane.xlu0 %1653  ;;  %3362 = vrcp.f32 %v1974_v60 }
 0x2b1   : > { %v3345_v12 = vpop.eup %3344  ;;  %v1818_v1 = vmul.f32 %v3343_v47, %v5611_v10  ;;  %v1819_v39 = vmul.f32 %v3343_v47, %v5618_v21  ;;  %v1820_v17 = vmul.f32 %v3343_v47, %v6924_v56  ;;  %v1821_v38 = vmul.f32 %v3343_v47, %v6925_v28 }
 0x2b2   : > { %v6129_v55 = vpop.eup %3346  ;;  %v2138_v35 = vmul.f32 %v3345_v12, %v6926_v2  ;;  %v2139_v18 = vmul.f32 %v3345_v12, %v6927_v13  ;;  %v2140_v54 = vmul.f32 %v3345_v12, %v6928_v3  ;;  %v2141_v6 = vmul.f32 %v3345_v12, %v6929_v27 }
 0x2b3   : > { %v6135_v14 = vpop.eup %3348  ;;  %v1702_v10 = vadd.f32 %v6102_v62, %v1701_v51  ;;  %v2022_v21 = vadd.f32 %v6121_v31, %v2021_v59  ;;  %3364 = vrcp.f32 %v1654_v24 }
 0x2b4   : > { %v6139_v7 = vpop.eup %3350  ;;  %v2266_v30 = vsub.f32 %v2138_v35, %v1818_v1  ;;  %v2267_v45 = vsub.f32 %v2139_v18, %v1819_v39  ;;  %v2268_v53 = vsub.f32 %v2140_v54, %v1820_v17  ;;  %v2269_v5 = vsub.f32 %v2141_v6, %v1821_v38 }
 0x2b5   : > { %6930 = vst [vmem:[#allocation53_spill] sm:$0xff] %v6139_v7  ;;  %v6141_v47 = vpop.eup %3352  ;;  %1703 = vadd.xlane.f32.xlu0 %v1702_v10  ;;  %2023 = vadd.xlane.f32.xlu1 %v2022_v21  ;;  %v1705_v12 = vadd.f32 %v6135_v14, %v6129_v55 }
 0x2b6   : > { %6931 = vst [vmem:[#allocation54_spill] sm:$0xff] %v6141_v47  ;;  %v6145_v56 = vpop.eup %3354  ;;  %v2394_v51 = vmul.f32 %v2266_v30, %v2266_v30  ;;  %v2395_v1 = vmul.f32 %v2267_v45, %v2267_v45  ;;  %v2396_v13 = vmul.f32 %v2268_v53, %v2268_v53  ;;  %v2397_v54 = vmul.f32 %v2269_v5, %v2269_v5  ;;  %v6933_v45 = vld [vmem:[#allocation32_spill] sm:$0xff] }
 0x2b7   : > { %v6147_v28 = vpop.eup %3356  ;;  %v1706_v59 = vadd.f32 %v6139_v7, %v1705_v12  ;;  %v1659_v12 = vpop.xlane.xlu0 %1658  ;;  %v6940_v7 = vld [vmem:[#allocation33_spill] sm:$0xff] }
 0x2b8   : > { %v2521_v39 = vadd.f32 %v2520_v48, %v2394_v51  ;;  %v2025_v17 = vadd.f32 %v6147_v28, %v6145_v56  ;;  %v6152_v38 = vpop.eup %3358  ;;  %v6934_v51 = vld [vmem:[#allocation27_spill] sm:$0xff] }
 0x2b9   : > { %v1707_v2 = vadd.f32 %v6141_v47, %v1706_v59  ;;  %v6155_v35 = vpop.eup %3360  ;;  %v1979_v30 = vpop.xlane.xlu1 %1978 }
 0x2ba   : > { %6932 = vst [vmem:[#allocation95_spill] sm:$0xff] %v6155_v35  ;;  %v2522_v18 = vadd.f32 %v2521_v39, %v2395_v1  ;;  %v2026_v3 = vadd.f32 %v6152_v38, %v2025_v17  ;;  %v3363_v48 = vpop.eup %3362  ;;  %3366 = vrcp.f32 %v1979_v30  ;;  %v6935_v1 = vld [vmem:[#allocation92_spill] sm:$0xff]  ;;  %v6939_v30 = vld [vmem:[#allocation39_spill] sm:$0xff] }
 0x2bb   : > { %1708 = vadd.xlane.f32.xlu0 %v1707_v2  ;;  %v2142_v21 = vmul.f32 %v3363_v48, %v5684_v57  ;;  %3368 = vrcp.f32 %v1659_v12  ;;  %v2143_v59 = vmul.f32 %v3363_v48, %v6934_v51  ;;  %v6936_v17 = vld [vmem:[#allocation28_spill] sm:$0xff]  ;;  %v6938_v57 = vld [vmem:[#allocation34_spill] sm:$0xff] }
 0x2bc   : > { %v2523_v27 = vadd.f32 %v2522_v18, %v2396_v13  ;;  %v2027_v6 = vadd.f32 %v6155_v35, %v2026_v3  ;;  %v2144_v2 = vmul.f32 %v3363_v48, %v6936_v17  ;;  %v6937_v18 = vld [vmem:[#allocation93_spill] sm:$0xff] }
 0x2bd   : > { %v3365_v10 = vpop.eup %3364 }
 0x2be   : > { %v2524_v60 = vadd.f32 %v2523_v27, %v2397_v54  ;;  %2028 = vadd.xlane.f32.xlu1 %v2027_v6  ;;  %v1822_v24 = vmul.f32 %v3365_v10, %v6933_v45  ;;  %v1823_v5 = vmul.f32 %v3365_v10, %v6935_v1  ;;  %v1824_v3 = vmul.f32 %v3365_v10, %v6937_v18  ;;  %v6942_v18 = vld [vmem:[#allocation30_spill] sm:$0xff] }
 0x2bf   : > { %v2145_v6 = vmul.f32 %v3363_v48, %v6938_v57  ;;  %v6941_v48 = vld [vmem:[#allocation43_spill] sm:$0xff] }
 0x2c0   : > { %v2270_v53 = vsub.f32 %v2142_v21, %v1822_v24  ;;  %v2271_v13 = vsub.f32 %v2143_v59, %v1823_v5  ;;  %v2272_v47 = vsub.f32 %v2144_v2, %v1824_v3  ;;  %v1825_v21 = vmul.f32 %v3365_v10, %v6939_v30 }
 0x2c2   : > { %v2398_v39 = vmul.f32 %v2270_v53, %v2270_v53  ;;  %v2399_v45 = vmul.f32 %v2271_v13, %v2271_v13  ;;  %v2273_v1 = vsub.f32 %v2145_v6, %v1825_v21  ;;  %v2400_v53 = vmul.f32 %v2272_v47, %v2272_v47 }
 0x2c3   : > { %v1664_v59 = vpop.xlane.xlu0 %1663 }
 0x2c4   : > { %v2525_v54 = vadd.f32 %v2524_v60, %v2398_v39  ;;  %v3367_v27 = vpop.eup %3366  ;;  %v2401_v39 = vmul.f32 %v2273_v1, %v2273_v1 }
 0x2c5   : > { %v3369_v35 = vpop.eup %3368  ;;  %v2146_v12 = vmul.f32 %v3367_v27, %v5733_v0  ;;  %v2147_v2 = vmul.f32 %v3367_v27, %v6941_v48 }
 0x2c6   : > { %v2526_v24 = vadd.f32 %v2525_v54, %v2399_v45  ;;  %v1984_v51 = vpop.xlane.xlu1 %1983  ;;  %v1826_v17 = vmul.f32 %v3369_v35, %v6940_v7  ;;  %v1827_v3 = vmul.f32 %v3369_v35, %v6942_v18  ;;  %v6943_v54 = vld [vmem:[#allocation38_spill] sm:$0xff]  ;;  %v6944_v45 = vld [vmem:[#allocation31_spill] sm:$0xff] }
 0x2c7   : > { %3370 = vrcp.f32 %v1984_v51  ;;  %v2148_v57 = vmul.f32 %v3367_v27, %v6943_v54  ;;  %v1828_v6 = vmul.f32 %v3369_v35, %v6944_v45  ;;  %v6945_v7 = vld [vmem:[#allocation42_spill] sm:$0xff] }
 0x2c8   : > { %v2527_v5 = vadd.f32 %v2526_v24, %v2400_v53  ;;  %v2274_v60 = vsub.f32 %v2146_v12, %v1826_v17  ;;  %3372 = vrcp.f32 %v1664_v59  ;;  %v2275_v0 = vsub.f32 %v2147_v2, %v1827_v3  ;;  %v6946_v53 = vld [vmem:[#allocation37_spill] sm:$0xff] }
 0x2c9   : > { %v2149_v21 = vmul.f32 %v3367_v27, %v6945_v7  ;;  %v2276_v51 = vsub.f32 %v2148_v57, %v1828_v6  ;;  %v1829_v1 = vmul.f32 %v3369_v35, %v6946_v53 }
 0x2ca   : > { %v2528_v13 = vadd.f32 %v2527_v5, %v2401_v39  ;;  %v2402_v10 = vmul.f32 %v2274_v60, %v2274_v60  ;;  %v2403_v24 = vmul.f32 %v2275_v0, %v2275_v0 }
 0x2cb   : > { %v2277_v39 = vsub.f32 %v2149_v21, %v1829_v1  ;;  %v2404_v60 = vmul.f32 %v2276_v51, %v2276_v51  ;;  %v6947_v51 = vld [vmem:[#allocation44_spill] sm:$0xff] }
 0x2cc   : > { %v2529_v47 = vadd.f32 %v2528_v13, %v2402_v10 }
 0x2cd   : > { %v2405_v3 = vmul.f32 %v2277_v39, %v2277_v39 }
 0x2ce   : > { %v2530_v17 = vadd.f32 %v2529_v47, %v2403_v24 }
 0x2cf   : > { %v1669_v2 = vpop.xlane.xlu0 %1668 }
 0x2d0   : > { %v2531_v18 = vadd.f32 %v2530_v17, %v2404_v60 }
 0x2d1   : > { %v3371_v30 = vpop.eup %3370 }
 0x2d2   : > { %v3373_v12 = vpop.eup %3372  ;;  %v2150_v59 = vmul.f32 %v3371_v30, %v5780_v19  ;;  %v2151_v27 = vmul.f32 %v3371_v30, %v5784_v15  ;;  %v2532_v10 = vadd.f32 %v2531_v18, %v2405_v3  ;;  %v2152_v57 = vmul.f32 %v3371_v30, %v5786_v37 }
 0x2d3   : > { %v1989_v5 = vpop.xlane.xlu1 %1988  ;;  %v1830_v48 = vmul.f32 %v3373_v12, %v5766_v50  ;;  %v1831_v54 = vmul.f32 %v3373_v12, %v5771_v29  ;;  %v1832_v0 = vmul.f32 %v3373_v12, %v5773_v22  ;;  %v2153_v50 = vmul.f32 %v3371_v30, %v5791_v4  ;;  %v6949_v4 = vld [vmem:[#allocation59_spill] sm:$0xff] }
 0x2d4   : > { %3374 = vrcp.f32 %v1989_v5  ;;  %v1833_v24 = vmul.f32 %v3373_v12, %v6947_v51 }
 0x2d5   : > { %v2278_v13 = vsub.f32 %v2150_v59, %v1830_v48  ;;  %3376 = vrcp.f32 %v1669_v2  ;;  %v2279_v19 = vsub.f32 %v2151_v27, %v1831_v54  ;;  %v2280_v47 = vsub.f32 %v2152_v57, %v1832_v0  ;;  %v6948_v59 = vld [vmem:[#allocation40_spill] sm:$0xff]  ;;  %v6950_v2 = vld [vmem:[#allocation35_spill] sm:$0xff] }
 0x2d6   : > { %v2281_v17 = vsub.f32 %v2153_v50, %v1833_v24 }
 0x2d7   : > { %v2406_v35 = vmul.f32 %v2278_v13, %v2278_v13  ;;  %v2407_v7 = vmul.f32 %v2279_v19, %v2279_v19  ;;  %v2408_v37 = vmul.f32 %v2280_v47, %v2280_v47  ;;  %v6951_v13 = vld [vmem:[#allocation60_spill] sm:$0xff]  ;;  %v6953_v19 = vld [vmem:[#allocation61_spill] sm:$0xff] }
 0x2d8   : > { %v2409_v60 = vmul.f32 %v2281_v17, %v2281_v17 }
 0x2d9   : > { %v2533_v45 = vadd.f32 %v2532_v10, %v2406_v35  ;;  %v6952_v10 = vld [vmem:[#allocation36_spill] sm:$0xff] }
 0x2db   : > { %v2534_v53 = vadd.f32 %v2533_v45, %v2407_v7  ;;  %v6954_v7 = vld [vmem:[#allocation41_spill] sm:$0xff] }
 0x2dd   : > { %v2535_v22 = vadd.f32 %v2534_v53, %v2408_v37  ;;  %v6955_v53 = vld [vmem:[#allocation62_spill] sm:$0xff] }
 0x2de   : > { %v3375_v6 = vpop.eup %3374 }
 0x2df   : > { %v3377_v21 = vpop.eup %3376  ;;  %v2154_v15 = vmul.f32 %v3375_v6, %v5813_v61  ;;  %v2155_v30 = vmul.f32 %v3375_v6, %v6949_v4  ;;  %v2536_v48 = vadd.f32 %v2535_v22, %v2409_v60  ;;  %v2156_v3 = vmul.f32 %v3375_v6, %v6951_v13  ;;  %v6957_v60 = vld [vmem:[#allocation63_spill] sm:$0xff] }
 0x2e0   : > { %v1834_v5 = vmul.f32 %v3377_v21, %v6948_v59  ;;  %v1835_v18 = vmul.f32 %v3377_v21, %v6950_v2  ;;  %v1836_v54 = vmul.f32 %v3377_v21, %v6952_v10  ;;  %v2157_v0 = vmul.f32 %v3375_v6, %v6953_v19  ;;  %v6956_v59 = vld [vmem:[#allocation66_spill] sm:$0xff] }
 0x2e1   : > { %v1837_v51 = vmul.f32 %v3377_v21, %v6954_v7 }
 0x2e2   : > { %v2282_v39 = vsub.f32 %v2154_v15, %v1834_v5  ;;  %v2283_v61 = vsub.f32 %v2155_v30, %v1835_v18  ;;  %v2284_v45 = vsub.f32 %v2156_v3, %v1836_v54  ;;  %v6959_v18 = vld [vmem:[#allocation64_spill] sm:$0xff] }
 0x2e3   : > { %v6960_v3 = vld [vmem:[#allocation68_spill] sm:$0xff] }
 0x2e4   : > { %v2410_v12 = vmul.f32 %v2282_v39, %v2282_v39  ;;  %v2411_v50 = vmul.f32 %v2283_v61, %v2283_v61 }
 0x2e6   : > { %v2537_v35 = vadd.f32 %v2536_v48, %v2410_v12  ;;  %v6958_v48 = vld [vmem:[#allocation67_spill] sm:$0xff] }
 0x2e8   : > { %v2538_v24 = vadd.f32 %v2537_v35, %v2411_v50  ;;  %v6961_v35 = vld [vmem:[#allocation65_spill] sm:$0xff] }
 0x2e9   : > { %v1674_v1 = vpop.xlane.xlu0 %1673 }
 0x2ef   : > { %v1994_v29 = vpop.xlane.xlu1 %1993 }
 0x2f0   : > { %3378 = vrcp.f32 %v1994_v29  ;;  %v2412_v29 = vmul.f32 %v2284_v45, %v2284_v45 }
 0x2f1   : > { %3380 = vrcp.f32 %v1674_v1  ;;  %v2285_v1 = vsub.f32 %v2157_v0, %v1837_v51 }
 0x2f2   : > { %v2539_v37 = vadd.f32 %v2538_v24, %v2412_v29 }
 0x2f3   : > { %v2413_v39 = vmul.f32 %v2285_v1, %v2285_v1  ;;  %v6962_v1 = vld [vmem:[#allocation72_spill] sm:$0xff] }
 0x2f5   : > { %v2540_v30 = vadd.f32 %v2539_v37, %v2413_v39 }
 0x2fa   : > { %v3379_v27 = vpop.eup %3378 }
 0x2fb   : > { %v3381_v57 = vpop.eup %3380  ;;  %v2158_v47 = vmul.f32 %v3379_v27, %v5865_v49  ;;  %v2159_v5 = vmul.f32 %v3379_v27, %v6956_v59  ;;  %v2160_v49 = vmul.f32 %v3379_v27, %v6958_v48  ;;  %v2161_v61 = vmul.f32 %v3379_v27, %v6960_v3  ;;  %v6963_v27 = vld [vmem:[#allocation69_spill] sm:$0xff] }
 0x2fc   : > { %v1838_v15 = vmul.f32 %v3381_v57, %v6955_v53  ;;  %v1839_v4 = vmul.f32 %v3381_v57, %v6957_v60  ;;  %v1840_v12 = vmul.f32 %v3381_v57, %v6959_v18  ;;  %v1841_v19 = vmul.f32 %v3381_v57, %v6961_v35  ;;  %v6964_v57 = vld [vmem:[#allocation73_spill] sm:$0xff] }
 0x2fe   : > { %v2286_v17 = vsub.f32 %v2158_v47, %v1838_v15  ;;  %v2287_v2 = vsub.f32 %v2159_v5, %v1839_v4  ;;  %v2288_v10 = vsub.f32 %v2160_v49, %v1840_v12  ;;  %v2289_v45 = vsub.f32 %v2161_v61, %v1841_v19 }
 0x300   : > { %v2414_v6 = vmul.f32 %v2286_v17, %v2286_v17  ;;  %v2415_v54 = vmul.f32 %v2287_v2, %v2287_v2  ;;  %v2416_v50 = vmul.f32 %v2288_v10, %v2288_v10  ;;  %v2417_v24 = vmul.f32 %v2289_v45, %v2289_v45  ;;  %v6968_v45 = vld [vmem:[#allocation75_spill] sm:$0xff] }
 0x302   : > { %v2541_v13 = vadd.f32 %v2540_v30, %v2414_v6  ;;  %v6965_v6 = vld [vmem:[#allocation70_spill] sm:$0xff] }
 0x304   : > { %v2542_v0 = vadd.f32 %v2541_v13, %v2415_v54 }
 0x305   : > { %v1679_v22 = vpop.xlane.xlu0 %1678 }
 0x306   : > { %3382 = vrcp.f32 %v1679_v22  ;;  %v2543_v7 = vadd.f32 %v2542_v0, %v2416_v50 }
 0x308   : > { %v1999_v21 = vpop.xlane.xlu1 %1998  ;;  %v2544_v37 = vadd.f32 %v2543_v7, %v2417_v24  ;;  %v6969_v7 = vld [vmem:[#allocation76_spill] sm:$0xff] }
 0x309   : > { %3384 = vrcp.f32 %v1999_v21  ;;  %v6967_v21 = vld [vmem:[#allocation71_spill] sm:$0xff] }
 0x310   : > { %v3383_v47 = vpop.eup %3382 }
 0x311   : > { %v1842_v53 = vmul.f32 %v3383_v47, %v5890_v26  ;;  %v1843_v59 = vmul.f32 %v3383_v47, %v6963_v27  ;;  %v1844_v30 = vmul.f32 %v3383_v47, %v6965_v6  ;;  %v6966_v26 = vld [vmem:[#allocation74_spill] sm:$0xff]  ;;  %v1845_v18 = vmul.f32 %v3383_v47, %v6967_v21 }
 0x313   : > { %v3385_v51 = vpop.eup %3384 }
 0x314   : > { %v2162_v15 = vmul.f32 %v3385_v51, %v5901_v46  ;;  %v2163_v29 = vmul.f32 %v3385_v51, %v6962_v1  ;;  %v2164_v22 = vmul.f32 %v3385_v51, %v6964_v57  ;;  %v2165_v49 = vmul.f32 %v3385_v51, %v6966_v26  ;;  %v6970_v51 = vld [vmem:[#allocation78_spill] sm:$0xff] }
 0x316   : > { %v2290_v5 = vsub.f32 %v2162_v15, %v1842_v53  ;;  %v2291_v39 = vsub.f32 %v2163_v29, %v1843_v59  ;;  %v2292_v46 = vsub.f32 %v2164_v22, %v1844_v30  ;;  %v2293_v3 = vsub.f32 %v2165_v49, %v1845_v18  ;;  %v6971_v15 = vld [vmem:[#allocation79_spill] sm:$0xff]  ;;  %v6973_v49 = vld [vmem:[#allocation80_spill] sm:$0xff] }
 0x317   : > { %v1684_v17 = vpop.xlane.xlu0 %1683 }
 0x318   : > { %3386 = vrcp.f32 %v1684_v17  ;;  %v2418_v60 = vmul.f32 %v2290_v5, %v2290_v5  ;;  %v2419_v2 = vmul.f32 %v2291_v39, %v2291_v39  ;;  %v2420_v61 = vmul.f32 %v2292_v46, %v2292_v46 }
 0x319   : > { %v2421_v0 = vmul.f32 %v2293_v3, %v2293_v3 }
 0x31a   : > { %v2004_v4 = vpop.xlane.xlu1 %2003  ;;  %v2545_v48 = vadd.f32 %v2544_v37, %v2418_v60 }
 0x31b   : > { %3388 = vrcp.f32 %v2004_v4  ;;  %v6972_v4 = vld [vmem:[#allocation77_spill] sm:$0xff] }
 0x31c   : > { %v2546_v12 = vadd.f32 %v2545_v48, %v2419_v2  ;;  %v6974_v2 = vld [vmem:[#allocation84_spill] sm:$0xff] }
 0x31e   : > { %v2547_v54 = vadd.f32 %v2546_v12, %v2420_v61 }
 0x31f   : > { %v1689_v13 = vpop.xlane.xlu0 %1688 }
 0x320   : > { %3390 = vrcp.f32 %v1689_v13  ;;  %v2548_v47 = vadd.f32 %v2547_v54, %v2421_v0  ;;  %v6975_v13 = vld [vmem:[#allocation87_spill] sm:$0xff]  ;;  %v6976_v54 = vld [vmem:[#allocation81_spill] sm:$0xff]  ;;  %v6977_v0 = vld [vmem:[#allocation88_spill] sm:$0xff] }
 0x322   : > { %v3387_v10 = vpop.eup %3386 }
 0x323   : > { %v1846_v50 = vmul.f32 %v3387_v10, %v6968_v45  ;;  %v1847_v24 = vmul.f32 %v3387_v10, %v6969_v7  ;;  %v1848_v27 = vmul.f32 %v3387_v10, %v5935_v42  ;;  %v1849_v6 = vmul.f32 %v3387_v10, %v6972_v4 }
 0x324   : > { %v2009_v35 = vpop.xlane.xlu1 %2008 }
 0x325   : > { %v3389_v19 = vpop.eup %3388  ;;  %3392 = vrcp.f32 %v2009_v35 }
 0x326   : > { %v2166_v53 = vmul.f32 %v3389_v19, %v6970_v51  ;;  %v2167_v1 = vmul.f32 %v3389_v19, %v6971_v15  ;;  %v2168_v29 = vmul.f32 %v3389_v19, %v5948_v40  ;;  %v2169_v5 = vmul.f32 %v3389_v19, %v5954_v25  ;;  %v6979_v15 = vld [vmem:[#allocation89_spill] sm:$0xff] }
 0x328   : > { %v2294_v17 = vsub.f32 %v2166_v53, %v1846_v50  ;;  %v2295_v37 = vsub.f32 %v2167_v1, %v1847_v24  ;;  %v2296_v57 = vsub.f32 %v2168_v29, %v1848_v27  ;;  %v2297_v21 = vsub.f32 %v2169_v5, %v1849_v6  ;;  %v6978_v24 = vld [vmem:[#allocation82_spill] sm:$0xff] }
 0x32a   : > { %v2422_v59 = vmul.f32 %v2294_v17, %v2294_v17  ;;  %v2423_v22 = vmul.f32 %v2295_v37, %v2295_v37  ;;  %v3391_v60 = vpop.eup %3390  ;;  %v2424_v26 = vmul.f32 %v2296_v57, %v2296_v57  ;;  %v2425_v25 = vmul.f32 %v2297_v21, %v2297_v21  ;;  %v6980_v37 = vld [vmem:[#allocation83_spill] sm:$0xff] }
 0x32b   : > { %v1850_v46 = vmul.f32 %v3391_v60, %v6973_v49  ;;  %v1851_v35 = vmul.f32 %v3391_v60, %v6976_v54  ;;  %v1852_v51 = vmul.f32 %v3391_v60, %v6978_v24  ;;  %v1853_v27 = vmul.f32 %v3391_v60, %v6980_v37  ;;  %v6982_v60 = vld [vmem:[#allocation86_spill] sm:$0xff] }
 0x32c   : > { %v2549_v39 = vadd.f32 %v2548_v47, %v2422_v59 }
 0x32e   : > { %v2550_v30 = vadd.f32 %v2549_v39, %v2423_v22 }
 0x32f   : > { %v3393_v48 = vpop.eup %3392 }
 0x330   : > { %v2170_v40 = vmul.f32 %v3393_v48, %v6974_v2  ;;  %v2551_v42 = vadd.f32 %v2550_v30, %v2424_v26  ;;  %v2171_v3 = vmul.f32 %v3393_v48, %v6975_v13  ;;  %v2172_v45 = vmul.f32 %v3393_v48, %v6977_v0 }
 0x331   : > { %v1694_v18 = vpop.xlane.xlu0 %1693  ;;  %v2173_v1 = vmul.f32 %v3393_v48, %v6979_v15 }
 0x332   : > { %v2298_v12 = vsub.f32 %v2170_v40, %v1850_v46  ;;  %3394 = vrcp.f32 %v1694_v18  ;;  %v2552_v10 = vadd.f32 %v2551_v42, %v2425_v25  ;;  %v2299_v50 = vsub.f32 %v2171_v3, %v1851_v35  ;;  %v6981_v46 = vld [vmem:[#allocation85_spill] sm:$0xff] }
 0x333   : > { %v2300_v47 = vsub.f32 %v2172_v45, %v1852_v51  ;;  %v2301_v57 = vsub.f32 %v2173_v1, %v1853_v27  ;;  %v6984_v45 = vld [vmem:[#allocation94_spill] sm:$0xff] }
 0x334   : > { %v2426_v19 = vmul.f32 %v2298_v12, %v2298_v12  ;;  %v2427_v29 = vmul.f32 %v2299_v50, %v2299_v50 }
 0x335   : > { %v2428_v22 = vmul.f32 %v2300_v47, %v2300_v47  ;;  %v2429_v21 = vmul.f32 %v2301_v57, %v2301_v57 }
 0x336   : > { %v2014_v61 = vpop.xlane.xlu1 %2013  ;;  %v2553_v53 = vadd.f32 %v2552_v10, %v2426_v19 }
 0x337   : > { %3396 = vrcp.f32 %v2014_v61 }
 0x338   : > { %v2554_v59 = vadd.f32 %v2553_v53, %v2427_v29 }
 0x33a   : > { %v1699_v7 = vpop.xlane.xlu0 %1698  ;;  %v2555_v48 = vadd.f32 %v2554_v59, %v2428_v22 }
 0x33b   : > { %3398 = vrcp.f32 %v1699_v7 }
 0x33c   : > { %v3395_v5 = vpop.eup %3394  ;;  %v2556_v42 = vadd.f32 %v2555_v48, %v2429_v21 }
 0x33d   : > { %v2019_v17 = vpop.xlane.xlu1 %2018  ;;  %v1854_v6 = vmul.f32 %v3395_v5, %v6008_v52  ;;  %v1855_v2 = vmul.f32 %v3395_v5, %v6981_v46  ;;  %v6983_v52 = vld [vmem:[#allocation90_spill] sm:$0xff]  ;;  %v1857_v54 = vmul.f32 %v3395_v5, %v6020_v63 }
 0x33e   : > { %3400 = vrcp.f32 %v2019_v17  ;;  %v1856_v61 = vmul.f32 %v3395_v5, %v6983_v52  ;;  %v6986_v5 = vld [vmem:[#allocation52_spill] sm:$0xff] }
 0x341   : > { %v3397_v39 = vpop.eup %3396 }
 0x342   : > { %v2024_v4 = vpop.xlane.xlu1 %2023  ;;  %v2174_v30 = vmul.f32 %v3397_v39, %v6023_v8  ;;  %v2175_v26 = vmul.f32 %v3397_v39, %v6028_v43  ;;  %v1704_v49 = vpop.xlane.xlu0 %1703  ;;  %v2176_v18 = vmul.f32 %v3397_v39, %v6982_v60  ;;  %v2177_v8 = vmul.f32 %v3397_v39, %v6037_v58  ;;  %v6985_v58 = vld [vmem:[#allocation51_spill] sm:$0xff] }
 0x343   : > { %3402 = vrcp.f32 %v2024_v4 }
 0x344   : > { %v2302_v40 = vsub.f32 %v2174_v30, %v1854_v6  ;;  %v2303_v12 = vsub.f32 %v2175_v26, %v1855_v2  ;;  %3404 = vrcp.f32 %v1704_v49  ;;  %v2304_v35 = vsub.f32 %v2176_v18, %v1856_v61 }
 0x345   : > { %v3399_v13 = vpop.eup %3398  ;;  %v2305_v24 = vsub.f32 %v2177_v8, %v1857_v54 }
 0x346   : > { %v2430_v3 = vmul.f32 %v2302_v40, %v2302_v40  ;;  %v2431_v19 = vmul.f32 %v2303_v12, %v2303_v12  ;;  %v1858_v50 = vmul.f32 %v3399_v13, %v6984_v45  ;;  %v2432_v1 = vmul.f32 %v2304_v35, %v2304_v35 }
 0x347   : > { %v2433_v29 = vmul.f32 %v2305_v24, %v2305_v24  ;;  %v1860_v57 = vmul.f32 %v3399_v13, %v6986_v5  ;;  %v6989_v24 = vld [vmem:[#allocation54_spill] sm:$0xff] }
 0x348   : > { %v3401_v25 = vpop.eup %3400  ;;  %v2557_v10 = vadd.f32 %v2556_v42, %v2430_v3  ;;  %v1709_v7 = vpop.xlane.xlu0 %1708 }
 0x349   : > { %v2178_v43 = vmul.f32 %v3401_v25, %v6060_v33  ;;  %v2179_v15 = vmul.f32 %v3401_v25, %v6062_v23  ;;  %v1859_v33 = vmul.f32 %v3399_v13, %v6985_v58  ;;  %v2180_v63 = vmul.f32 %v3401_v25, %v6070_v36 }
 0x34a   : > { %v2558_v51 = vadd.f32 %v2557_v10, %v2431_v19  ;;  %v2181_v27 = vmul.f32 %v3401_v25, %v6072_v44  ;;  %v1861_v23 = vmul.f32 %v3399_v13, %v6058_v11  ;;  %v6987_v19 = vld [vmem:[#allocation53_spill] sm:$0xff] }
 0x34b   : > { %v2029_v0 = vpop.xlane.xlu1 %2028  ;;  %v2306_v53 = vsub.f32 %v2178_v43, %v1858_v50  ;;  %v2307_v39 = vsub.f32 %v2179_v15, %v1859_v33  ;;  %v2308_v30 = vsub.f32 %v2180_v63, %v1860_v57 }
 0x34c   : > { %3406 = vrcp.f32 %v2029_v0  ;;  %v2559_v17 = vadd.f32 %v2558_v51, %v2432_v1  ;;  %v2309_v26 = vsub.f32 %v2181_v27, %v1861_v23 }
 0x34d   : > { %v3403_v47 = vpop.eup %3402  ;;  %3408 = vrcp.f32 %v1709_v7  ;;  %v2434_v59 = vmul.f32 %v2306_v53, %v2306_v53  ;;  %v2435_v46 = vmul.f32 %v2307_v39, %v2307_v39  ;;  %v2436_v21 = vmul.f32 %v2308_v30, %v2308_v30 }
 0x34e   : > { %v3405_v37 = vpop.eup %3404  ;;  %v2182_v22 = vmul.f32 %v3403_v47, %v6106_v41  ;;  %v2560_v4 = vadd.f32 %v2559_v17, %v2433_v29  ;;  %v2183_v36 = vmul.f32 %v3403_v47, %v6111_v34  ;;  %v2184_v40 = vmul.f32 %v3403_v47, %v6114_v20 }
 0x34f   : > { %v1862_v6 = vmul.f32 %v3405_v37, %v6091_v16  ;;  %v1863_v44 = vmul.f32 %v3405_v37, %v6094_v32  ;;  %v1864_v18 = vmul.f32 %v3405_v37, %v6098_v9  ;;  %v2185_v11 = vmul.f32 %v3403_v47, %v6121_v31 }
 0x350   : > { %v2561_v48 = vadd.f32 %v2560_v4, %v2434_v59  ;;  %v2437_v16 = vmul.f32 %v2309_v26, %v2309_v26  ;;  %v1865_v3 = vmul.f32 %v3405_v37, %v6102_v62  ;;  %v6988_v62 = vld [vmem:[#allocation95_spill] sm:$0xff] }
 0x351   : > { %v2310_v49 = vsub.f32 %v2182_v22, %v1862_v6  ;;  %v2311_v42 = vsub.f32 %v2183_v36, %v1863_v44  ;;  %v2312_v32 = vsub.f32 %v2184_v40, %v1864_v18 }
 0x352   : > { %v2562_v41 = vadd.f32 %v2561_v48, %v2435_v46  ;;  %v2313_v20 = vsub.f32 %v2185_v11, %v1865_v3 }
 0x353   : > { %v2438_v13 = vmul.f32 %v2310_v49, %v2310_v49  ;;  %v2439_v43 = vmul.f32 %v2311_v42, %v2311_v42 }
 0x354   : > { %v2563_v34 = vadd.f32 %v2562_v41, %v2436_v21  ;;  %v2441_v0 = vmul.f32 %v2313_v20, %v2313_v20 }
 0x356   : > { %v3407_v2 = vpop.eup %3406  ;;  %v2564_v52 = vadd.f32 %v2563_v34, %v2437_v16 }
 0x357   : > { %v3409_v60 = vpop.eup %3408  ;;  %v2186_v12 = vmul.f32 %v3407_v2, %v6145_v56  ;;  %v2187_v61 = vmul.f32 %v3407_v2, %v6147_v28  ;;  %v2188_v54 = vmul.f32 %v3407_v2, %v6152_v38  ;;  %v2440_v56 = vmul.f32 %v2312_v32, %v2312_v32 }
 0x358   : > { %v1866_v25 = vmul.f32 %v3409_v60, %v6129_v55  ;;  %v2565_v9 = vadd.f32 %v2564_v52, %v2438_v13  ;;  %v1867_v31 = vmul.f32 %v3409_v60, %v6135_v14  ;;  %v1868_v10 = vmul.f32 %v3409_v60, %v6987_v19 }
 0x359   : > { %v2189_v45 = vmul.f32 %v3407_v2, %v6988_v62  ;;  %v1869_v51 = vmul.f32 %v3409_v60, %v6989_v24 }
 0x35a   : > { %v2314_v8 = vsub.f32 %v2186_v12, %v1866_v25  ;;  %v2566_v35 = vadd.f32 %v2565_v9, %v2439_v43  ;;  %v2315_v55 = vsub.f32 %v2187_v61, %v1867_v31  ;;  %v2316_v28 = vsub.f32 %v2188_v54, %v1868_v10 }
 0x35b   : > { %v2317_v15 = vsub.f32 %v2189_v45, %v1869_v51 }
 0x35c   : > { %v2442_v50 = vmul.f32 %v2314_v8, %v2314_v8  ;;  %v2567_v7 = vadd.f32 %v2566_v35, %v2440_v56  ;;  %v2443_v1 = vmul.f32 %v2315_v55, %v2315_v55  ;;  %v2444_v47 = vmul.f32 %v2316_v28, %v2316_v28 }
 0x35d   : > { %v2445_v58 = vmul.f32 %v2317_v15, %v2317_v15 }
 0x35e   : > { %v2568_v53 = vadd.f32 %v2567_v7, %v2441_v0 }
 0x360   : > { %v2569_v14 = vadd.f32 %v2568_v53, %v2442_v50 }
 0x362   : > { %v2570_v38 = vadd.f32 %v2569_v14, %v2443_v1 }
 0x364   : > { %v2571_v33 = vadd.f32 %v2570_v38, %v2444_v47 }
 0x366   : > { %v2572_v63 = vadd.f32 %v2571_v33, %v2445_v58 }
 0x368   : > { %2573 = vadd.xlane.f32.xlu0 %v2572_v63 }
 0x3f5   : > { %v2574_v29 = vpop.xlane.xlu0 %2573 }
 0x3f6   : > { %v2575_v17 = vrot.slane %v2574_v29, 4 }
 0x3f8   : > { %v2576_v37 = vadd.f32 %v2575_v17, %v2574_v29 }
 0x3fa   : > { %v2577_v27 = vrot.slane %v2576_v37, 2 }
 0x3fc   : > { %v2578_v59 = vadd.f32 %v2577_v27, %v2576_v37 }
 0x3fe   : > { %v2579_v5 = vrot.slane %v2578_v59, 1 }
 0x400   : > { %v2580_v57 = vadd.f32 %v2579_v5, %v2578_v59 }
 0x402   : > { %2715 = vpush %v2580_v57 }
 0x433   : > { %s2716_s17 = spop %2715 }
 0x434   : > { %v2582_v22 = vstv %s2716_s17 }
 0x435   : > { %2584 = vst [vmem:[%s203_s5] sm:$0xff] %v2582_v22 }
 0x436   : > { %3668 = shalt.err (!%p3665_p11)
}
 0x437   : > { %s3669_s16 = scalar_lea.hbm %s6262_s26, 128  ;;  %s3673_s19 = scalar_lea.hbm %s6306_s2, 256 }
 0x438   : > { %p3670_p3 = scmp.ne.s32.totalorder %s6262_s26, %s3669_s16  ;;  %p3674_p2 = scmp.lt.u32.totalorder %s6262_s26, %s6306_s2 }
 0x439   : > { %p3675_p4 = scmp.lt.u32.totalorder %s3673_s19, %s3669_s16  ;;  %p3677_p13 = scmp.lt.u32.totalorder %s3669_s16, %s6262_s26 }
 0x43a   : > { %p3671_p8 = pnand %p3670_p3, %p6990_p1 }
 0x43b   : > { %p3676_p6 = por %p3675_p4, %p3674_p2 }
 0x43c   : > { %p3672_p0 = pneg %p3671_p8 }
 0x43d   : > { %p3678_p12 = por %p3677_p13, %p3676_p6 }
 0x43f   : > { %p3679_p10 = pnand %p3678_p12, %p3672_p0 }
 0x441   : > { %3682 = shalt.err (!%p3679_p10)
}
 0x442   : > { %2721 = dma.vmem_to_hbm [thread:$0]  (%p6990_p1), %s6257_s6, 128, %s6262_s26, %s2586_s27  }
 0x443 PF: > { %s2611_s29 = sand.u32 1, %s3713_s9   ;;  %p6991_p5 = scmp.ne.s32.totalorder %s6526_s22, 0 }
 0x444   : > { %p6992_p7 = scmp.ge.s32.totalorder %s3725_s12, 2  ;;  %s2612_s20 = scalar_lea.sflag [#allocation4], %s2611_s29 }
 0x446   : > { %p2731_p9 = pnand %p6992_p7, %p6991_p5 }
 0x448   : > { %3708 = dma.done.wait (!%p2731_p9), %s2612_s20, 128  }
 0x449   : > { %3710 = vsyncadd (!%p2731_p9), %s2612_s20, 4294967168  ;;  %p18_p11 = scmp.ge.s32.totalorder %s3772_s15, 4   ;;  %s6993_s9 = smov %s3717_s10 }
 0x44a   : > { %s6994_s10 = smov %s3721_s11  ;;  %s6995_s11 = smov %s3784_s18 }
 0x44b   : > { %s6996_s12 = smov %s3772_s15  ;;  %20 = sbr.rel (!%p18_p11) target bundleno = 7 (0x7), region = 86 }
 0x452   :  { %2617 = vsyncpa [#allocation3], 1 }
 0x453   :  { %2619 = vsyncpa [#allocation3 + $0x1], 1 }
 0x454   :  { %2620 = vsyncpa [#allocation6], 1 }
 0x455   :  { %2622 = vsyncpa [#allocation6 + $0x1], 1 }
 0x456   :  { %2623 = vsyncpa [#allocation4], 1 }
 0x457   :  { %2625 = vsyncpa [#allocation4 + $0x1], 1 }

</bundles_post_ra>
